<compile_context>
chip_gen: v7x
topology: tpu7x:2x2x1
jax: 0.10.0
libtpu: 0.0.40
codegen_flags: <defaults>
</compile_context>

<pallas_src>
import jax
import jax.numpy as jnp
from jax.experimental import pallas as pl
from jax.experimental.pallas import tpu as pltpu  # noqa: F401  (kept for parity)

EPS = 1e-5


def bn_relu_conv1x1_kernel(x_ref, gamma_ref, beta_ref, w_ref, o_ref):
    # x_ref:     [NHW, Cin]   lane-dense activation (whole tensor in VMEM)
    # gamma_ref: [1, Cin]
    # beta_ref:  [1, Cin]
    # w_ref:     [Cout, Cin]  conv weight in its natural (OIHW-reshaped) layout
    # o_ref:     [NHW, Cout]
    x = x_ref[...]
    inv_n = 1.0 / x.shape[0]

    # ---- BatchNorm batch statistics (per channel, over the NHW rows) ----
    # Sublane-axis reductions -> cheap VPU adds + one small XLU fold per lane tile.
    s = jnp.sum(x, axis=0, keepdims=True)             # [1, Cin]
    ss = jnp.sum(x * x, axis=0, keepdims=True)        # [1, Cin]
    mean = s * inv_n
    var = jnp.maximum(ss * inv_n - mean * mean, 0.0)  # biased var, clamped >= 0
    inv = jax.lax.rsqrt(var + EPS)
    scale = gamma_ref[...] * inv                      # [1, Cin]
    shift = beta_ref[...] - mean * scale              # [1, Cin]

    # ---- Affine + ReLU (full 128-lane vregs) ----
    xr = jnp.maximum(x * scale + shift, 0.0)          # [NHW, Cin]

    # ---- 1x1 conv == NT matmul on the MXU ----
    # out[n, co] = sum_ci xr[n, ci] * w[co, ci]   (same pattern as q @ k^T)
    o_ref[...] = jax.lax.dot_general(
        xr, w_ref[...],
        dimension_numbers=(((1,), (1,)), ((), ())),
        preferred_element_type=jnp.float32,
    ).astype(o_ref.dtype)


def _bn_relu_conv1x1_2d(x2d, gamma2d, beta2d, w2d):
    NHW, C = x2d.shape
    Cout = w2d.shape[0]
    return pl.pallas_call(
        bn_relu_conv1x1_kernel,
        out_shape=jax.ShapeDtypeStruct((NHW, Cout), x2d.dtype),
        grid=(1,),
        in_specs=[
            pl.BlockSpec((NHW, C), lambda i: (0, 0)),   # x, whole
            pl.BlockSpec((1, C), lambda i: (0, 0)),     # gamma
            pl.BlockSpec((1, C), lambda i: (0, 0)),     # beta
            pl.BlockSpec((Cout, C), lambda i: (0, 0)),  # weight, whole
        ],
        out_specs=pl.BlockSpec((NHW, Cout), lambda i: (0, 0)),
    )(x2d, gamma2d, beta2d, w2d)


@jax.jit
def bn_relu_conv1x1(x_nchw, gamma, beta, w_oihw):
    """x_nchw: [N, Cin, H, W]; w_oihw: [Cout, Cin, 1, 1] -> [N, Cout, H, W]."""
    # TODO(synk): BatchNorm running_mean/running_var buffer updates (training-time
    # side effect) are not materialized; only the forward output is computed.
    N, C, H, W = x_nchw.shape
    Cout = w_oihw.shape[0]
    NHW = N * H * W

    # NCHW -> [N*H*W, Cin]: one small HBM transpose (0.42 MB here) buying a
    # lane-dense kernel.  Correct for N > 1 too (BN reduces over N, H, W).
    x2d = jnp.transpose(x_nchw, (0, 2, 3, 1)).reshape(NHW, C)
    w2d = w_oihw.reshape(Cout, C)          # [Cout, Cin, 1, 1] -> [Cout, Cin], free
    gamma2d = gamma.reshape(1, C)
    beta2d = beta.reshape(1, C)

    out2d = _bn_relu_conv1x1_2d(x2d, gamma2d, beta2d, w2d)   # [NHW, Cout]

    # [N*H*W, Cout] -> NCHW (tiny 37 KB transpose).
    return jnp.transpose(out2d.reshape(N, H, W, Cout), (0, 3, 1, 2))


@jax.jit
def reference(x_nchw, gamma, beta, w_oihw):
    # Pure-JAX reference for correctness checking (f32 throughout).
    mean = jnp.mean(x_nchw, axis=(0, 2, 3), keepdims=True)
    var = jnp.mean((x_nchw - mean) ** 2, axis=(0, 2, 3), keepdims=True)
    xn = (x_nchw - mean) * jax.lax.rsqrt(var + EPS)
    xn = xn * gamma.reshape(1, -1, 1, 1) + beta.reshape(1, -1, 1, 1)
    xr = jnp.maximum(xn, 0.0)
    return jax.lax.conv_general_dilated(
        xr, w_oihw, window_strides=(1, 1), padding="VALID",
        dimension_numbers=("NCHW", "OIHW", "NCHW"),
    )


if __name__ == "__main__":
    N, C_IN, H, W = 1, 2160, 7, 7   # shapes implied by the module
    C_OUT = 192

    key = jax.random.PRNGKey(0)
    kx, kw = jax.random.split(key)

    x = jax.random.normal(kx, (N, C_IN, H, W), dtype=jnp.float32)

    # Deterministic parameter init (PyTorch defaults: BN weight=1, bias=0;
    # conv weight ~ uniform with bound 1/sqrt(fan_in)).
    gamma = jnp.ones((C_IN,), dtype=jnp.float32)
    beta = jnp.zeros((C_IN,), dtype=jnp.float32)
    bound = 1.0 / (C_IN ** 0.5)
    w = jax.random.uniform(
        kw, (C_OUT, C_IN, 1, 1), dtype=jnp.float32, minval=-bound, maxval=bound
    )

    out = jax.block_until_ready(bn_relu_conv1x1(x, gamma, beta, w))
    ref = jax.block_until_ready(reference(x, gamma, beta, w))

    assert out.shape == (N, C_OUT, H, W), out.shape
    assert jnp.allclose(out, ref, atol=1e-3, rtol=1e-3), float(
        jnp.max(jnp.abs(out - ref))
    )

    print("KERNEL_OK")
</pallas_src>

<mosaic_0001>
module attributes {stable_mosaic.version = 11 : i64} {
  func.func @bn_relu_conv1x1_kernel(%arg0: i32, %arg1: memref<49x2160xf32, #tpu.memory_space<vmem>>, %arg2: memref<1x2160xf32, #tpu.memory_space<vmem>>, %arg3: memref<1x2160xf32, #tpu.memory_space<vmem>>, %arg4: memref<192x2160xf32, #tpu.memory_space<vmem>>, %arg5: memref<49x192xf32, #tpu.memory_space<vmem>>) attributes {dimension_semantics = [#tpu.dimension_semantics<arbitrary>], iteration_bounds = array<i64: 1>, scalar_prefetch = 0 : i64, scratch_operands = 0 : i64, tpu.core_type = #tpu.core_type<tc>, window_params = [{pipeline_mode = #tpu.pipeline_mode<synchronous>, transform_indices = @transform_0, window_bounds = array<i64: 49, 2160>}, {pipeline_mode = #tpu.pipeline_mode<synchronous>, transform_indices = @transform_1, window_bounds = array<i64: 1, 2160>}, {pipeline_mode = #tpu.pipeline_mode<synchronous>, transform_indices = @transform_2, window_bounds = array<i64: 1, 2160>}, {pipeline_mode = #tpu.pipeline_mode<synchronous>, transform_indices = @transform_3, window_bounds = array<i64: 192, 2160>}, {pipeline_mode = #tpu.pipeline_mode<synchronous>, transform_indices = @transform_4, window_bounds = array<i64: 49, 192>}]} {
    %c0 = arith.constant 0 : index
    %c0_0 = arith.constant 0 : index
    %0 = vector.load %arg1[%c0, %c0_0] : memref<49x2160xf32, #tpu.memory_space<vmem>>, vector<49x2160xf32>
    %cst = arith.constant dense<0.000000e+00> : vector<2160xf32>
    %1 = vector.multi_reduction <add>, %0, %cst [0] : vector<49x2160xf32> to vector<2160xf32>
    %2 = vector.shape_cast %1 : vector<2160xf32> to vector<1x2160xf32>
    %3 = arith.mulf %0, %0 : vector<49x2160xf32>
    %cst_1 = arith.constant dense<0.000000e+00> : vector<2160xf32>
    %4 = vector.multi_reduction <add>, %3, %cst_1 [0] : vector<49x2160xf32> to vector<2160xf32>
    %5 = vector.shape_cast %4 : vector<2160xf32> to vector<1x2160xf32>
    %cst_2 = arith.constant 0.0204081628 : f32
    %6 = vector.broadcast %cst_2 : f32 to vector<1x2160xf32>
    %7 = arith.mulf %2, %6 : vector<1x2160xf32>
    %cst_3 = arith.constant 0.0204081628 : f32
    %8 = vector.broadcast %cst_3 : f32 to vector<1x2160xf32>
    %9 = arith.mulf %5, %8 : vector<1x2160xf32>
    %10 = arith.mulf %7, %7 : vector<1x2160xf32>
    %11 = arith.subf %9, %10 : vector<1x2160xf32>
    %cst_4 = arith.constant 0.000000e+00 : f32
    %12 = vector.broadcast %cst_4 : f32 to vector<1x2160xf32>
    %13 = arith.maximumf %11, %12 : vector<1x2160xf32>
    %cst_5 = arith.constant 9.99999974E-6 : f32
    %14 = vector.broadcast %cst_5 : f32 to vector<1x2160xf32>
    %15 = arith.addf %13, %14 : vector<1x2160xf32>
    %16 = math.rsqrt %15 : vector<1x2160xf32>
    %c0_6 = arith.constant 0 : index
    %c0_7 = arith.constant 0 : index
    %17 = vector.load %arg2[%c0_6, %c0_7] : memref<1x2160xf32, #tpu.memory_space<vmem>>, vector<1x2160xf32>
    %18 = arith.mulf %17, %16 : vector<1x2160xf32>
    %c0_8 = arith.constant 0 : index
    %c0_9 = arith.constant 0 : index
    %19 = vector.load %arg3[%c0_8, %c0_9] : memref<1x2160xf32, #tpu.memory_space<vmem>>, vector<1x2160xf32>
    %20 = arith.mulf %7, %18 : vector<1x2160xf32>
    %21 = arith.subf %19, %20 : vector<1x2160xf32>
    %22 = vector.broadcast %18 : vector<1x2160xf32> to vector<49x2160xf32>
    %23 = arith.mulf %0, %22 : vector<49x2160xf32>
    %24 = vector.broadcast %21 : vector<1x2160xf32> to vector<49x2160xf32>
    %25 = arith.addf %23, %24 : vector<49x2160xf32>
    %cst_10 = arith.constant 0.000000e+00 : f32
    %26 = vector.broadcast %cst_10 : f32 to vector<49x2160xf32>
    %27 = arith.maximumf %25, %26 : vector<49x2160xf32>
    %c0_11 = arith.constant 0 : index
    %c0_12 = arith.constant 0 : index
    %28 = vector.load %arg4[%c0_11, %c0_12] : memref<192x2160xf32, #tpu.memory_space<vmem>>, vector<192x2160xf32>
    %cst_13 = arith.constant dense<0.000000e+00> : vector<49x192xf32>
    %29 = tpu.matmul %27, %28, %cst_13 {dimension_numbers = #tpu.dot_dimension_numbers<[1], [1], [0], [0], [0, 0, 1, 0], [], []>} : vector<49x2160xf32>, vector<192x2160xf32>, vector<49x192xf32> -> vector<49x192xf32>
    %c0_14 = arith.constant 0 : index
    %c0_15 = arith.constant 0 : index
    %30 = vector.load %arg5[%c0_14, %c0_15] : memref<49x192xf32, #tpu.memory_space<vmem>>, vector<49x192xf32>
    tpu.vector_store %arg5[%c0_14, %c0_15], %29 {strides = array<i32>} : memref<49x192xf32, #tpu.memory_space<vmem>>, vector<49x192xf32>,
    return
  }
  func.func @transform_0(%arg0: i32) -> (i32, i32) {
    %c0_i32 = arith.constant 0 : i32
    %c0_i32_0 = arith.constant 0 : i32
    %c0_i32_1 = arith.constant 0 : i32
    return %c0_i32, %c0_i32_0 : i32, i32
  }
  func.func @transform_1(%arg0: i32) -> (i32, i32) {
    %c0_i32 = arith.constant 0 : i32
    %c0_i32_0 = arith.constant 0 : i32
    %c0_i32_1 = arith.constant 0 : i32
    return %c0_i32, %c0_i32_0 : i32, i32
  }
  func.func @transform_2(%arg0: i32) -> (i32, i32) {
    %c0_i32 = arith.constant 0 : i32
    %c0_i32_0 = arith.constant 0 : i32
    %c0_i32_1 = arith.constant 0 : i32
    return %c0_i32, %c0_i32_0 : i32, i32
  }
  func.func @transform_3(%arg0: i32) -> (i32, i32) {
    %c0_i32 = arith.constant 0 : i32
    %c0_i32_0 = arith.constant 0 : i32
    %c0_i32_1 = arith.constant 0 : i32
    return %c0_i32, %c0_i32_0 : i32, i32
  }
  func.func @transform_4(%arg0: i32) -> (i32, i32) {
    %c0_i32 = arith.constant 0 : i32
    %c0_i32_0 = arith.constant 0 : i32
    %c0_i32_1 = arith.constant 0 : i32
    return %c0_i32, %c0_i32_0 : i32, i32
  }
}

</mosaic_0001>

<bundles_post_ra>
// kernel: bn_relu_conv1x1.1
= control target key start
LH: loop header
LB: loop body
LE: loop exit
PB: predicated region body
PF: predicated region fallthrough
CT: control target
= control target key end

     0   :  { %v3889_v38 = vmov 1966171168   ;;  %v858_v40 = vlaneseq  ;;  %vm141_vm0 = vcmask 1040384   ;;  %vm345_vm1 = vcmask 916480   ;;  %s7709_s3 = inlined_call_operand.vmem [shape: f32[192,2160], index: 3, kind: input, shape index: {}]   ;;  %s7710_s0 = inlined_call_operand.vmem [shape: f32[49,2160], index: 0, kind: input, shape index: {}]   ;;  %s7711_s1 = inlined_call_operand.vmem [shape: f32[1,2160], index: 1, kind: input, shape index: {}]   ;;  %s7712_s2 = inlined_call_operand.vmem [shape: f32[1,2160], index: 2, kind: input, shape index: {}]   ;;  %s7713_s4 = inlined_call_operand.vmem [shape: f32[49,192], index: 4, kind: output, shape index: {}]  }
   0x1   :  { %v1658_v0 = vld [vmem:[%s7709_s3 + $0x8] sm:$0xff]  ;;  %v1675_v1 = vld [vmem:[%s7709_s3 + $0x90] sm:$0xff]  ;;  %v1657_v5 = vld [vmem:[%s7709_s3] sm:$0xff]  ;;  %v856_v39 = vunpack.c.l.s4 %v3889_v38  ;;  %vm357_vm2 = vcmask 909312   ;;  %vm3122_vm4 = vcmask 523264   ;;  %vm3135_vm5 = vcmask 516096  }
   0x2   :  { %v1666_v2 = vld [vmem:[%s7709_s3 + $0x48] sm:$0xff]  ;;  %v3172_v3 = vpack.c.bf16 %v1675_v1, %v1658_v0  ;;  %v1683_v4 = vld [vmem:[%s7709_s3 + $0xd0] sm:$0xff]  ;;  %v1665_v9 = vld [vmem:[%s7709_s3 + $0x40] sm:$0xff]  ;;  %v4031_v52 = vshrl.u32 %v858_v40, 7 }
   0x3   :  { %v1674_v6 = vld [vmem:[%s7709_s3 + $0x88] sm:$0xff]  ;;  %v3364_v7 = vpack.c.bf16 %v1683_v4, %v1666_v2  ;;  %v1692_v11 = vld [vmem:[%s7709_s3 + $0x118] sm:$0xff]  ;;  %v1709_v13 = vld [vmem:[%s7709_s3 + $0x1a0] sm:$0xff]  ;;  %v857_v51 = vunpack.c.0.s8 %v856_v39 }
   0x4   :  { %v3174_v8 = vpack.c.bf16 %v1674_v6, %v1657_v5  ;;  %v1682_v10 = vld [vmem:[%s7709_s3 + $0xc8] sm:$0xff]  ;;  %3173 = vmatprep.subr.bf16.mxu1 %v3172_v3  ;;  %v1700_v14 = vld [vmem:[%s7709_s3 + $0x158] sm:$0xff]  ;;  %v1717_v15 = vld [vmem:[%s7709_s3 + $0x1e0] sm:$0xff]  ;;  %v3176_v16 = vpack.c.bf16 %v1709_v13, %v1692_v11  ;;  %v4266_v40 = vsub.s32 3, %v4031_v52 }
   0x5   :  { %v3366_v12 = vpack.c.bf16 %v1682_v10, %v1665_v9  ;;  %3365 = vmatprep.subr.bf16.mxu0 %v3364_v7  ;;  %v3368_v17 = vpack.c.bf16 %v1717_v15, %v1700_v14  ;;  %v1691_v18 = vld [vmem:[%s7709_s3 + $0x110] sm:$0xff]  ;;  %v1708_v19 = vld [vmem:[%s7709_s3 + $0x198] sm:$0xff]  ;;  %v1726_v22 = vld [vmem:[%s7709_s3 + $0x228] sm:$0xff] }
   0x6   :  { %3175 = vmatpush1.bf16.xpose.msra.mxu1 %v3174_v8  ;;  %v1699_v20 = vld [vmem:[%s7709_s3 + $0x150] sm:$0xff]  ;;  %v1716_v21 = vld [vmem:[%s7709_s3 + $0x1d8] sm:$0xff]  ;;  %v1734_v24 = vld [vmem:[%s7709_s3 + $0x268] sm:$0xff]  ;;  %v3178_v26 = vpack.c.bf16 %v1708_v19, %v1691_v18  ;;  %v4178_v19 = vsub.s32 %v857_v51, %v4031_v52  ;;  %7815 = vst [vmem:[#allocation11_spill] sm:$0xff] %v4266_v40 }
   0x7   :  { %3367 = vmatpush1.bf16.xpose.msra.mxu0 %v3366_v12  ;;  %3177 = vmatprep.subr.bf16.mxu1 %v3176_v16  ;;  %v1743_v23 = vld [vmem:[%s7709_s3 + $0x2b0] sm:$0xff]  ;;  %v3370_v27 = vpack.c.bf16 %v1716_v21, %v1699_v20  ;;  %v1725_v30 = vld [vmem:[%s7709_s3 + $0x220] sm:$0xff]  ;;  %v1742_v31 = vld [vmem:[%s7709_s3 + $0x2a8] sm:$0xff] }
   0x8   :  { %3369 = vmatprep.subr.bf16.mxu0 %v3368_v17  ;;  %v1751_v25 = vld [vmem:[%s7709_s3 + $0x2f0] sm:$0xff]  ;;  %v3180_v28 = vpack.c.bf16 %v1743_v23, %v1726_v22  ;;  %v1733_v32 = vld [vmem:[%s7709_s3 + $0x260] sm:$0xff]  ;;  %v1750_v33 = vld [vmem:[%s7709_s3 + $0x2e8] sm:$0xff]  ;;  %v3182_v41 = vpack.c.bf16 %v1742_v31, %v1725_v30  ;;  %7806 = vst [vmem:[#allocation2_spill] sm:$0xff] %v4178_v19 }
   0x9   :  { %v3372_v29 = vpack.c.bf16 %v1751_v25, %v1734_v24  ;;  %v1760_v34 = vld [vmem:[%s7709_s3 + $0x338] sm:$0xff]  ;;  %v1777_v35 = vld [vmem:[%s7709_s3 + $0x3c0] sm:$0xff]  ;;  %v3374_v42 = vpack.c.bf16 %v1750_v33, %v1733_v32  ;;  %v4004_v45 = vld [vmem:[%s7709_s3 + $0x330] sm:$0xff] }
   0xa   :  { %v1768_v36 = vld [vmem:[%s7709_s3 + $0x378] sm:$0xff]  ;;  %v1785_v37 = vld [vmem:[%s7709_s3 + $0x400] sm:$0xff]  ;;  %v3184_v43 = vpack.c.bf16 %v1777_v35, %v1760_v34  ;;  %v4014_v47 = vld [vmem:[%s7709_s3 + $0x370] sm:$0xff] }
   0xb   :  { %v3376_v44 = vpack.c.bf16 %v1785_v37, %v1768_v36  ;;  %v4009_v46 = vld [vmem:[%s7709_s3 + $0x3b8] sm:$0xff]  ;;  %v4024_v49 = vld [vmem:[%s7709_s3 + $0x448] sm:$0xff]  ;;  %v4029_v50 = vld [vmem:[%s7709_s3 + $0x4d0] sm:$0xff] }
   0xc   :  { %v4019_v48 = vld [vmem:[%s7709_s3 + $0x3f8] sm:$0xff]  ;;  %v4036_v53 = vld [vmem:[%s7709_s3 + $0x488] sm:$0xff]  ;;  %v4041_v54 = vld [vmem:[%s7709_s3 + $0x510] sm:$0xff]  ;;  %v3186_v9 = vpack.c.bf16 %v4009_v46, %v4004_v45  ;;  %v3188_v20 = vpack.c.bf16 %v4029_v50, %v4024_v49 }
   0xd   :  { %v4046_v55 = vld [vmem:[%s7709_s3 + $0x440] sm:$0xff]  ;;  %v4051_v56 = vld [vmem:[%s7709_s3 + $0x4c8] sm:$0xff]  ;;  %v4066_v59 = vld [vmem:[%s7709_s3 + $0x558] sm:$0xff]  ;;  %v3378_v10 = vpack.c.bf16 %v4019_v48, %v4014_v47  ;;  %v3380_v30 = vpack.c.bf16 %v4041_v54, %v4036_v53 }
   0xe   :  { %3179 = vmatpush1.bf16.xpose.msra.mxu1 %v3178_v26  ;;  %v4056_v57 = vld [vmem:[%s7709_s3 + $0x480] sm:$0xff]  ;;  %v4061_v58 = vld [vmem:[%s7709_s3 + $0x508] sm:$0xff]  ;;  %v4076_v61 = vld [vmem:[%s7709_s3 + $0x598] sm:$0xff] }
   0xf   :  { %3371 = vmatpush1.bf16.xpose.msra.mxu0 %v3370_v27  ;;  %3181 = vmatprep.subr.bf16.mxu1 %v3180_v28  ;;  %v4071_v60 = vld [vmem:[%s7709_s3 + $0x5e0] sm:$0xff]  ;;  %v4086_v63 = vld [vmem:[%s7709_s3 + $0x550] sm:$0xff]  ;;  %v4091_v0 = vld [vmem:[%s7709_s3 + $0x5d8] sm:$0xff]  ;;  %v4213_v27 = vsub.s32 0, %v4031_v52  ;;  %v4216_v28 = vsub.s32 1, %v4031_v52 }
  0x10   :  { %3373 = vmatprep.subr.bf16.mxu0 %v3372_v29  ;;  %v4081_v62 = vld [vmem:[%s7709_s3 + $0x620] sm:$0xff]  ;;  %v4096_v1 = vld [vmem:[%s7709_s3 + $0x590] sm:$0xff]  ;;  %v4101_v2 = vld [vmem:[%s7709_s3 + $0x618] sm:$0xff]  ;;  %v4219_v29 = vsub.s32 2, %v4031_v52 }
  0x11   :  { %v4106_v3 = vld [vmem:[%s7709_s3 + $0x668] sm:$0xff]  ;;  %v4111_v4 = vld [vmem:[%s7709_s3 + $0x6f0] sm:$0xff]  ;;  %v4126_v7 = vld [vmem:[%s7709_s3 + $0x660] sm:$0xff]  ;;  %7807 = vst [vmem:[#allocation3_spill] sm:$0xff] %v4213_v27 }
  0x12   :  { %v4116_v5 = vld [vmem:[%s7709_s3 + $0x6a8] sm:$0xff]  ;;  %v4121_v6 = vld [vmem:[%s7709_s3 + $0x730] sm:$0xff]  ;;  %v4140_v11 = vld [vmem:[%s7709_s3 + $0x6a0] sm:$0xff]  ;;  %7808 = vst [vmem:[#allocation4_spill] sm:$0xff] %v4216_v28 }
  0x13   :  { %v4131_v8 = vld [vmem:[%s7709_s3 + $0x6e8] sm:$0xff]  ;;  %v4150_v13 = vld [vmem:[%s7709_s3 + $0x778] sm:$0xff]  ;;  %v4155_v14 = vld [vmem:[%s7709_s3 + $0x800] sm:$0xff]  ;;  %7809 = vst [vmem:[#allocation5_spill] sm:$0xff] %v4219_v29 }
  0x14   :  { %v4145_v12 = vld [vmem:[%s7709_s3 + $0x728] sm:$0xff]  ;;  %v4160_v15 = vld [vmem:[%s7709_s3 + $0x7b8] sm:$0xff]  ;;  %v4165_v16 = vld [vmem:[%s7709_s3 + $0x840] sm:$0xff] }
  0x15   :  { %v4170_v17 = vld [vmem:[%s7709_s3 + $0x770] sm:$0xff]  ;;  %v4175_v18 = vld [vmem:[%s7709_s3 + $0x7f8] sm:$0xff]  ;;  %v4195_v23 = vld [vmem:[%s7709_s3 + $0x888] sm:$0xff] }
  0x16   :  { %3183 = vmatpush1.bf16.xpose.msra.mxu1 %v3182_v41  ;;  %v4185_v21 = vld [vmem:[%s7709_s3 + $0x7b0] sm:$0xff]  ;;  %v4190_v22 = vld [vmem:[%s7709_s3 + $0x838] sm:$0xff]  ;;  %v4205_v25 = vld [vmem:[%s7709_s3 + $0x8c8] sm:$0xff]  ;;  %v4269_v41 = vsub.s32 4, %v4031_v52 }
  0x17   :  { %3375 = vmatpush1.bf16.xpose.msra.mxu0 %v3374_v42  ;;  %3185 = vmatprep.subr.bf16.mxu1 %v3184_v43  ;;  %v4200_v24 = vld [vmem:[%s7709_s3 + $0x910] sm:$0xff]  ;;  %v4228_v32 = vld [vmem:[%s7709_s3 + $0x880] sm:$0xff]  ;;  %v4233_v33 = vld [vmem:[%s7709_s3 + $0x908] sm:$0xff] }
  0x18   :  { %3377 = vmatprep.subr.bf16.mxu0 %v3376_v44  ;;  %v4210_v26 = vld [vmem:[%s7709_s3 + $0x950] sm:$0xff]  ;;  %v4238_v34 = vld [vmem:[%s7709_s3 + $0x8c0] sm:$0xff]  ;;  %v4243_v35 = vld [vmem:[%s7709_s3 + $0x948] sm:$0xff]  ;;  %7816 = vst [vmem:[#allocation12_spill] sm:$0xff] %v4269_v41 }
  0x19   :  { %7810 = vst [vmem:[#allocation6_spill] sm:$0xff] %v4238_v34  ;;  %v4248_v36 = vld [vmem:[%s7709_s3 + $0x998] sm:$0xff]  ;;  %v4253_v37 = vld [vmem:[%s7709_s3 + $0xa20] sm:$0xff]  ;;  %v4282_v46 = vld [vmem:[%s7709_s3 + $0x990] sm:$0xff] }
  0x1a   :  { %7811 = vst [vmem:[#allocation7_spill] sm:$0xff] %v4248_v36  ;;  %7812 = vst [vmem:[#allocation8_spill] sm:$0xff] %v4253_v37  ;;  %v4258_v38 = vld [vmem:[%s7709_s3 + $0x9d8] sm:$0xff]  ;;  %v4263_v39 = vld [vmem:[%s7709_s3 + $0xa60] sm:$0xff]  ;;  %v7859_v36 = vpack.c.bf16 %v4091_v0, %v4086_v63 }
  0x1b   :  { %7813 = vst [vmem:[#allocation9_spill] sm:$0xff] %v4258_v38  ;;  %7814 = vst [vmem:[#allocation10_spill] sm:$0xff] %v4263_v39  ;;  %v4287_v47 = vld [vmem:[%s7709_s3 + $0xa18] sm:$0xff]  ;;  %v4292_v48 = vld [vmem:[%s7709_s3 + $0x9d0] sm:$0xff] }
  0x1c   :  { %7817 = vst [vmem:[#allocation13_spill] sm:$0xff] %v4282_v46  ;;  %7818 = vst [vmem:[#allocation14_spill] sm:$0xff] %v4287_v47  ;;  %v4297_v49 = vld [vmem:[%s7709_s3 + $0xa58] sm:$0xff]  ;;  %v4302_v50 = vld [vmem:[%s7709_s3 + $0xaa8] sm:$0xff] }
  0x1d   :  { %7819 = vst [vmem:[#allocation15_spill] sm:$0xff] %v4292_v48  ;;  %7820 = vst [vmem:[#allocation16_spill] sm:$0xff] %v4297_v49  ;;  %v4315_v44 = vld [vmem:[%s7709_s3 + $0xb30] sm:$0xff]  ;;  %v4320_v43 = vld [vmem:[%s7709_s3 + $0xae8] sm:$0xff] }
  0x1e   :  { %7821 = vst [vmem:[#allocation17_spill] sm:$0xff] %v4302_v50  ;;  %7822 = vst [vmem:[#allocation18_spill] sm:$0xff] %v4315_v44  ;;  %v4325_v53 = vld [vmem:[%s7709_s3 + $0xb70] sm:$0xff]  ;;  %3187 = vmatpush1.bf16.xpose.msra.mxu1 %v3186_v9  ;;  %v4338_v31 = vld [vmem:[%s7709_s3 + $0xaa0] sm:$0xff] }
  0x1f   :  { %7823 = vst [vmem:[#allocation19_spill] sm:$0xff] %v4320_v43  ;;  %7824 = vst [vmem:[#allocation20_spill] sm:$0xff] %v4325_v53  ;;  %v4343_v9 = vld [vmem:[%s7709_s3 + $0xb28] sm:$0xff]  ;;  %v4348_v45 = vld [vmem:[%s7709_s3 + $0xae0] sm:$0xff]  ;;  %3379 = vmatpush1.bf16.xpose.msra.mxu0 %v3378_v10  ;;  %3189 = vmatprep.subr.bf16.mxu1 %v3188_v20  ;;  %v4372_v20 = vsub.s32 5, %v4031_v52 }
  0x20   :  { %7825 = vst [vmem:[#allocation21_spill] sm:$0xff] %v4338_v31  ;;  %7826 = vst [vmem:[#allocation22_spill] sm:$0xff] %v4343_v9  ;;  %v4359_v41 = vld [vmem:[%s7709_s3 + $0xb68] sm:$0xff]  ;;  %v4364_v40 = vld [vmem:[%s7709_s3 + $0xbb8] sm:$0xff]  ;;  %3381 = vmatprep.subr.bf16.mxu0 %v3380_v30 }
  0x21   :  { %7827 = vst [vmem:[#allocation23_spill] sm:$0xff] %v4348_v45  ;;  %7828 = vst [vmem:[#allocation24_spill] sm:$0xff] %v4359_v41  ;;  %v4369_v10 = vld [vmem:[%s7709_s3 + $0xc40] sm:$0xff]  ;;  %v4385_v28 = vld [vmem:[%s7709_s3 + $0xbf8] sm:$0xff] }
  0x22   :  { %7829 = vst [vmem:[#allocation25_spill] sm:$0xff] %v4364_v40  ;;  %7830 = vst [vmem:[#allocation26_spill] sm:$0xff] %v4369_v10  ;;  %v4390_v30 = vld [vmem:[%s7709_s3 + $0xc80] sm:$0xff]  ;;  %v4395_v51 = vld [vmem:[%s7709_s3 + $0xbb0] sm:$0xff] }
  0x23   :  { %7831 = vst [vmem:[#allocation27_spill] sm:$0xff] %v4372_v20  ;;  %7832 = vst [vmem:[#allocation28_spill] sm:$0xff] %v4385_v28  ;;  %v4408_v27 = vld [vmem:[%s7709_s3 + $0xc38] sm:$0xff]  ;;  %v4413_v19 = vld [vmem:[%s7709_s3 + $0xbf0] sm:$0xff] }
  0x24   :  { %7833 = vst [vmem:[#allocation29_spill] sm:$0xff] %v4390_v30  ;;  %7834 = vst [vmem:[#allocation30_spill] sm:$0xff] %v4395_v51  ;;  %v4418_v29 = vld [vmem:[%s7709_s3 + $0xc78] sm:$0xff]  ;;  %v17_v53 = vld [vmem:[%s7710_s0] sm:$0xff] }
  0x25   :  { %7835 = vst [vmem:[#allocation31_spill] sm:$0xff] %v4408_v27  ;;  %7836 = vst [vmem:[#allocation32_spill] sm:$0xff] %v4413_v19  ;;  %v18_v50 = vld [vmem:[%s7710_s0 + $0x8] sm:$0xff]  ;;  %v19_v54 = vld [vmem:[%s7710_s0 + $0x10] sm:$0xff]  ;;  %v4450_v40 = vmul.f32 %v17_v53, %v17_v53 }
  0x26   :  { %7837 = vst [vmem:[#allocation33_spill] sm:$0xff] %v4418_v29  ;;  %v20_v43 = vld [vmem:[%s7710_s0 + $0x18] sm:$0xff]  ;;  %v21_v28 = vld [vmem:[%s7710_s0 + $0x20] sm:$0xff]  ;;  %v22_v30 = vld [vmem:[%s7710_s0 + $0x28] sm:$0xff]  ;;  %v4452_v10 = vmul.f32 %v18_v50, %v18_v50  ;;  %v4463_v29 = vmul.f32 %v19_v54, %v19_v54 }
  0x27   :  { %7838 = vst [vmem:[#allocation34_spill] sm:$0xff] %v4450_v40  ;;  %v23_v42 = vld [vmem:[%s7710_s0 + $0x30] sm:$0xff]  ;;  %v24_v20 = vld [vmem:[%s7710_s0 + $0x38] sm:$0xff]  ;;  %v34_v19 = vld [vmem:[%s7710_s0 + $0x88] sm:$0xff]  ;;  %v4465_v51 = vmul.f32 %v20_v43, %v20_v43  ;;  %v4467_v27 = vmul.f32 %v21_v28, %v21_v28  ;;  %v4469_v45 = vmul.f32 %v22_v30, %v22_v30 }
  0x28   :  { %7839 = vst [vmem:[#allocation35_spill] sm:$0xff] %v4452_v10  ;;  %7840 = vst [vmem:[#allocation36_spill] sm:$0xff] %v4463_v29  ;;  %v35_v41 = vld [vmem:[%s7710_s0 + $0x90] sm:$0xff]  ;;  %v36_v31 = vld [vmem:[%s7710_s0 + $0x98] sm:$0xff]  ;;  %v136_v44 = vadd.f32 %v34_v19, %v17_v53  ;;  %v4480_v48 = vmul.f32 %v23_v42, %v23_v42  ;;  %v4482_v49 = vmul.f32 %v24_v20, %v24_v20 }
  0x29   :  { %7841 = vst [vmem:[#allocation37_spill] sm:$0xff] %v4465_v51  ;;  %7842 = vst [vmem:[#allocation38_spill] sm:$0xff] %v4467_v27  ;;  %v37_v9 = vld [vmem:[%s7710_s0 + $0xa0] sm:$0xff]  ;;  %v4484_v27 = vmul.f32 %v34_v19, %v34_v19  ;;  %v38_v46 = vld [vmem:[%s7710_s0 + $0xa8] sm:$0xff]  ;;  %v4498_v51 = vmul.f32 %v35_v41, %v35_v41 }
  0x2a   :  { %7843 = vst [vmem:[#allocation39_spill] sm:$0xff] %v4469_v45  ;;  %7844 = vst [vmem:[#allocation40_spill] sm:$0xff] %v4480_v48  ;;  %v7847_v45 = vpack.c.bf16 %v4051_v56, %v4046_v55  ;;  %v39_v47 = vld [vmem:[%s7710_s0 + $0xb0] sm:$0xff]  ;;  %v40_v53 = vld [vmem:[%s7710_s0 + $0xb8] sm:$0xff]  ;;  %v150_v48 = vadd.f32 %v35_v41, %v18_v50  ;;  %v176_v19 = vadd.f32 %v37_v9, %v20_v43 }
  0x2b   :  { %7845 = vst [vmem:[#allocation41_spill] sm:$0xff] %v4482_v49  ;;  %7846 = vst [vmem:[#allocation42_spill] sm:$0xff] %v4484_v27  ;;  %v163_v49 = vadd.f32 %v36_v31, %v19_v54  ;;  %v7849_v55 = vpack.c.bf16 %v4061_v58, %v4056_v57  ;;  %v7850_v56 = vpack.c.bf16 %v4071_v60, %v4066_v59  ;;  %v51_v50 = vld [vmem:[%s7710_s0 + $0x110] sm:$0xff]  ;;  %v4515_v41 = vld [vmem:[%s7710_s0 + $0x118] sm:$0xff]  ;;  %v4518_v54 = vsub.s32 6, %v4031_v52 }
  0x2c   :  { %3191 = vmatpush1.bf16.xpose.msra.mxu1 %v7847_v45  ;;  %7848 = vst [vmem:[#allocation43_spill] sm:$0xff] %v4498_v51  ;;  %v41_v45 = vld [vmem:[%s7710_s0 + $0xc0] sm:$0xff]  ;;  %v189_v43 = vadd.f32 %v38_v46, %v21_v28  ;;  %v202_v57 = vadd.f32 %v39_v47, %v22_v30  ;;  %v215_v58 = vadd.f32 %v40_v53, %v23_v42  ;;  %v4536_v28 = vld [vmem:[%s7710_s0 + $0x130] sm:$0xff]  ;;  %v4589_v10 = vld [vmem:[%s7710_s0 + $0x1b8] sm:$0xff] }
  0x2d   :  { %3383 = vmatpush1.bf16.xpose.msra.mxu0 %v7849_v55  ;;  %3193 = vmatprep.subr.bf16.mxu1 %v7850_v56  ;;  %7851 = vst [vmem:[#allocation44_spill] sm:$0xff] %v4518_v54  ;;  %v7852_v59 = vpack.c.bf16 %v4081_v62, %v4076_v61  ;;  %v4526_v60 = vld [vmem:[%s7710_s0 + $0x120] sm:$0xff]  ;;  %v4531_v55 = vld [vmem:[%s7710_s0 + $0x128] sm:$0xff]  ;;  %v137_v42 = vadd.f32 %v136_v44, %v51_v50  ;;  %v4544_v56 = vld [vmem:[%s7710_s0 + $0x138] sm:$0xff] }
  0x2e   :  { %v151_v30 = vadd.f32 %v150_v48, %v4515_v41  ;;  %v228_v61 = vadd.f32 %v41_v45, %v24_v20  ;;  %v4539_v62 = vmul.f32 %v36_v31, %v36_v31  ;;  %v4554_v54 = vld [vmem:[%s7710_s0 + $0x148] sm:$0xff]  ;;  %v164_v44 = vadd.f32 %v163_v49, %v4526_v60  ;;  %v4569_v29 = vld [vmem:[%s7710_s0 + $0x1a0] sm:$0xff]  ;;  %v4584_v51 = vld [vmem:[%s7710_s0 + $0x1b0] sm:$0xff] }
  0x2f   :  { %3385 = vmatprep.subr.bf16.mxu0 %v7852_v59  ;;  %v4549_v59 = vld [vmem:[%s7710_s0 + $0x140] sm:$0xff]  ;;  %v177_v31 = vadd.f32 %v176_v19, %v4531_v55  ;;  %v190_v48 = vadd.f32 %v189_v43, %v4536_v28  ;;  %v4559_v20 = vmul.f32 %v37_v9, %v37_v9  ;;  %v4574_v49 = vld [vmem:[%s7710_s0 + $0x1a8] sm:$0xff]  ;;  %v203_v19 = vadd.f32 %v202_v57, %v4544_v56  ;;  %v4609_v40 = vld [vmem:[%s7710_s0 + $0x1d0] sm:$0xff] }
  0x30   :  { %7853 = vst [vmem:[#allocation45_spill] sm:$0xff] %v4539_v62  ;;  %v4564_v62 = vld [vmem:[%s7710_s0 + $0x198] sm:$0xff]  ;;  %v216_v9 = vadd.f32 %v215_v58, %v4549_v59  ;;  %v229_v43 = vadd.f32 %v228_v61, %v4554_v54  ;;  %v4594_v57 = vld [vmem:[%s7710_s0 + $0x1c0] sm:$0xff]  ;;  %v165_v61 = vadd.f32 %v164_v44, %v4574_v49  ;;  %v4604_v27 = vld [vmem:[%s7710_s0 + $0x1c8] sm:$0xff] }
  0x31   :  { %7854 = vst [vmem:[#allocation46_spill] sm:$0xff] %v4559_v20  ;;  %v4579_v20 = vmul.f32 %v38_v46, %v38_v46  ;;  %v138_v58 = vadd.f32 %v137_v42, %v4564_v62  ;;  %v152_v46 = vadd.f32 %v151_v30, %v4569_v29  ;;  %v4614_v42 = vld [vmem:[%s7710_s0 + $0x220] sm:$0xff]  ;;  %v178_v30 = vadd.f32 %v177_v31, %v4584_v51  ;;  %v4624_v38 = vld [vmem:[%s7710_s0 + $0x228] sm:$0xff]  ;;  %v4629_v39 = vld [vmem:[%s7710_s0 + $0x230] sm:$0xff] }
  0x32   :  { %v204_v44 = vadd.f32 %v203_v19, %v4594_v57  ;;  %v4634_v31 = vld [vmem:[%s7710_s0 + $0x238] sm:$0xff]  ;;  %v230_v19 = vadd.f32 %v229_v43, %v4609_v40  ;;  %v4647_v37 = vld [vmem:[%s7710_s0 + $0x240] sm:$0xff]  ;;  %v4652_v34 = vld [vmem:[%s7710_s0 + $0x248] sm:$0xff]  ;;  %v166_v63 = vadd.f32 %v165_v61, %v4629_v39  ;;  %v7861_v43 = vpack.c.bf16 %v4101_v2, %v4096_v1 }
  0x33   :  { %7855 = vst [vmem:[#allocation47_spill] sm:$0xff] %v4579_v20  ;;  %v4599_v20 = vmul.f32 %v39_v47, %v39_v47  ;;  %v191_v47 = vadd.f32 %v190_v48, %v4589_v10  ;;  %v139_v48 = vadd.f32 %v138_v58, %v4614_v42  ;;  %v179_v0 = vadd.f32 %v178_v30, %v4634_v31  ;;  %v4697_v30 = vld [vmem:[%s7710_s0 + $0x2b8] sm:$0xff]  ;;  %vm7276_vm3 = vmpackc.low %vm345_vm1, %vm345_vm1 }
  0x34   :  { %3195 = vmatpush1.bf16.xpose.msra.mxu1 %v7859_v36  ;;  %v4662_v36 = vmul.f32 %v51_v50, %v51_v50  ;;  %v7862_v58 = vpack.c.bf16 %v4111_v4, %v4106_v3  ;;  %v4683_v50 = vld [vmem:[%s7710_s0 + $0x2b0] sm:$0xff]  ;;  %v205_v2 = vadd.f32 %v204_v44, %v4652_v34  ;;  %v4689_v4 = vsub.s32 7, %v4031_v52  ;;  %v4707_v44 = vld [vmem:[%s7710_s0 + $0x2c8] sm:$0xff] }
  0x35   :  { %7856 = vst [vmem:[#allocation48_spill] sm:$0xff] %v4599_v20  ;;  %v4619_v20 = vmul.f32 %v40_v53, %v40_v53  ;;  %v217_v53 = vadd.f32 %v216_v9, %v4604_v27  ;;  %v4657_v9 = vld [vmem:[%s7710_s0 + $0x250] sm:$0xff]  ;;  %3387 = vmatpush1.bf16.xpose.msra.mxu0 %v7861_v43  ;;  %v192_v1 = vadd.f32 %v191_v47, %v4647_v37  ;;  %v4702_v47 = vld [vmem:[%s7710_s0 + $0x2c0] sm:$0xff]  ;;  %7865 = vst [vmem:[#allocation53_spill] sm:$0xff] %v4707_v44 }
  0x36   :  { %7860 = vst [vmem:[#allocation51_spill] sm:$0xff] %v4662_v36  ;;  %3197 = vmatprep.subr.bf16.mxu1 %v7862_v58  ;;  %7863 = vst [vmem:[#allocation52_spill] sm:$0xff] %v4689_v4  ;;  %v7864_v61 = vpack.c.bf16 %v4121_v6, %v4116_v5  ;;  %v4719_v43 = vld [vmem:[%s7710_s0 + $0x2d0] sm:$0xff]  ;;  %v4724_v58 = vld [vmem:[%s7710_s0 + $0x2d8] sm:$0xff] }
  0x37   :  { %7857 = vst [vmem:[#allocation49_spill] sm:$0xff] %v4619_v20  ;;  %v4639_v20 = vmul.f32 %v41_v45, %v41_v45  ;;  %v153_v45 = vadd.f32 %v152_v46, %v4624_v38  ;;  %v4678_v46 = vld [vmem:[%s7710_s0 + $0x2a8] sm:$0xff]  ;;  %v218_v3 = vadd.f32 %v217_v53, %v4657_v9  ;;  %v4714_v53 = vmul.f32 %v4515_v41, %v4515_v41  ;;  %v4741_v4 = vld [vmem:[%s7710_s0 + $0x330] sm:$0x1] }
  0x38   :  { %3389 = vmatprep.subr.bf16.mxu0 %v7864_v61  ;;  %v140_v52 = vadd.f32 %v139_v48, %v4678_v46  ;;  %7867 = vst [vmem:[#allocation55_spill] sm:$0xff] %v4724_v58  ;;  %v4729_v48 = vld [vmem:[%s7710_s0 + $0x2e0] sm:$0xff]  ;;  %v180_v41 = vadd.f32 %v179_v0, %v4702_v47  ;;  %v4736_v61 = vmul.f32 %v4526_v60, %v4526_v60  ;;  %7870 = vst [vmem:[#allocation58_spill] sm:$0xff] %v4741_v4  ;;  %v4763_v36 = vld [vmem:[%s7710_s0 + $0x348] sm:$0x1] }
  0x39   :  { %7858 = vst [vmem:[#allocation50_spill] sm:$0xff] %v4639_v20  ;;  %v4673_v20 = vld [vmem:[%s7710_s0 + $0x258] sm:$0xff]  ;;  %v154_v5 = vadd.f32 %v153_v45, %v4683_v50  ;;  %7866 = vst [vmem:[#allocation54_spill] sm:$0xff] %v4714_v53  ;;  %v193_v45 = vadd.f32 %v192_v1, %v4707_v44  ;;  %v206_v0 = vadd.f32 %v205_v2, %v4719_v43  ;;  %v4768_v44 = vld [vmem:[%s7710_s0 + $0x350] sm:$0x1] }
  0x3a   :  { %v231_v6 = vadd.f32 %v230_v19, %v4673_v20  ;;  %7868 = vst [vmem:[#allocation56_spill] sm:$0xff] %v4729_v48  ;;  %v167_v19 = vadd.f32 %v166_v63, %v4697_v30  ;;  %7869 = vst [vmem:[#allocation57_spill] sm:$0xff] %v4736_v61  ;;  %v4746_v53 = vld [vmem:[%s7710_s0 + $0x338] sm:$0x1]  ;;  %v4751_v63 = vld [vmem:[%s7710_s0 + $0x340] sm:$0x1]  ;;  %v219_v60 = vadd.f32 %v218_v3, %v4724_v58 }
  0x3b   :  { %7871 = vst [vmem:[#allocation59_spill] sm:$0xff] %v4746_v53  ;;  %7872 = vst [vmem:[#allocation60_spill] sm:$0xff] %v4751_v63  ;;  %v4758_v61 = vmul.f32 %v4531_v55, %v4531_v55  ;;  %v4773_v2 = vld [vmem:[%s7710_s0 + $0x358] sm:$0x1]  ;;  %v4777_v3 = vmul.f32 %v4536_v28, %v4536_v28  ;;  %v4781_v55 = vmul.f32 %v4544_v56, %v4544_v56  ;;  %v155_v58 = vsel %vm141_vm0, %v4746_v53, 0.0 }
  0x3c   :  { %v232_v1 = vadd.f32 %v231_v6, %v4729_v48  ;;  %7874 = vst [vmem:[#allocation62_spill] sm:$0xff] %v4763_v36  ;;  %7875 = vst [vmem:[#allocation63_spill] sm:$0xff] %v4768_v44  ;;  %v4785_v6 = vmul.f32 %v4549_v59, %v4549_v59  ;;  %v142_v48 = vsel %vm141_vm0, %v4741_v4, 0.0  ;;  %v4797_v28 = vmul.f32 %v4564_v62, %v4564_v62  ;;  %v4806_v59 = vld [vmem:[%s7710_s0 + $0x360] sm:$0x1] }
  0x3d   :  { %7873 = vst [vmem:[#allocation61_spill] sm:$0xff] %v4758_v61  ;;  %7876 = vst [vmem:[#allocation64_spill] sm:$0xff] %v4773_v2  ;;  %v4789_v61 = vmul.f32 %v4554_v54, %v4554_v54  ;;  %v4801_v56 = vmul.f32 %v4569_v29, %v4569_v29  ;;  %v4811_v54 = vld [vmem:[%s7710_s0 + $0x368] sm:$0x1]  ;;  %v168_v62 = vsel %vm141_vm0, %v4751_v63, 0.0  ;;  %v7885_v29 = vpack.c.bf16 %v4131_v8, %v4126_v7 }
  0x3e   :  { %7877 = vst [vmem:[#allocation65_spill] sm:$0xff] %v4777_v3  ;;  %7878 = vst [vmem:[#allocation66_spill] sm:$0xff] %v4781_v55  ;;  %v181_v55 = vsel %vm141_vm0, %v4763_v36, 0.0  ;;  %v169_v3 = vadd.f32 %v168_v62, %v167_v19  ;;  %v207_v53 = vsel %vm141_vm0, %v4773_v2, 0.0  ;;  %v7888_v19 = vpack.c.bf16 %v4165_v16, %v4160_v15 }
  0x3f   :  { %7879 = vst [vmem:[#allocation67_spill] sm:$0xff] %v4785_v6  ;;  %7880 = vst [vmem:[#allocation68_spill] sm:$0xff] %v4789_v61  ;;  %v143_v61 = vadd.f32 %v142_v48, %v140_v52  ;;  %v156_v6 = vadd.f32 %v155_v58, %v154_v5  ;;  %3199 = vmatpush1.bf16.xpose.msra.mxu1 %v7885_v29  ;;  %v7886_v52 = vpack.c.bf16 %v4145_v12, %v4140_v11 }
  0x40   :  { %7881 = vst [vmem:[#allocation69_spill] sm:$0xff] %v4797_v28  ;;  %7882 = vst [vmem:[#allocation70_spill] sm:$0xff] %v4801_v56  ;;  %v182_v56 = vadd.f32 %v181_v55, %v180_v41  ;;  %v194_v28 = vsel %vm141_vm0, %v4768_v44, 0.0  ;;  %v7887_v5 = vpack.c.bf16 %v4155_v14, %v4150_v13  ;;  %v208_v8 = vadd.f32 %v207_v53, %v206_v0 }
  0x41   :  { %7883 = vst [vmem:[#allocation71_spill] sm:$0xff] %v4806_v59  ;;  %7884 = vst [vmem:[#allocation72_spill] sm:$0xff] %v4811_v54  ;;  %3391 = vmatpush1.bf16.xpose.msra.mxu0 %v7886_v52  ;;  %v144_v58 = vrot.slane %v143_v61, 4  ;;  %v157_v48 = vrot.slane %v156_v6, 4  ;;  %v195_v7 = vadd.f32 %v194_v28, %v193_v45  ;;  %v170_v41 = vrot.slane %v169_v3, 4 }
  0x42   :  { %3201 = vmatprep.subr.bf16.mxu1 %v7887_v5  ;;  %3393 = vmatprep.subr.bf16.mxu0 %v7888_v19  ;;  %v183_v55 = vrot.slane %v182_v56, 4  ;;  %v220_v62 = vsel %vm141_vm0, %v4806_v59, 0.0  ;;  %v233_v11 = vsel %vm141_vm0, %v4811_v54, 0.0  ;;  %v209_v14 = vrot.slane %v208_v8, 4 }
  0x43   :  { %v145_v12 = vadd.f32 %v144_v58, %v143_v61  ;;  %v158_v29 = vadd.f32 %v157_v48, %v156_v6  ;;  %v196_v13 = vrot.slane %v195_v7, 4  ;;  %v171_v52 = vadd.f32 %v170_v41, %v169_v3 }
  0x44   :  { %v184_v5 = vadd.f32 %v183_v55, %v182_v56  ;;  %v221_v45 = vadd.f32 %v220_v62, %v219_v60  ;;  %v234_v53 = vadd.f32 %v233_v11, %v232_v1  ;;  %v210_v16 = vadd.f32 %v209_v14, %v208_v8 }
  0x45   :  { %v146_v0 = vrot.slane %v145_v12, 2  ;;  %v159_v28 = vrot.slane %v158_v29, 2  ;;  %v197_v15 = vadd.f32 %v196_v13, %v195_v7  ;;  %v172_v19 = vrot.slane %v171_v52, 2 }
  0x46   :  { %v185_v2 = vrot.slane %v184_v5, 2  ;;  %v222_v44 = vrot.slane %v221_v45, 4  ;;  %v235_v36 = vrot.slane %v234_v53, 4  ;;  %v211_v54 = vrot.slane %v210_v16, 2 }
  0x47   :  { %v147_v59 = vadd.f32 %v146_v0, %v145_v12  ;;  %v160_v63 = vadd.f32 %v159_v28, %v158_v29  ;;  %v198_v4 = vrot.slane %v197_v15, 2  ;;  %v7889_v61 = vpack.c.bf16 %v4175_v18, %v4170_v17 }
  0x48   :  { %v173_v3 = vadd.f32 %v172_v19, %v171_v52  ;;  %v186_v6 = vadd.f32 %v185_v2, %v184_v5  ;;  %v223_v60 = vadd.f32 %v222_v44, %v221_v45  ;;  %v236_v1 = vadd.f32 %v235_v36, %v234_v53  ;;  %v7894_v45 = vld [vmem:[#allocation6_spill] sm:$0xff]  ;;  %v7896_v53 = vld [vmem:[#allocation8_spill] sm:$0xff] }
  0x49   :  { %3203 = vmatpush1.bf16.xpose.msra.mxu1 %v7889_v61  ;;  %v7890_v56 = vpack.c.bf16 %v4190_v22, %v4185_v21  ;;  %v7891_v58 = vpack.c.bf16 %v4200_v24, %v4195_v23  ;;  %v148_v48 = vrot.slane %v147_v59, 1  ;;  %v161_v7 = vrot.slane %v160_v63, 1  ;;  %v7902_v61 = vld [vmem:[#allocation53_spill] sm:$0xff] }
  0x4a   :  { %v199_v8 = vadd.f32 %v198_v4, %v197_v15  ;;  %v212_v41 = vadd.f32 %v211_v54, %v210_v16  ;;  %v7892_v17 = vpack.c.bf16 %v4210_v26, %v4205_v25  ;;  %v174_v18 = vrot.slane %v173_v3, 1  ;;  %v7900_v15 = vld [vmem:[#allocation9_spill] sm:$0xff] }
  0x4b   :  { %3395 = vmatpush1.bf16.xpose.msra.mxu0 %v7890_v56  ;;  %3205 = vmatprep.subr.bf16.mxu1 %v7891_v58  ;;  %v187_v2 = vrot.slane %v186_v6, 1  ;;  %v224_v44 = vrot.slane %v223_v60, 2  ;;  %v237_v36 = vrot.slane %v236_v1, 2  ;;  %v149_v55 = vadd.f32 %v148_v48, %v147_v59  ;;  %v7906_v56 = vld [vmem:[#allocation59_spill] sm:$0xff]  ;;  %v7907_v58 = vld [vmem:[#allocation60_spill] sm:$0xff] }
  0x4c   :  { %3397 = vmatprep.subr.bf16.mxu0 %v7892_v17  ;;  %v4849_v62 = vadd.f32 %v161_v7, %v160_v63  ;;  %v200_v21 = vrot.slane %v199_v8, 1  ;;  %v213_v22 = vrot.slane %v212_v41, 1  ;;  %v4851_v11 = vadd.f32 %v174_v18, %v173_v3  ;;  %v7908_v7 = vld [vmem:[#allocation62_spill] sm:$0xff]  ;;  %v7910_v17 = vld [vmem:[#allocation64_spill] sm:$0xff] }
  0x4d   :  { %v4853_v23 = vadd.f32 %v187_v2, %v186_v6  ;;  %v225_v24 = vadd.f32 %v224_v44, %v223_v60  ;;  %v238_v4 = vadd.f32 %v237_v36, %v236_v1  ;;  %v419_v25 = vmul.f32 %v4574_v49, %v4574_v49  ;;  %v7905_v1 = vld [vmem:[#allocation58_spill] sm:$0xff]  ;;  %v7911_v2 = vld [vmem:[#allocation71_spill] sm:$0xff]  ;;  %v7912_v36 = vld [vmem:[#allocation72_spill] sm:$0xff] }
  0x4e   :  { %v4855_v54 = vadd.f32 %v200_v21, %v199_v8  ;;  %v4857_v12 = vadd.f32 %v213_v22, %v212_v41  ;;  %v420_v26 = vmul.f32 %v4584_v51, %v4584_v51  ;;  %v4865_v29 = vmul.f32 %v4589_v10, %v4589_v10  ;;  %v7909_v8 = vld [vmem:[#allocation63_spill] sm:$0xff]  ;;  %v7913_v21 = vld [vmem:[#allocation34_spill] sm:$0xff] }
  0x4f   :  { %v226_v63 = vrot.slane %v225_v24, 1  ;;  %v239_v59 = vrot.slane %v238_v4, 1  ;;  %v4869_v13 = vmul.f32 %v4594_v57, %v4594_v57  ;;  %v4873_v14 = vmul.f32 %v4604_v27, %v4604_v27  ;;  %v7914_v22 = vld [vmem:[#allocation42_spill] sm:$0xff] }
  0x50   :  { %v4877_v49 = vmul.f32 %v4609_v40, %v4609_v40  ;;  %v434_v51 = vmul.f32 %v4614_v42, %v4614_v42  ;;  %v435_v52 = vmul.f32 %v4624_v38, %v4624_v38  ;;  %v7893_v10 = vpack.c.bf16 %v4233_v33, %v4228_v32  ;;  %v7897_v38 = vld [vmem:[#allocation7_spill] sm:$0xff] }
  0x51   :  { %v4886_v57 = vadd.f32 %v226_v63, %v225_v24  ;;  %v4888_v5 = vadd.f32 %v239_v59, %v238_v4  ;;  %v436_v27 = vmul.f32 %v4629_v39, %v4629_v39  ;;  %v437_v40 = vmul.f32 %v4634_v31, %v4634_v31  ;;  %v7899_v31 = vld [vmem:[#allocation10_spill] sm:$0xff]  ;;  %v7915_v63 = vld [vmem:[#allocation35_spill] sm:$0xff] }
  0x52   :  { %3207 = vmatpush1.bf16.xpose.msra.mxu1 %v7893_v10  ;;  %v7895_v42 = vpack.c.bf16 %v4243_v35, %v7894_v45  ;;  %v7898_v0 = vpack.c.bf16 %v7896_v53, %v7897_v38  ;;  %v438_v32 = vmul.f32 %v4647_v37, %v4647_v37  ;;  %v439_v33 = vmul.f32 %v4652_v34, %v4652_v34  ;;  %v7916_v59 = vld [vmem:[#allocation43_spill] sm:$0xff]  ;;  %v7918_v53 = vld [vmem:[#allocation45_spill] sm:$0xff] }
  0x53   :  { %v4906_v39 = vmul.f32 %v4657_v9, %v4657_v9  ;;  %v4908_v28 = vmul.f32 0.020408163, %v149_v55  ;;  %v7901_v35 = vpack.c.bf16 %v7899_v31, %v7900_v15  ;;  %v4915_v16 = vmul.f32 %v4673_v20, %v4673_v20  ;;  %v7903_v20 = vld [vmem:[#allocation55_spill] sm:$0xff]  ;;  %v7919_v31 = vld [vmem:[#allocation37_spill] sm:$0xff]  ;;  %v7920_v15 = vld [vmem:[#allocation46_spill] sm:$0xff] }
  0x54   :  { %3399 = vmatpush1.bf16.xpose.msra.mxu0 %v7895_v42  ;;  %3209 = vmatprep.subr.bf16.mxu1 %v7898_v0  ;;  %v451_v37 = vmul.f32 %v4678_v46, %v4678_v46  ;;  %v452_v34 = vmul.f32 %v4683_v50, %v4683_v50  ;;  %v453_v9 = vmul.f32 %v4697_v30, %v4697_v30  ;;  %v7904_v46 = vld [vmem:[#allocation56_spill] sm:$0xff] }
  0x55   :  { %3401 = vmatprep.subr.bf16.mxu0 %v7901_v35  ;;  %v454_v19 = vmul.f32 %v4702_v47, %v4702_v47  ;;  %v455_v3 = vmul.f32 %v7902_v61, %v7902_v61  ;;  %v4929_v6 = vmul.f32 %v4719_v43, %v4719_v43  ;;  %v4933_v60 = vmul.f32 %v7903_v20, %v7903_v20  ;;  %v7917_v42 = vld [vmem:[#allocation36_spill] sm:$0xff]  ;;  %v7921_v61 = vld [vmem:[#allocation14_spill] sm:$0xff]  ;;  %v7922_v20 = vld [vmem:[#allocation13_spill] sm:$0xff] }
  0x56   :  { %v4937_v50 = vmul.f32 %v7904_v46, %v7904_v46  ;;  %v468_v30 = vmul.f32 %v7905_v1, %v7905_v1  ;;  %v469_v47 = vmul.f32 %v7906_v56, %v7906_v56  ;;  %v470_v48 = vmul.f32 %v7907_v58, %v7907_v58  ;;  %v7924_v1 = vld [vmem:[#allocation51_spill] sm:$0xff] }
  0x57   :  { %v471_v43 = vmul.f32 %v7908_v7, %v7908_v7  ;;  %v472_v41 = vmul.f32 %v7909_v8, %v7909_v8  ;;  %v473_v18 = vmul.f32 %v7910_v17, %v7910_v17  ;;  %v474_v44 = vmul.f32 %v7911_v2, %v7911_v2  ;;  %v7926_v8 = vld [vmem:[#allocation38_spill] sm:$0xff]  ;;  %v7928_v2 = vld [vmem:[#allocation16_spill] sm:$0xff] }
  0x58   :  { %v475_v55 = vmul.f32 %v7912_v36, %v7912_v36  ;;  %v485_v24 = vadd.f32 %v7914_v22, %v7913_v21  ;;  %v490_v4 = vsel %vm141_vm0, %v468_v30, 0.0  ;;  %v498_v10 = vadd.f32 %v7916_v59, %v7915_v63  ;;  %v7925_v30 = vld [vmem:[#allocation54_spill] sm:$0xff]  ;;  %v7929_v36 = vld [vmem:[#allocation15_spill] sm:$0xff]  ;;  %v7932_v22 = vld [vmem:[#allocation17_spill] sm:$0xff] }
  0x59   :  { %v503_v45 = vsel %vm141_vm0, %v469_v47, 0.0  ;;  %v511_v38 = vadd.f32 %v7918_v53, %v7917_v42  ;;  %v516_v0 = vsel %vm141_vm0, %v470_v48, 0.0  ;;  %v524_v35 = vadd.f32 %v7920_v15, %v7919_v31  ;;  %v7927_v47 = vld [vmem:[#allocation47_spill] sm:$0xff]  ;;  %v7931_v48 = vld [vmem:[#allocation18_spill] sm:$0xff]  ;;  %v7934_v59 = vld [vmem:[#allocation57_spill] sm:$0xff] }
  0x5a   :  { %v7923_v46 = vpack.c.bf16 %v7921_v61, %v7922_v20  ;;  %v486_v56 = vadd.f32 %v485_v24, %v7924_v1  ;;  %v499_v58 = vadd.f32 %v498_v10, %v7925_v30  ;;  %v529_v7 = vsel %vm141_vm0, %v471_v43, 0.0  ;;  %v7935_v53 = vld [vmem:[#allocation61_spill] sm:$0xff]  ;;  %v7936_v10 = vld [vmem:[#allocation39_spill] sm:$0xff]  ;;  %v7937_v15 = vld [vmem:[#allocation48_spill] sm:$0xff] }
  0x5b   :  { %v537_v17 = vadd.f32 %v7927_v47, %v7926_v8  ;;  %v7930_v21 = vpack.c.bf16 %v7928_v2, %v7929_v36  ;;  %v7933_v63 = vpack.c.bf16 %v7931_v48, %v7932_v22  ;;  %v512_v42 = vadd.f32 %v511_v38, %v7934_v59  ;;  %v7938_v61 = vld [vmem:[#allocation20_spill] sm:$0xff]  ;;  %v7939_v20 = vld [vmem:[#allocation19_spill] sm:$0xff]  ;;  %v7941_v1 = vld [vmem:[#allocation69_spill] sm:$0xff] }
  0x5c   :  { %3211 = vmatpush1.bf16.xpose.msra.mxu1 %v7923_v46  ;;  %v525_v31 = vadd.f32 %v524_v35, %v7935_v53  ;;  %v542_v24 = vsel %vm141_vm0, %v472_v41, 0.0  ;;  %v550_v43 = vadd.f32 %v7937_v15, %v7936_v10  ;;  %v7940_v46 = vpack.c.bf16 %v7938_v61, %v7939_v20  ;;  %v7942_v8 = vld [vmem:[#allocation70_spill] sm:$0xff]  ;;  %v7943_v2 = vld [vmem:[#allocation65_spill] sm:$0xff]  ;;  %v7945_v41 = vld [vmem:[#allocation40_spill] sm:$0xff] }
  0x5d   :  { %3403 = vmatpush1.bf16.xpose.msra.mxu0 %v7930_v21  ;;  %3213 = vmatprep.subr.bf16.mxu1 %v7933_v63  ;;  %v487_v30 = vadd.f32 %v486_v56, %v7941_v1  ;;  %v500_v47 = vadd.f32 %v499_v58, %v7942_v8  ;;  %v538_v36 = vadd.f32 %v537_v17, %v7943_v2  ;;  %v555_v21 = vsel %vm141_vm0, %v473_v18, 0.0  ;;  %v7944_v35 = vld [vmem:[#allocation66_spill] sm:$0xff]  ;;  %v7946_v63 = vld [vmem:[#allocation49_spill] sm:$0xff]  ;;  %v7947_v17 = vld [vmem:[#allocation67_spill] sm:$0xff] }
  0x5e   :  { %3405 = vmatprep.subr.bf16.mxu0 %v7940_v46  ;;  %v513_v38 = vadd.f32 %v512_v42, %v419_v25  ;;  %v526_v48 = vadd.f32 %v525_v31, %v420_v26  ;;  %v551_v22 = vadd.f32 %v550_v43, %v7944_v35  ;;  %v563_v59 = vadd.f32 %v7946_v63, %v7945_v41  ;;  %v7948_v42 = vld [vmem:[#allocation41_spill] sm:$0xff]  ;;  %v7949_v31 = vld [vmem:[#allocation50_spill] sm:$0xff] }
  0x5f   :  { %v488_v53 = vadd.f32 %v487_v30, %v434_v51  ;;  %v501_v10 = vadd.f32 %v500_v47, %v435_v52  ;;  %v539_v15 = vadd.f32 %v538_v36, %v4865_v29  ;;  %v568_v61 = vsel %vm141_vm0, %v474_v44, 0.0  ;;  %v7950_v29 = vld [vmem:[#allocation22_spill] sm:$0xff]  ;;  %v7951_v30 = vld [vmem:[#allocation21_spill] sm:$0xff]  ;;  %v7953_v47 = vld [vmem:[#allocation68_spill] sm:$0xff] }
  0x60   :  { %v514_v56 = vadd.f32 %v513_v38, %v436_v27  ;;  %v527_v20 = vadd.f32 %v526_v48, %v437_v40  ;;  %v552_v58 = vadd.f32 %v551_v22, %v4869_v13  ;;  %v564_v46 = vadd.f32 %v563_v59, %v7947_v17  ;;  %v7957_v36 = vld [vmem:[#allocation26_spill] sm:$0xff]  ;;  %v7958_v38 = vld [vmem:[#allocation25_spill] sm:$0xff] }
  0x61   :  { %v489_v18 = vadd.f32 %v488_v53, %v451_v37  ;;  %v502_v25 = vadd.f32 %v501_v10, %v452_v34  ;;  %v540_v26 = vadd.f32 %v539_v15, %v438_v32  ;;  %v576_v43 = vadd.f32 %v7949_v31, %v7948_v42  ;;  %v7954_v37 = vld [vmem:[#allocation24_spill] sm:$0xff]  ;;  %v7955_v34 = vld [vmem:[#allocation23_spill] sm:$0xff]  ;;  %v7960_v35 = vld [vmem:[#allocation29_spill] sm:$0xff] }
  0x62   :  { %v515_v1 = vadd.f32 %v514_v56, %v453_v9  ;;  %v528_v8 = vadd.f32 %v527_v20, %v454_v19  ;;  %v553_v51 = vadd.f32 %v552_v58, %v439_v33  ;;  %v565_v52 = vadd.f32 %v564_v46, %v4873_v14  ;;  %v7964_v31 = vld [vmem:[#allocation30_spill] sm:$0xff] }
  0x63   :  { %v7952_v44 = vpack.c.bf16 %v7950_v29, %v7951_v30  ;;  %v491_v27 = vadd.f32 %v490_v4, %v489_v18  ;;  %v504_v40 = vadd.f32 %v503_v45, %v502_v25  ;;  %v541_v13 = vadd.f32 %v540_v26, %v455_v3  ;;  %v7961_v4 = vld [vmem:[#allocation28_spill] sm:$0xff] }
  0x64   :  { %v577_v2 = vadd.f32 %v576_v43, %v7953_v47  ;;  %v7956_v32 = vpack.c.bf16 %v7954_v37, %v7955_v34  ;;  %v7959_v9 = vpack.c.bf16 %v7957_v36, %v7958_v38  ;;  %v517_v33 = vadd.f32 %v516_v0, %v515_v1  ;;  %v7967_v29 = vld [vmem:[#allocation32_spill] sm:$0xff] }
  0x65   :  { %3215 = vmatpush1.bf16.xpose.msra.mxu1 %v7952_v44  ;;  %v530_v19 = vadd.f32 %v529_v7, %v528_v8  ;;  %v554_v14 = vadd.f32 %v553_v51, %v4929_v6  ;;  %v581_v48 = vsel %vm141_vm0, %v475_v55, 0.0  ;;  %v7962_v45 = vpack.c.bf16 %v7960_v35, %v7961_v4 }
  0x66   :  { %3407 = vmatpush1.bf16.xpose.msra.mxu0 %v7956_v32  ;;  %3217 = vmatprep.subr.bf16.mxu1 %v7959_v9  ;;  %v492_v3 = vrot.slane %v491_v27, 4  ;;  %v505_v22 = vrot.slane %v504_v40, 4  ;;  %v543_v41 = vadd.f32 %v542_v24, %v541_v13  ;;  %v566_v63 = vadd.f32 %v565_v52, %v4906_v39  ;;  %v7966_v52 = vld [vmem:[#allocation33_spill] sm:$0xff] }
  0x67   :  { %3409 = vmatprep.subr.bf16.mxu0 %v7962_v45  ;;  %v518_v59 = vrot.slane %v517_v33, 4  ;;  %v531_v53 = vrot.slane %v530_v19, 4  ;;  %v556_v10 = vadd.f32 %v555_v21, %v554_v14  ;;  %v578_v15 = vadd.f32 %v577_v2, %v4877_v49  ;;  %v7963_v49 = vld [vmem:[#allocation31_spill] sm:$0xff] }
  0x68   :  { %v493_v0 = vadd.f32 %v492_v3, %v491_v27  ;;  %v506_v7 = vadd.f32 %v505_v22, %v504_v40  ;;  %v544_v56 = vrot.slane %v543_v41, 4  ;;  %v567_v6 = vadd.f32 %v566_v63, %v4933_v60 }
  0x69   :  { %v519_v55 = vadd.f32 %v518_v59, %v517_v33  ;;  %v532_v20 = vadd.f32 %v531_v53, %v530_v19  ;;  %v557_v58 = vrot.slane %v556_v10, 4  ;;  %v579_v17 = vadd.f32 %v578_v15, %v4915_v16 }
  0x6a   :  { %v494_v46 = vrot.slane %v493_v0, 2  ;;  %v507_v18 = vrot.slane %v506_v7, 2  ;;  %v545_v24 = vadd.f32 %v544_v56, %v543_v41  ;;  %v569_v25 = vadd.f32 %v568_v61, %v567_v6 }
  0x6b   :  { %v520_v39 = vrot.slane %v519_v55, 2  ;;  %v533_v26 = vrot.slane %v532_v20, 2  ;;  %v558_v42 = vadd.f32 %v557_v58, %v556_v10  ;;  %v580_v21 = vadd.f32 %v579_v17, %v4937_v50 }
  0x6c   :  { %v7965_v43 = vpack.c.bf16 %v7963_v49, %v7964_v31  ;;  %v495_v1 = vadd.f32 %v494_v46, %v493_v0  ;;  %v508_v60 = vadd.f32 %v507_v18, %v506_v7  ;;  %v546_v8 = vrot.slane %v545_v24, 2 }
  0x6d   :  { %v570_v51 = vrot.slane %v569_v25, 4  ;;  %v7968_v16 = vpack.c.bf16 %v7966_v52, %v7967_v29  ;;  %v521_v30 = vadd.f32 %v520_v39, %v519_v55  ;;  %v534_v44 = vadd.f32 %v533_v26, %v532_v20 }
  0x6e   :  { %3219 = vmatpush1.bf16.xpose.msra.mxu1 %v7965_v43  ;;  %v559_v61 = vrot.slane %v558_v42, 2  ;;  %v582_v27 = vadd.f32 %v581_v48, %v580_v21  ;;  %v496_v40 = vrot.slane %v495_v1, 1  ;;  %v509_v13 = vrot.slane %v508_v60, 1 }
  0x6f   :  { %3411 = vmatpush1.bf16.xpose.msra.mxu0 %v7968_v16  ;;  %v547_v47 = vadd.f32 %v546_v8, %v545_v24  ;;  %v571_v50 = vadd.f32 %v570_v51, %v569_v25  ;;  %v522_v2 = vrot.slane %v521_v30, 1  ;;  %v535_v37 = vrot.slane %v534_v44, 1  ;;  %v5074_v16 = vld [vmem:[%s7710_s0 + $0x40] sm:$0xff] }
  0x70   :  { %v560_v34 = vadd.f32 %v559_v61, %v558_v42  ;;  %v583_v32 = vrot.slane %v582_v27, 4  ;;  %v497_v36 = vadd.f32 %v496_v40, %v495_v1  ;;  %v510_v38 = vadd.f32 %v509_v13, %v508_v60  ;;  %v1660_v1 = vld [vmem:[%s7709_s3 + $0x18] sm:$0xff]  ;;  %v1677_v60 = vld [vmem:[%s7709_s3 + $0xa0] sm:$0xff] }
  0x71   :  { %v548_v9 = vrot.slane %v547_v47, 1  ;;  %v572_v33 = vrot.slane %v571_v50, 2  ;;  %v523_v19 = vadd.f32 %v522_v2, %v521_v30  ;;  %v536_v14 = vadd.f32 %v535_v37, %v534_v44  ;;  %v5079_v30 = vld [vmem:[%s7710_s0 + $0xc8] sm:$0xff]  ;;  %v5084_v44 = vld [vmem:[%s7710_s0 + $0x370] sm:$0x1] }
  0x72   :  { %v561_v35 = vrot.slane %v560_v34, 1  ;;  %v584_v4 = vadd.f32 %v583_v32, %v582_v27  ;;  %v5029_v48 = vmul.f32 0.020408163, %v4849_v62  ;;  %v5032_v22 = vmul.f32 0.020408163, %v4851_v11  ;;  %7969 = vst [vmem:[#allocation6_spill] sm:$0xff] %v5084_v44 }
  0x73   :  { %v549_v45 = vadd.f32 %v548_v9, %v547_v47  ;;  %v573_v3 = vadd.f32 %v572_v33, %v571_v50  ;;  %v5035_v59 = vmul.f32 0.020408163, %v4853_v23  ;;  %v5038_v53 = vmul.f32 0.020408163, %v4855_v54  ;;  %v5089_v47 = vld [vmem:[%s7710_s0 + $0x48] sm:$0xff]  ;;  %v5094_v50 = vld [vmem:[%s7710_s0 + $0xd0] sm:$0xff] }
  0x74   :  { %v562_v41 = vadd.f32 %v561_v35, %v560_v34  ;;  %v585_v63 = vrot.slane %v584_v4, 2  ;;  %v5041_v15 = vmul.f32 0.020408163, %v4857_v12  ;;  %v5044_v0 = vmul.f32 0.020408163, %v4886_v57  ;;  %v5109_v9 = vld [vmem:[%s7710_s0 + $0xd8] sm:$0xff] }
  0x75   :  { %v574_v10 = vrot.slane %v573_v3, 1  ;;  %v746_v62 = vmul.f32 %v4908_v28, %v4908_v28  ;;  %v5049_v7 = vmul.f32 0.020408163, %v4888_v5  ;;  %v729_v56 = vmul.f32 0.020408163, %v497_v36 }
  0x76   :  { %v586_v11 = vadd.f32 %v585_v63, %v584_v4  ;;  %v730_v23 = vmul.f32 0.020408163, %v510_v38  ;;  %v731_v55 = vmul.f32 0.020408163, %v523_v19  ;;  %v732_v54 = vmul.f32 0.020408163, %v536_v14 }
  0x77   :  { %v575_v6 = vadd.f32 %v574_v10, %v573_v3  ;;  %v733_v20 = vmul.f32 0.020408163, %v549_v45  ;;  %v734_v17 = vmul.f32 0.020408163, %v562_v41  ;;  %v747_v12 = vmul.f32 %v5029_v48, %v5029_v48  ;;  %v5099_v2 = vld [vmem:[%s7710_s0 + $0x378] sm:$0x1] }
  0x78   :  { %v587_v58 = vrot.slane %v586_v11, 1  ;;  %v748_v57 = vmul.f32 %v5032_v22, %v5032_v22  ;;  %v749_v18 = vmul.f32 %v5035_v59, %v5035_v59  ;;  %v750_v5 = vmul.f32 %v5038_v53, %v5038_v53  ;;  %7970 = vst [vmem:[#allocation8_spill] sm:$0xff] %v5099_v2  ;;  %v5104_v38 = vld [vmem:[%s7710_s0 + $0x50] sm:$0xff]  ;;  %v5114_v33 = vld [vmem:[%s7710_s0 + $0x380] sm:$0x1]  ;;  %v5119_v45 = vld [vmem:[%s7710_s0 + $0x58] sm:$0xff] }
  0x79   :  { %v735_v46 = vmul.f32 0.020408163, %v575_v6  ;;  %v751_v24 = vmul.f32 %v5041_v15, %v5041_v15  ;;  %v752_v39 = vmul.f32 %v5044_v0, %v5044_v0  ;;  %v753_v26 = vmul.f32 %v5049_v7, %v5049_v7  ;;  %7971 = vst [vmem:[#allocation7_spill] sm:$0xff] %v5114_v33  ;;  %v5124_v3 = vld [vmem:[%s7710_s0 + $0xe0] sm:$0xff]  ;;  %v5144_v6 = vld [vmem:[%s7710_s0 + $0x388] sm:$0x1] }
  0x7a   :  { %v588_v25 = vadd.f32 %v587_v58, %v586_v11  ;;  %v763_v42 = vsub.f32 %v729_v56, %v746_v62  ;;  %v764_v21 = vsub.f32 %v730_v23, %v747_v12  ;;  %v765_v49 = vsub.f32 %v731_v55, %v748_v57  ;;  %v5129_v62 = vld [vmem:[%s7710_s0 + $0x60] sm:$0xff]  ;;  %v5134_v11 = vld [vmem:[%s7710_s0 + $0x150] sm:$0xff]  ;;  %v5139_v23 = vld [vmem:[%s7710_s0 + $0x158] sm:$0xff]  ;;  %7972 = vst [vmem:[#allocation10_spill] sm:$0xff] %v5144_v6 }
  0x7b   :  { %v766_v31 = vsub.f32 %v732_v54, %v749_v18  ;;  %v767_v43 = vsub.f32 %v733_v20, %v750_v5  ;;  %v768_v51 = vsub.f32 %v734_v17, %v751_v24  ;;  %v769_v52 = vsub.f32 %v735_v46, %v752_v39  ;;  %v5155_v58 = vld [vmem:[%s7710_s0 + $0xe8] sm:$0xff]  ;;  %v5160_v17 = vld [vmem:[%s7710_s0 + $0x160] sm:$0xff]  ;;  %v5165_v12 = vld [vmem:[%s7710_s0 + $0x1d8] sm:$0xff] }
  0x7c   :  { %v736_v8 = vmul.f32 0.020408163, %v588_v25  ;;  %v780_v29 = vmax.f32 %v763_v42, 0.0  ;;  %v781_v61 = vmax.f32 %v764_v21, 0.0  ;;  %v782_v27 = vmax.f32 %v765_v49, 0.0  ;;  %7973 = vst [vmem:[#allocation9_spill] sm:$0xff] %v5165_v12 }
  0x7d   :  { %v783_v40 = vmax.f32 %v766_v31, 0.0  ;;  %v784_v13 = vmax.f32 %v767_v43, 0.0  ;;  %v785_v34 = vmax.f32 %v768_v51, 0.0  ;;  %v786_v32 = vmax.f32 %v769_v52, 0.0  ;;  %v5176_v18 = vld [vmem:[%s7710_s0 + $0x68] sm:$0xff]  ;;  %v5181_v5 = vld [vmem:[%s7710_s0 + $0xf0] sm:$0xff] }
  0x7e   :  { %v770_v37 = vsub.f32 %v736_v8, %v753_v26  ;;  %v797_v36 = vadd.f32 1e-05, %v780_v29  ;;  %v798_v19 = vadd.f32 1e-05, %v781_v61  ;;  %v799_v14 = vadd.f32 1e-05, %v782_v27 }
  0x7f   :  { %v800_v35 = vadd.f32 1e-05, %v783_v40  ;;  %v3220_v4 = vpack.c.bf16 %v1677_v60, %v1660_v1  ;;  %v801_v63 = vadd.f32 1e-05, %v784_v13  ;;  %v802_v10 = vadd.f32 1e-05, %v785_v34 }
  0x80   :  { %v787_v41 = vmax.f32 %v770_v37, 0.0  ;;  %3743 = vrsqrt.f32 %v797_v36  ;;  %v803_v56 = vadd.f32 1e-05, %v786_v32  ;;  %v241_v55 = vadd.f32 %v5079_v30, %v5074_v16  ;;  %v5186_v24 = vld [vmem:[%s7710_s0 + $0x168] sm:$0xff]  ;;  %v5191_v25 = vld [vmem:[%s7710_s0 + $0x1e0] sm:$0xff]  ;;  %v5208_v49 = vld [vmem:[%s7710_s0 + $0x70] sm:$0xff] }
  0x81   :  { %3745 = vrsqrt.f32 %v798_v19  ;;  %3221 = vmatprep.subr.bf16.mxu1 %v3220_v4  ;;  %v5150_v54 = vsel %vm141_vm0, %v5084_v44, 0.0  ;;  %v254_v57 = vadd.f32 %v5094_v50, %v5089_v47  ;;  %v5171_v46 = vsel %vm141_vm0, %v5099_v2, 0.0  ;;  %7974 = vst [vmem:[#allocation53_spill] sm:$0xff] %v5191_v25  ;;  %v5196_v39 = vld [vmem:[%s7710_s0 + $0x390] sm:$0x1]  ;;  %v5213_v31 = vld [vmem:[%s7710_s0 + $0xf8] sm:$0xff] }
  0x82   :  { %v804_v20 = vadd.f32 1e-05, %v787_v41  ;;  %3747 = vrsqrt.f32 %v799_v14  ;;  %7975 = vst [vmem:[#allocation55_spill] sm:$0xff] %v5196_v39  ;;  %v242_v26 = vadd.f32 %v241_v55, %v5134_v11  ;;  %v267_v42 = vadd.f32 %v5109_v9, %v5104_v38  ;;  %v5218_v43 = vld [vmem:[%s7710_s0 + $0x170] sm:$0xff]  ;;  %v5223_v1 = vld [vmem:[%s7710_s0 + $0x1e8] sm:$0xff]  ;;  %v5228_v60 = vld [vmem:[%s7710_s0 + $0x260] sm:$0xff] }
  0x83   :  { %3749 = vrsqrt.f32 %v800_v35  ;;  %v5203_v21 = vsel %vm141_vm0, %v5114_v33, 0.0  ;;  %7976 = vst [vmem:[#allocation56_spill] sm:$0xff] %v5223_v1  ;;  %7977 = vst [vmem:[#allocation58_spill] sm:$0xff] %v5228_v60  ;;  %v255_v8 = vadd.f32 %v254_v57, %v5139_v23  ;;  %v280_v51 = vadd.f32 %v5124_v3, %v5119_v45  ;;  %v5240_v29 = vld [vmem:[%s7710_s0 + $0x178] sm:$0xff]  ;;  %v5245_v61 = vld [vmem:[%s7710_s0 + $0x1f0] sm:$0xff] }
  0x84   :  { %3751 = vrsqrt.f32 %v801_v63  ;;  %v5235_v52 = vsel %vm141_vm0, %v5144_v6, 0.0  ;;  %7978 = vst [vmem:[#allocation59_spill] sm:$0xff] %v5245_v61  ;;  %v5250_v27 = vld [vmem:[%s7710_s0 + $0x268] sm:$0xff]  ;;  %v5255_v40 = vld [vmem:[%s7710_s0 + $0x398] sm:$0x1]  ;;  %v243_v13 = vadd.f32 %v242_v26, %v5165_v12  ;;  %v268_v37 = vadd.f32 %v267_v42, %v5160_v17  ;;  %v5269_v36 = vld [vmem:[%s7710_s0 + $0x270] sm:$0xff] }
  0x85   :  { %3753 = vrsqrt.f32 %v802_v10  ;;  %7979 = vst [vmem:[#allocation60_spill] sm:$0xff] %v5250_v27  ;;  %7980 = vst [vmem:[#allocation62_spill] sm:$0xff] %v5255_v40  ;;  %v293_v34 = vadd.f32 %v5155_v58, %v5129_v62  ;;  %v5264_v32 = vld [vmem:[%s7710_s0 + $0x1f8] sm:$0xff]  ;;  %v5274_v19 = vld [vmem:[%s7710_s0 + $0x2e8] sm:$0xff]  ;;  %v256_v14 = vadd.f32 %v255_v8, %v5191_v25  ;;  %v281_v35 = vadd.f32 %v280_v51, %v5186_v24 }
  0x86   :  { %3755 = vrsqrt.f32 %v803_v56  ;;  %7981 = vst [vmem:[#allocation63_spill] sm:$0xff] %v5264_v32  ;;  %7982 = vst [vmem:[#allocation64_spill] sm:$0xff] %v5269_v36  ;;  %v298_v4 = vsel %vm141_vm0, %v5196_v39, 0.0  ;;  %v5283_v41 = vld [vmem:[%s7710_s0 + $0x278] sm:$0xff]  ;;  %v5288_v63 = vld [vmem:[%s7710_s0 + $0x2f0] sm:$0xff]  ;;  %v244_v56 = vadd.f32 %v243_v13, %v5228_v60  ;;  %v269_v55 = vadd.f32 %v268_v37, %v5223_v1 }
  0x87   :  { %7983 = vst [vmem:[#allocation71_spill] sm:$0xff] %v5274_v19  ;;  %3757 = vrsqrt.f32 %v804_v20  ;;  %7984 = vst [vmem:[#allocation72_spill] sm:$0xff] %v5283_v41  ;;  %v5293_v10 = vld [vmem:[%s7710_s0 + $0x3a0] sm:$0x1]  ;;  %v294_v20 = vadd.f32 %v293_v34, %v5218_v43  ;;  %v5311_v42 = vld [vmem:[%s7710_s0 + $0x2f8] sm:$0xff]  ;;  %v257_v8 = vadd.f32 %v256_v14, %v5250_v27  ;;  %v282_v51 = vadd.f32 %v281_v35, %v5245_v61 }
  0x88   :  { %7985 = vst [vmem:[#allocation34_spill] sm:$0xff] %v5288_v63  ;;  %7986 = vst [vmem:[#allocation42_spill] sm:$0xff] %v5293_v10  ;;  %v5301_v57 = vld [vmem:[%s7710_s0 + $0x180] sm:$0xff]  ;;  %v306_v13 = vadd.f32 %v5181_v5, %v5176_v18  ;;  %v5319_v37 = vsel %vm141_vm0, %v5255_v40, 0.0  ;;  %v245_v14 = vadd.f32 %v244_v56, %v5274_v19  ;;  %v270_v35 = vadd.f32 %v269_v55, %v5269_v36  ;;  %v5339_v2 = vld [vmem:[%s7710_s0 + $0x208] sm:$0xff] }
  0x89   :  { %7987 = vst [vmem:[#allocation35_spill] sm:$0xff] %v5301_v57  ;;  %v5306_v26 = vld [vmem:[%s7710_s0 + $0x280] sm:$0xff]  ;;  %7989 = vst [vmem:[#allocation36_spill] sm:$0xff] %v5311_v42  ;;  %v295_v6 = vadd.f32 %v294_v20, %v5264_v32  ;;  %v319_v40 = vadd.f32 %v5213_v31, %v5208_v49  ;;  %v5344_v44 = vld [vmem:[%s7710_s0 + $0x308] sm:$0xff]  ;;  %v258_v56 = vadd.f32 %v257_v8, %v5288_v63  ;;  %v5351_v19 = vsel %vm141_vm0, %v5293_v10, 0.0 }
  0x8a   :  { %7988 = vst [vmem:[#allocation43_spill] sm:$0xff] %v5306_v26  ;;  %v5324_v34 = vld [vmem:[%s7710_s0 + $0x200] sm:$0xff]  ;;  %v3744_v33 = vpop.eup %3743  ;;  %7992 = vst [vmem:[#allocation46_spill] sm:$0xff] %v5339_v2  ;;  %v283_v55 = vadd.f32 %v282_v51, %v5283_v41  ;;  %v307_v20 = vadd.f32 %v306_v13, %v5240_v29  ;;  %v247_v27 = vadd.f32 %v5150_v54, %v245_v14  ;;  %v5360_v8 = vld [vmem:[%s7710_s0 + $0x288] sm:$0xff] }
  0x8b   :  { %7990 = vst [vmem:[#allocation45_spill] sm:$0xff] %v5324_v34  ;;  %v5329_v39 = vld [vmem:[%s7710_s0 + $0x300] sm:$0xff]  ;;  %7993 = vst [vmem:[#allocation14_spill] sm:$0xff] %v5344_v44  ;;  %v3746_v36 = vpop.eup %3745  ;;  %v271_v60 = vadd.f32 %v270_v35, %v5311_v42  ;;  %v296_v32 = vadd.f32 %v295_v6, %v5306_v26  ;;  %v320_v61 = vadd.f32 %v319_v40, %v5301_v57 }
  0x8c   :  { %7991 = vst [vmem:[#allocation37_spill] sm:$0xff] %v5329_v39  ;;  %v3748_v1 = vpop.eup %3747  ;;  %v851_v25 = vcombine.low %v3744_v33, %v3746_v36  ;;  %v260_v51 = vadd.f32 %v5171_v46, %v258_v56  ;;  %v284_v13 = vadd.f32 %v283_v55, %v5329_v39  ;;  %v308_v10 = vadd.f32 %v307_v20, %v5324_v34  ;;  %v7994_v42 = vld [vmem:[#allocation2_spill] sm:$0xff]  ;;  %v5372_v46 = vld [vmem:[%s7710_s0 + $0x310] sm:$0xff] }
  0x8d   :  { %v3750_v54 = vpop.eup %3749  ;;  %v248_v14 = vrot.slane %v247_v27, 4  ;;  %v273_v35 = vadd.f32 %v5203_v21, %v271_v60  ;;  %v297_v6 = vadd.f32 %v296_v32, %v5344_v44  ;;  %v321_v40 = vadd.f32 %v320_v61, %v5339_v2 }
  0x8e   :  { %v3752_v33 = vpop.eup %3751  ;;  %v852_v36 = vcombine.low %v3748_v1, %v3750_v54  ;;  %v861_v63 = vrot.slane %v851_v25, %v7994_v42  ;;  %v261_v56 = vrot.slane %v260_v51, 4  ;;  %v286_v55 = vadd.f32 %v5235_v52, %v284_v13 }
  0x8f   :  { %v3754_v20 = vpop.eup %3753  ;;  %v249_v39 = vadd.f32 %v248_v14, %v247_v27  ;;  %v274_v26 = vrot.slane %v273_v35, 4  ;;  %v299_v21 = vadd.f32 %v298_v4, %v297_v6  ;;  %v309_v60 = vadd.f32 %v308_v10, %v5360_v8  ;;  %v5382_v4 = vld [vmem:[%s7710_s0 + $0x290] sm:$0xff] }
  0x90   :  { %v3756_v32 = vpop.eup %3755  ;;  %v853_v61 = vcombine.low %v3752_v33, %v3754_v20  ;;  %v868_v1 = vrot.slane %v852_v36, %v7994_v42  ;;  %v262_v54 = vadd.f32 %v261_v56, %v260_v51  ;;  %v287_v25 = vrot.slane %v286_v55, 4 }
  0x91   :  { %v3758_v44 = vpop.eup %3757  ;;  %v250_v41 = vrot.slane %v249_v39, 2  ;;  %v275_v2 = vadd.f32 %v274_v26, %v273_v35  ;;  %v300_v34 = vrot.slane %v299_v21, 4  ;;  %v310_v12 = vadd.f32 %v309_v60, %v5372_v46 }
  0x92   :  { %v854_v57 = vcombine.low %v3756_v32, %v3758_v44  ;;  %v875_v52 = vrot.slane %v853_v61, %v7994_v42  ;;  %v883_v27 = vcombine.low %v861_v63, %v868_v1  ;;  %v263_v13 = vrot.slane %v262_v54, 2  ;;  %v5390_v63 = vld [vmem:[%s7710_s0 + $0x318] sm:$0xff] }
  0x93   :  { %v251_v10 = vadd.f32 %v250_v41, %v249_v39  ;;  %v276_v14 = vrot.slane %v275_v2, 2  ;;  %v288_v51 = vadd.f32 %v287_v25, %v286_v55  ;;  %v301_v6 = vadd.f32 %v300_v34, %v299_v21  ;;  %v5395_v41 = vld [vmem:[%s7710_s0 + $0x78] sm:$0xff] }
  0x94   :  { %v882_v33 = vrot.slane %v854_v57, %v7994_v42  ;;  %v891_v26 = vrot.slane %v883_v27, %v7994_v42  ;;  %v264_v35 = vadd.f32 %v263_v13, %v262_v54  ;;  %v312_v44 = vadd.f32 %v5319_v37, %v310_v12  ;;  %v5400_v57 = vld [vmem:[%s7710_s0 + $0x100] sm:$0xff]  ;;  %v5414_v54 = vld [vmem:[%s7710_s0 + $0x188] sm:$0xff] }
  0x95   :  { %v252_v36 = vrot.slane %v251_v10, 1  ;;  %v277_v56 = vadd.f32 %v276_v14, %v275_v2  ;;  %v289_v20 = vrot.slane %v288_v51, 2  ;;  %v302_v60 = vrot.slane %v301_v6, 2  ;;  %v5406_v2 = vld [vmem:[%s7710_s0 + $0x3a8] sm:$0x1]  ;;  %v831_v27 = vld [vmem:[%s7711_s1] sm:$0xff] }
  0x96   :  { %v884_v39 = vcombine.low %v875_v52, %v882_v33  ;;  %v265_v12 = vrot.slane %v264_v35, 1  ;;  %v313_v37 = vrot.slane %v312_v44, 4  ;;  %v322_v34 = vadd.f32 %v321_v40, %v5382_v4  ;;  %v5429_v33 = vld [vmem:[%s7710_s0 + $0x210] sm:$0xff] }
  0x97   :  { %v5408_v55 = vadd.f32 %v252_v36, %v251_v10  ;;  %v278_v21 = vrot.slane %v277_v56, 1  ;;  %v290_v32 = vadd.f32 %v289_v20, %v288_v51  ;;  %v303_v61 = vadd.f32 %v302_v60, %v301_v6 }
  0x98   :  { %v898_v1 = vrot.slane %v884_v39, %v7994_v42  ;;  %v5416_v25 = vadd.f32 %v265_v12, %v264_v35  ;;  %v314_v40 = vadd.f32 %v313_v37, %v312_v44  ;;  %v323_v52 = vadd.f32 %v322_v34, %v5390_v63 }
  0x99   :  { %7995 = vst [vmem:[#allocation13_spill] sm:$0xff] %v5408_v55  ;;  %v5422_v13 = vadd.f32 %v278_v21, %v277_v56  ;;  %v291_v10 = vrot.slane %v290_v32, 1  ;;  %v304_v14 = vrot.slane %v303_v61, 1  ;;  %v332_v51 = vadd.f32 %v5400_v57, %v5395_v41 }
  0x9a   :  { %7996 = vst [vmem:[#allocation51_spill] sm:$0xff] %v5416_v25  ;;  %v899_v6 = vcombine.low %v891_v26, %v898_v1  ;;  %v315_v35 = vrot.slane %v314_v40, 2  ;;  %v325_v44 = vadd.f32 %v5351_v19, %v323_v52  ;;  %v337_v36 = vsel %vm141_vm0, %v5406_v2, 0.0  ;;  %v8004_v52 = vld [vmem:[#allocation5_spill] sm:$0xff] }
  0x9b   :  { %7997 = vst [vmem:[#allocation54_spill] sm:$0xff] %v5422_v13  ;;  %v5434_v20 = vadd.f32 %v291_v10, %v290_v32  ;;  %v5436_v56 = vadd.f32 %v304_v14, %v303_v61  ;;  %v333_v60 = vadd.f32 %v332_v51, %v5414_v54  ;;  %v5441_v26 = vmul.f32 %v5074_v16, %v5074_v16  ;;  %v8000_v61 = vld [vmem:[#allocation3_spill] sm:$0xff]  ;;  %v8008_v14 = vld [vmem:[#allocation12_spill] sm:$0xff] }
  0x9c   :  { %v966_v39 = vmul.f32 %v899_v6, %v831_v27  ;;  %v316_v12 = vadd.f32 %v315_v35, %v314_v40  ;;  %v326_v37 = vrot.slane %v325_v44, 4  ;;  %v5445_v34 = vmul.f32 %v5089_v47, %v5089_v47  ;;  %v8002_v40 = vld [vmem:[#allocation4_spill] sm:$0xff]  ;;  %v8006_v10 = vld [vmem:[#allocation11_spill] sm:$0xff] }
  0x9d   :  { %7998 = vst [vmem:[#allocation38_spill] sm:$0xff] %v5434_v20  ;;  %7999 = vst [vmem:[#allocation47_spill] sm:$0xff] %v5436_v56  ;;  %v334_v19 = vadd.f32 %v333_v60, %v5429_v33  ;;  %v5450_v21 = vmul.f32 %v5104_v38, %v5104_v38  ;;  %v5454_v32 = vmul.f32 %v5119_v45, %v5119_v45  ;;  %v8010_v45 = vld [vmem:[#allocation27_spill] sm:$0xff]  ;;  %v8014_v60 = vld [vmem:[#allocation52_spill] sm:$0xff] }
  0x9e   :  { %v5458_v16 = vmul.f32 %v5129_v62, %v5129_v62  ;;  %v5461_v1 = vrot.slane %v966_v39, %v8000_v61  ;;  %v5464_v47 = vrot.slane %v966_v39, %v8002_v40  ;;  %v5467_v27 = vrot.slane %v966_v39, %v8004_v52  ;;  %v8012_v62 = vld [vmem:[#allocation44_spill] sm:$0xff]  ;;  %v8044_v20 = vld [vmem:[#allocation55_spill] sm:$0xff] }
  0x9f   :  { %v5470_v38 = vrot.slane %v966_v39, %v8006_v10  ;;  %v5473_v51 = vrot.slane %v966_v39, %v8008_v14  ;;  %v5476_v6 = vrot.slane %v966_v39, %v8010_v45  ;;  %v5479_v35 = vrot.slane %v966_v39, %v8012_v62  ;;  %v5495_v62 = vld [vmem:[%s7710_s0 + $0x298] sm:$0xff] }
  0xa0   :  { %8001 = vst [vmem:[#allocation16_spill] sm:$0xff] %v5461_v1  ;;  %8003 = vst [vmem:[#allocation15_spill] sm:$0xff] %v5464_v47  ;;  %v5482_v61 = vrot.slane %v966_v39, %v8014_v60  ;;  %v1060_v56 = vmul.f32 %v5461_v1, %v4908_v28  ;;  %v1061_v52 = vmul.f32 %v5464_v47, %v5029_v48  ;;  %v8037_v1 = vld [vmem:[#allocation37_spill] sm:$0xff] }
  0xa1   :  { %8005 = vst [vmem:[#allocation18_spill] sm:$0xff] %v5467_v27  ;;  %8007 = vst [vmem:[#allocation17_spill] sm:$0xff] %v5470_v38  ;;  %v1062_v10 = vmul.f32 %v5467_v27, %v5032_v22  ;;  %v1063_v14 = vmul.f32 %v5470_v38, %v5035_v59  ;;  %v1064_v39 = vmul.f32 %v5473_v51, %v5038_v53  ;;  %v3777_v59 = vld [vmem:[%s7710_s0 + $0x8] sm:$0xff]  ;;  %v5512_v53 = vld [vmem:[%s7710_s0 + $0x320] sm:$0xff] }
  0xa2   :  { %8009 = vst [vmem:[#allocation57_spill] sm:$0xff] %v5473_v51  ;;  %8011 = vst [vmem:[#allocation61_spill] sm:$0xff] %v5476_v6  ;;  %v1065_v28 = vmul.f32 %v5476_v6, %v5041_v15  ;;  %v1066_v48 = vmul.f32 %v5479_v35, %v5044_v0  ;;  %v1067_v22 = vmul.f32 %v5482_v61, %v5049_v7  ;;  %v317_v15 = vrot.slane %v316_v12, 1  ;;  %v8032_v38 = vld [vmem:[#allocation43_spill] sm:$0xff] }
  0xa3   :  { %8013 = vst [vmem:[#allocation39_spill] sm:$0xff] %v5479_v35  ;;  %8015 = vst [vmem:[#allocation48_spill] sm:$0xff] %v5482_v61  ;;  %v1094_v27 = vcombine.low %v1060_v56, %v1061_v52  ;;  %v1095_v60 = vcombine.low %v1062_v10, %v1063_v14  ;;  %v1213_v45 = vmul.f32 %v3777_v59, %v5464_v47 }
  0xa4   :  { %v1096_v51 = vcombine.low %v1064_v39, %v1065_v28  ;;  %v1097_v6 = vcombine.low %v1066_v48, %v1067_v22  ;;  %v327_v0 = vadd.f32 %v326_v37, %v325_v44  ;;  %v335_v35 = vadd.f32 %v334_v19, %v5495_v62 }
  0xa5   :  { %v1104_v7 = vrot.slane %v1094_v27, %v7994_v42  ;;  %v1111_v56 = vrot.slane %v1095_v60, %v7994_v42  ;;  %v5517_v52 = vadd.f32 %v317_v15, %v316_v12  ;;  %v5521_v10 = vmul.f32 %v5176_v18, %v5176_v18 }
  0xa6   :  { %v1118_v14 = vrot.slane %v1096_v51, %v7994_v42  ;;  %v1125_v59 = vrot.slane %v1097_v6, %v7994_v42  ;;  %v328_v61 = vrot.slane %v327_v0, 2  ;;  %v336_v39 = vadd.f32 %v335_v35, %v5512_v53 }
  0xa7   :  { %8016 = vst [vmem:[#allocation20_spill] sm:$0xff] %v5517_v52  ;;  %v1126_v44 = vcombine.low %v1104_v7, %v1111_v56  ;;  %v5528_v37 = vmul.f32 %v5208_v49, %v5208_v49  ;;  %v5532_v12 = vmul.f32 %v5395_v41, %v5395_v41  ;;  %v5536_v18 = vmul.f32 %v5079_v30, %v5079_v30 }
  0xa8   :  { %v1127_v19 = vcombine.low %v1118_v14, %v1125_v59  ;;  %v329_v27 = vadd.f32 %v328_v61, %v327_v0  ;;  %v338_v51 = vadd.f32 %v337_v36, %v336_v39  ;;  %v5540_v6 = vmul.f32 %v5094_v50, %v5094_v50  ;;  %v8020_v59 = vld [vmem:[#allocation9_spill] sm:$0xff] }
  0xa9   :  { %v1134_v35 = vrot.slane %v1126_v44, %v7994_v42  ;;  %v5545_v49 = vmul.f32 %v5109_v9, %v5109_v9  ;;  %v5549_v41 = vmul.f32 %v5124_v3, %v5124_v3  ;;  %v5553_v30 = vmul.f32 %v5155_v58, %v5155_v58  ;;  %v969_v9 = vld [vmem:[%s7712_s2] sm:$0xff]  ;;  %v8021_v39 = vld [vmem:[#allocation53_spill] sm:$0xff]  ;;  %v8022_v44 = vld [vmem:[#allocation56_spill] sm:$0xff] }
  0xaa   :  { %v1141_v36 = vrot.slane %v1127_v19, %v7994_v42  ;;  %v330_v61 = vrot.slane %v329_v27, 1  ;;  %v339_v60 = vrot.slane %v338_v51, 4  ;;  %v5558_v50 = vmul.f32 %v5181_v5, %v5181_v5  ;;  %v8023_v19 = vld [vmem:[#allocation59_spill] sm:$0xff] }
  0xab   :  { %v5565_v3 = vmul.f32 %v5213_v31, %v5213_v31  ;;  %v5569_v58 = vmul.f32 %v5400_v57, %v5400_v57  ;;  %v408_v28 = vmul.f32 %v5134_v11, %v5134_v11  ;;  %v409_v48 = vmul.f32 %v5139_v23, %v5139_v23  ;;  %v8018_v11 = vld [vmem:[#allocation35_spill] sm:$0xff] }
  0xac   :  { %v1142_v5 = vcombine.low %v1134_v35, %v1141_v36  ;;  %v5575_v22 = vadd.f32 %v330_v61, %v329_v27  ;;  %v340_v15 = vadd.f32 %v339_v60, %v338_v51  ;;  %v410_v0 = vmul.f32 %v5160_v17, %v5160_v17  ;;  %v8024_v51 = vld [vmem:[#allocation63_spill] sm:$0xff]  ;;  %v8026_v61 = vld [vmem:[#allocation45_spill] sm:$0xff] }
  0xad   :  { %v411_v31 = vmul.f32 %v5186_v24, %v5186_v24  ;;  %v412_v57 = vmul.f32 %v5218_v43, %v5218_v43  ;;  %v5585_v7 = vmul.f32 %v5240_v29, %v5240_v29  ;;  %v5589_v23 = vmul.f32 %v8018_v11, %v8018_v11 }
  0xae   :  { %8017 = vst [vmem:[#allocation19_spill] sm:$0xff] %v5575_v22  ;;  %v5591_v56 = vsub.f32 %v969_v9, %v1142_v5  ;;  %v341_v14 = vrot.slane %v340_v15, 2  ;;  %v5595_v17 = vmul.f32 %v5414_v54, %v5414_v54  ;;  %v425_v24 = vmul.f32 %v8020_v59, %v8020_v59  ;;  %v8027_v9 = vld [vmem:[#allocation46_spill] sm:$0xff] }
  0xaf   :  { %v426_v43 = vmul.f32 %v8021_v39, %v8021_v39  ;;  %v427_v29 = vmul.f32 %v8022_v44, %v8022_v44  ;;  %v428_v27 = vmul.f32 %v8023_v19, %v8023_v19  ;;  %v429_v35 = vmul.f32 %v8024_v51, %v8024_v51  ;;  %v8028_v59 = vld [vmem:[#allocation58_spill] sm:$0xff]  ;;  %v8029_v44 = vld [vmem:[#allocation60_spill] sm:$0xff] }
  0xb0   :  { %8019 = vst [vmem:[#allocation69_spill] sm:$0xff] %v5591_v56  ;;  %v5609_v36 = vrot.slane %v5591_v56, %v8002_v40  ;;  %v342_v54 = vadd.f32 %v341_v14, %v340_v15  ;;  %v430_v60 = vmul.f32 %v8026_v61, %v8026_v61  ;;  %v5615_v5 = vmul.f32 %v8027_v9, %v8027_v9  ;;  %v8030_v51 = vld [vmem:[#allocation64_spill] sm:$0xff]  ;;  %v8038_v22 = vld [vmem:[#allocation14_spill] sm:$0xff] }
  0xb1   :  { %v5619_v11 = vmul.f32 %v5429_v33, %v5429_v33  ;;  %v442_v39 = vmul.f32 %v8028_v59, %v8028_v59  ;;  %v443_v19 = vmul.f32 %v8029_v44, %v8029_v44  ;;  %v444_v15 = vmul.f32 %v8030_v51, %v8030_v51  ;;  %v8031_v40 = vld [vmem:[#allocation72_spill] sm:$0xff]  ;;  %v8033_v51 = vld [vmem:[#allocation71_spill] sm:$0xff] }
  0xb2   :  { %8025 = vst [vmem:[#allocation70_spill] sm:$0xff] %v5609_v36  ;;  %v1420_v14 = vadd.f32 %v5609_v36, %v1213_v45  ;;  %v343_v61 = vrot.slane %v342_v54, 1  ;;  %v445_v9 = vmul.f32 %v8031_v40, %v8031_v40  ;;  %v446_v42 = vmul.f32 %v8032_v38, %v8032_v38  ;;  %v8035_v40 = vld [vmem:[#allocation34_spill] sm:$0xff]  ;;  %v8036_v56 = vld [vmem:[#allocation36_spill] sm:$0xff] }
  0xb3   :  { %v447_v33 = vmul.f32 %v5360_v8, %v5360_v8  ;;  %v5636_v59 = vmul.f32 %v5382_v4, %v5382_v4  ;;  %v5640_v44 = vmul.f32 %v5495_v62, %v5495_v62  ;;  %v459_v45 = vmul.f32 %v8033_v51, %v8033_v51  ;;  %v8041_v51 = vld [vmem:[#allocation8_spill] sm:$0xff] }
  0xb4   :  { %v1539_v36 = vmax.f32 %v1420_v14, 0.0  ;;  %v5644_v47 = vadd.f32 %v343_v61, %v342_v54  ;;  %v460_v38 = vmul.f32 %v8035_v40, %v8035_v40  ;;  %v461_v8 = vmul.f32 %v8036_v56, %v8036_v56  ;;  %v8040_v61 = vld [vmem:[#allocation6_spill] sm:$0xff]  ;;  %v8042_v40 = vld [vmem:[#allocation7_spill] sm:$0xff] }
  0xb5   :  { %v462_v4 = vmul.f32 %v8037_v1, %v8037_v1  ;;  %v463_v52 = vmul.f32 %v8038_v22, %v8038_v22  ;;  %v464_v62 = vmul.f32 %v5372_v46, %v5372_v46  ;;  %v5658_v14 = vmul.f32 %v5390_v63, %v5390_v63 }
  0xb6   :  { %8034 = vst [vmem:[#allocation65_spill] sm:$0xff] %v5644_v47  ;;  %2222 = vmatprep.mubr.f32.mxu1 %v1539_v36  ;;  %v5662_v54 = vmul.f32 %v5512_v53, %v5512_v53  ;;  %v476_v56 = vmul.f32 %v8040_v61, %v8040_v61  ;;  %v477_v1 = vmul.f32 %v8041_v51, %v8041_v51  ;;  %v8043_v47 = vld [vmem:[#allocation10_spill] sm:$0xff] }
  0xb7   :  { %v478_v22 = vmul.f32 %v8042_v40, %v8042_v40  ;;  %v479_v46 = vmul.f32 %v8043_v47, %v8043_v47  ;;  %v480_v63 = vmul.f32 %v8044_v20, %v8044_v20  ;;  %v8045_v36 = vld [vmem:[#allocation62_spill] sm:$0xff]  ;;  %v5680_v61 = vmul.f32 %v5406_v2, %v5406_v2 }
  0xb8   :  { %8039 = vst [vmem:[#allocation66_spill] sm:$0xff] %v5662_v54  ;;  %v481_v13 = vmul.f32 %v8045_v36, %v8045_v36  ;;  %v8046_v53 = vld [vmem:[#allocation42_spill] sm:$0xff]  ;;  %v589_v51 = vadd.f32 %v5536_v18, %v5441_v26  ;;  %v594_v40 = vsel %vm141_vm0, %v476_v56, 0.0  ;;  %v602_v47 = vadd.f32 %v5540_v6, %v5445_v34 }
  0xb9   :  { %v482_v25 = vmul.f32 %v8046_v53, %v8046_v53  ;;  %8047 = vst [vmem:[#allocation40_spill] sm:$0xff] %v5680_v61  ;;  %v607_v20 = vsel %vm141_vm0, %v477_v1, 0.0  ;;  %v615_v36 = vadd.f32 %v5545_v49, %v5450_v21  ;;  %v620_v55 = vsel %vm141_vm0, %v478_v22, 0.0 }
  0xba   :  { %v628_v53 = vadd.f32 %v5549_v41, %v5454_v32  ;;  %v590_v2 = vadd.f32 %v589_v51, %v408_v28  ;;  %v603_v61 = vadd.f32 %v602_v47, %v409_v48  ;;  %v633_v54 = vsel %vm141_vm0, %v479_v46, 0.0 }
  0xbb   :  { %v641_v26 = vadd.f32 %v5553_v30, %v5458_v16  ;;  %v616_v18 = vadd.f32 %v615_v36, %v410_v0  ;;  %v646_v34 = vsel %vm141_vm0, %v480_v63, 0.0  ;;  %v654_v6 = vadd.f32 %v5558_v50, %v5521_v10 }
  0xbc   :  { %v629_v56 = vadd.f32 %v628_v53, %v411_v31  ;;  %v591_v21 = vadd.f32 %v590_v2, %v425_v24  ;;  %v604_v49 = vadd.f32 %v603_v61, %v426_v43  ;;  %v659_v22 = vsel %vm141_vm0, %v481_v13, 0.0 }
  0xbd   :  { %v642_v1 = vadd.f32 %v641_v26, %v412_v57  ;;  %v617_v32 = vadd.f32 %v616_v18, %v427_v29  ;;  %v655_v28 = vadd.f32 %v654_v6, %v5585_v7  ;;  %v667_v48 = vadd.f32 %v5565_v3, %v5528_v37 }
  0xbe   :  { %v630_v41 = vadd.f32 %v629_v56, %v428_v27  ;;  %v592_v16 = vadd.f32 %v591_v21, %v442_v39  ;;  %v605_v30 = vadd.f32 %v604_v49, %v443_v19  ;;  %v672_v31 = vsel %vm141_vm0, %v482_v25, 0.0 }
  0xbf   :  { %v643_v0 = vadd.f32 %v642_v1, %v429_v35  ;;  %v618_v46 = vadd.f32 %v617_v32, %v444_v15  ;;  %v656_v10 = vadd.f32 %v655_v28, %v430_v60  ;;  %v668_v50 = vadd.f32 %v667_v48, %v5589_v23  ;;  %v8048_v47 = vld [vmem:[#allocation66_spill] sm:$0xff] }
  0xc0   :  { %v631_v63 = vadd.f32 %v630_v41, %v445_v9  ;;  %v593_v57 = vadd.f32 %v592_v16, %v459_v45  ;;  %v606_v24 = vadd.f32 %v605_v30, %v460_v38  ;;  %v680_v43 = vadd.f32 %v5569_v58, %v5532_v12  ;;  %v8049_v56 = vld [vmem:[#allocation40_spill] sm:$0xff] }
  0xc1   :  { %v644_v13 = vadd.f32 %v643_v0, %v446_v42  ;;  %v619_v7 = vadd.f32 %v618_v46, %v461_v8  ;;  %v657_v27 = vadd.f32 %v656_v10, %v447_v33  ;;  %v669_v37 = vadd.f32 %v668_v50, %v5615_v5 }
  0xc2   :  { %v632_v29 = vadd.f32 %v631_v63, %v462_v4  ;;  %v595_v3 = vadd.f32 %v594_v40, %v593_v57  ;;  %v608_v35 = vadd.f32 %v607_v20, %v606_v24  ;;  %v681_v25 = vadd.f32 %v680_v43, %v5595_v17 }
  0xc3   :  { %v645_v39 = vadd.f32 %v644_v13, %v463_v52  ;;  %v621_v19 = vadd.f32 %v620_v55, %v619_v7  ;;  %v658_v15 = vadd.f32 %v657_v27, %v464_v62  ;;  %v670_v23 = vadd.f32 %v669_v37, %v5636_v59  ;;  %v8050_v7 = vld [vmem:[#allocation13_spill] sm:$0xff]  ;;  %v8051_v27 = vld [vmem:[#allocation51_spill] sm:$0xff] }
  0xc4   :  { %v634_v60 = vadd.f32 %v633_v54, %v632_v29  ;;  %v596_v9 = vrot.slane %v595_v3, 4  ;;  %v609_v42 = vrot.slane %v608_v35, 4  ;;  %v682_v12 = vadd.f32 %v681_v25, %v5619_v11 }
  0xc5   :  { %v647_v45 = vadd.f32 %v646_v34, %v645_v39  ;;  %v622_v58 = vrot.slane %v621_v19, 4  ;;  %v660_v33 = vadd.f32 %v659_v22, %v658_v15  ;;  %v671_v5 = vadd.f32 %v670_v23, %v5658_v14  ;;  %v8052_v39 = vld [vmem:[#allocation54_spill] sm:$0xff]  ;;  %v8054_v23 = vld [vmem:[#allocation47_spill] sm:$0xff] }
  0xc6   :  { %v635_v38 = vrot.slane %v634_v60, 4  ;;  %v597_v8 = vadd.f32 %v596_v9, %v595_v3  ;;  %v610_v4 = vadd.f32 %v609_v42, %v608_v35  ;;  %v683_v17 = vadd.f32 %v682_v12, %v5640_v44  ;;  %v8055_v42 = vld [vmem:[#allocation20_spill] sm:$0xff] }
  0xc7   :  { %v648_v52 = vrot.slane %v647_v45, 4  ;;  %v623_v55 = vadd.f32 %v622_v58, %v621_v19  ;;  %v661_v62 = vrot.slane %v660_v33, 4  ;;  %v673_v61 = vadd.f32 %v672_v31, %v671_v5  ;;  %v8053_v19 = vld [vmem:[#allocation38_spill] sm:$0xff]  ;;  %v8057_v5 = vld [vmem:[#allocation65_spill] sm:$0xff] }
  0xc8   :  { %v636_v54 = vadd.f32 %v635_v38, %v634_v60  ;;  %v598_v59 = vrot.slane %v597_v8, 2  ;;  %v611_v51 = vrot.slane %v610_v4, 2  ;;  %v684_v20 = vadd.f32 %v683_v17, %v8048_v47  ;;  %v8056_v38 = vld [vmem:[#allocation19_spill] sm:$0xff] }
  0xc9   :  { %v649_v40 = vadd.f32 %v648_v52, %v647_v45  ;;  %v624_v11 = vrot.slane %v623_v55, 2  ;;  %v662_v53 = vadd.f32 %v661_v62, %v660_v33  ;;  %v674_v2 = vrot.slane %v673_v61, 4 }
  0xca   :  { %v637_v36 = vrot.slane %v636_v54, 2  ;;  %v599_v26 = vadd.f32 %v598_v59, %v597_v8  ;;  %v612_v14 = vadd.f32 %v611_v51, %v610_v4  ;;  %v685_v34 = vsel %vm141_vm0, %v8049_v56, 0.0 }
  0xcb   :  { %v650_v18 = vrot.slane %v649_v40, 2  ;;  %v625_v44 = vadd.f32 %v624_v11, %v623_v55  ;;  %v663_v21 = vrot.slane %v662_v53, 2  ;;  %v675_v49 = vadd.f32 %v674_v2, %v673_v61 }
  0xcc   :  { %v638_v6 = vadd.f32 %v637_v36, %v636_v54  ;;  %v600_v1 = vrot.slane %v599_v26, 1  ;;  %v613_v22 = vrot.slane %v612_v14, 1  ;;  %v686_v41 = vadd.f32 %v685_v34, %v684_v20 }
  0xcd   :  { %v651_v32 = vadd.f32 %v650_v18, %v649_v40  ;;  %v626_v28 = vrot.slane %v625_v44, 1  ;;  %v664_v16 = vadd.f32 %v663_v21, %v662_v53  ;;  %v676_v30 = vrot.slane %v675_v49, 2 }
  0xce   :  { %v639_v48 = vrot.slane %v638_v6, 1  ;;  %v601_v0 = vadd.f32 %v600_v1, %v599_v26  ;;  %v614_v31 = vadd.f32 %v613_v22, %v612_v14  ;;  %v687_v63 = vrot.slane %v686_v41, 4 }
  0xcf   :  { %v652_v46 = vrot.slane %v651_v32, 1  ;;  %v627_v10 = vadd.f32 %v626_v28, %v625_v44  ;;  %v665_v57 = vrot.slane %v664_v16, 1  ;;  %v677_v24 = vadd.f32 %v676_v30, %v675_v49  ;;  %v1668_v28 = vld [vmem:[%s7709_s3 + $0x58] sm:$0xff] }
  0xd0   :  { %v640_v50 = vadd.f32 %v639_v48, %v638_v6  ;;  %v688_v43 = vadd.f32 %v687_v63, %v686_v41  ;;  %v5717_v29 = vmul.f32 0.020408163, %v8050_v7  ;;  %v5720_v37 = vmul.f32 0.020408163, %v8051_v27  ;;  %v3778_v7 = vld [vmem:[%s7710_s0] sm:$0xff]  ;;  %v8058_v27 = vld [vmem:[#allocation16_spill] sm:$0xff] }
  0xd1   :  { %v653_v13 = vadd.f32 %v652_v46, %v651_v32  ;;  %v666_v3 = vadd.f32 %v665_v57, %v664_v16  ;;  %v678_v35 = vrot.slane %v677_v24, 1  ;;  %v5723_v25 = vmul.f32 0.020408163, %v8052_v39  ;;  %v8059_v39 = vld [vmem:[#allocation3_spill] sm:$0xff] }
  0xd2   :  { %v5726_v60 = vmul.f32 0.020408163, %v8053_v19  ;;  %v689_v15 = vrot.slane %v688_v43, 2  ;;  %v5729_v9 = vmul.f32 0.020408163, %v8054_v23  ;;  %v754_v12 = vmul.f32 %v5717_v29, %v5717_v29  ;;  %v8060_v19 = vld [vmem:[#allocation69_spill] sm:$0xff] }
  0xd3   :  { %v5732_v45 = vmul.f32 0.020408163, %v8055_v42  ;;  %v679_v58 = vadd.f32 %v678_v35, %v677_v24  ;;  %v5737_v33 = vmul.f32 0.020408163, %v8056_v38  ;;  %v5740_v8 = vmul.f32 0.020408163, %v8057_v5 }
  0xd4   :  { %v737_v4 = vmul.f32 0.020408163, %v601_v0  ;;  %v690_v52 = vadd.f32 %v689_v15, %v688_v43  ;;  %v738_v17 = vmul.f32 0.020408163, %v614_v31  ;;  %v739_v55 = vmul.f32 0.020408163, %v627_v10 }
  0xd5   :  { %v740_v54 = vmul.f32 0.020408163, %v640_v50  ;;  %v741_v62 = vmul.f32 0.020408163, %v653_v13  ;;  %v742_v61 = vmul.f32 0.020408163, %v666_v3  ;;  %v755_v51 = vmul.f32 %v5720_v37, %v5720_v37 }
  0xd6   :  { %v743_v59 = vmul.f32 0.020408163, %v679_v58  ;;  %v691_v40 = vrot.slane %v690_v52, 1  ;;  %v756_v47 = vmul.f32 %v5723_v25, %v5723_v25  ;;  %v757_v20 = vmul.f32 %v5726_v60, %v5726_v60  ;;  %v1685_v31 = vld [vmem:[%s7709_s3 + $0xe0] sm:$0xff]  ;;  %v1659_v23 = vld [vmem:[%s7709_s3 + $0x10] sm:$0xff]  ;;  %v1676_v42 = vld [vmem:[%s7709_s3 + $0x98] sm:$0xff] }
  0xd7   :  { %v758_v11 = vmul.f32 %v5729_v9, %v5729_v9  ;;  %v759_v36 = vmul.f32 %v5732_v45, %v5732_v45  ;;  %v760_v53 = vmul.f32 %v5737_v33, %v5737_v33  ;;  %v761_v2 = vmul.f32 %v5740_v8, %v5740_v8  ;;  %v1694_v58 = vld [vmem:[%s7709_s3 + $0x128] sm:$0xff]  ;;  %v1711_v38 = vld [vmem:[%s7709_s3 + $0x1b0] sm:$0xff] }
  0xd8   :  { %v771_v26 = vsub.f32 %v737_v4, %v754_v12  ;;  %v692_v14 = vadd.f32 %v691_v40, %v690_v52  ;;  %v772_v18 = vsub.f32 %v738_v17, %v755_v51  ;;  %v773_v56 = vsub.f32 %v739_v55, %v756_v47  ;;  %v1745_v51 = vld [vmem:[%s7709_s3 + $0x2c0] sm:$0xff] }
  0xd9   :  { %v774_v34 = vsub.f32 %v740_v54, %v757_v20  ;;  %v775_v44 = vsub.f32 %v741_v62, %v758_v11  ;;  %v776_v6 = vsub.f32 %v742_v61, %v759_v36  ;;  %v777_v21 = vsub.f32 %v743_v59, %v760_v53  ;;  %v1693_v54 = vld [vmem:[%s7709_s3 + $0x120] sm:$0xff]  ;;  %v1710_v62 = vld [vmem:[%s7709_s3 + $0x1a8] sm:$0xff]  ;;  %v1728_v59 = vld [vmem:[%s7709_s3 + $0x238] sm:$0xff] }
  0xda   :  { %v788_v49 = vmax.f32 %v771_v26, 0.0  ;;  %v744_v1 = vmul.f32 0.020408163, %v692_v14  ;;  %v789_v22 = vmax.f32 %v772_v18, 0.0  ;;  %v790_v32 = vmax.f32 %v773_v56, 0.0  ;;  %v3779_v36 = vld [vmem:[%s7710_s0 + $0x90] sm:$0xff] }
  0xdb   :  { %v791_v41 = vmax.f32 %v774_v34, 0.0  ;;  %v792_v48 = vmax.f32 %v775_v44, 0.0  ;;  %v793_v16 = vmax.f32 %v776_v6, 0.0  ;;  %v794_v30 = vmax.f32 %v777_v21, 0.0  ;;  %v8061_v53 = vld [vmem:[#allocation15_spill] sm:$0xff]  ;;  %v8062_v18 = vld [vmem:[#allocation2_spill] sm:$0xff] }
  0xdc   :  { %v805_v0 = vadd.f32 1e-05, %v788_v49  ;;  %v778_v46 = vsub.f32 %v744_v1, %v761_v2  ;;  %v806_v63 = vadd.f32 1e-05, %v789_v22  ;;  %v807_v10 = vadd.f32 1e-05, %v790_v32 }
  0xdd   :  { %v808_v50 = vadd.f32 1e-05, %v791_v41  ;;  %v809_v57 = vadd.f32 1e-05, %v792_v48  ;;  %v810_v24 = vadd.f32 1e-05, %v793_v16  ;;  %v3412_v43 = vpack.c.bf16 %v1685_v31, %v1668_v28 }
  0xde   :  { %3759 = vrsqrt.f32 %v805_v0  ;;  %v795_v13 = vmax.f32 %v778_v46, 0.0  ;;  %v1212_v3 = vmul.f32 %v3778_v7, %v8058_v27  ;;  %v811_v35 = vadd.f32 1e-05, %v794_v30  ;;  %v3780_v44 = vld [vmem:[%s7710_s0 + $0x88] sm:$0xff]  ;;  %v8063_v49 = vld [vmem:[#allocation70_spill] sm:$0xff]  ;;  %v3781_v22 = vld [vmem:[%s7710_s0 + $0x118] sm:$0xff] }
  0xdf   :  { %3761 = vrsqrt.f32 %v806_v63  ;;  %v5768_v15 = vrot.slane %v8060_v19, %v8059_v39  ;;  %3413 = vmatprep.subr.bf16.mxu0 %v3412_v43  ;;  %v3222_v4 = vpack.c.bf16 %v1676_v42, %v1659_v23  ;;  %v3224_v17 = vpack.c.bf16 %v1711_v38, %v1694_v58  ;;  %v3782_v41 = vld [vmem:[%s7710_s0 + $0x110] sm:$0xff]  ;;  %v3783_v31 = vld [vmem:[%s7710_s0 + $0x1a0] sm:$0xff] }
  0xe0   :  { %3763 = vrsqrt.f32 %v807_v10  ;;  %v812_v12 = vadd.f32 1e-05, %v795_v13  ;;  %v3226_v11 = vpack.c.bf16 %v1710_v62, %v1693_v54  ;;  %v1230_v2 = vmul.f32 %v3779_v36, %v8061_v53  ;;  %v1727_v10 = vld [vmem:[%s7709_s3 + $0x230] sm:$0xff]  ;;  %v3785_v62 = vld [vmem:[%s7710_s0 + $0x228] sm:$0xff] }
  0xe1   :  { %3765 = vrsqrt.f32 %v808_v50  ;;  %v1419_v5 = vadd.f32 %v5768_v15, %v1212_v3  ;;  %v3228_v34 = vpack.c.bf16 %v1745_v51, %v1728_v59  ;;  %v1229_v6 = vmul.f32 %v3780_v44, %v8058_v27  ;;  %v1744_v50 = vld [vmem:[%s7709_s3 + $0x2b8] sm:$0xff]  ;;  %v1779_v23 = vld [vmem:[%s7709_s3 + $0x3d0] sm:$0xff]  ;;  %v3786_v59 = vld [vmem:[%s7710_s0 + $0x220] sm:$0xff] }
  0xe2   :  { %3767 = vrsqrt.f32 %v809_v57  ;;  %v1437_v1 = vadd.f32 %v8063_v49, %v1230_v2  ;;  %v1247_v32 = vmul.f32 %v3781_v22, %v8061_v53  ;;  %v1246_v28 = vmul.f32 %v3782_v41, %v8058_v27  ;;  %v1761_v2 = vld [vmem:[%s7709_s3 + $0x340] sm:$0xff]  ;;  %v1778_v44 = vld [vmem:[%s7709_s3 + $0x3c8] sm:$0xff] }
  0xe3   :  { %3769 = vrsqrt.f32 %v810_v24  ;;  %v1538_v52 = vmax.f32 %v1419_v5, 0.0  ;;  %v1436_v0 = vadd.f32 %v5768_v15, %v1229_v6  ;;  %v1264_v46 = vmul.f32 %v3783_v31, %v8061_v53  ;;  %v1796_v6 = vld [vmem:[%s7709_s3 + $0x458] sm:$0xff]  ;;  %v832_v41 = vld [vmem:[%s7711_s1 + $0x8] sm:$0xff] }
  0xe4   :  { %3771 = vrsqrt.f32 %v811_v35  ;;  %v1556_v57 = vmax.f32 %v1437_v1, 0.0  ;;  %v1454_v24 = vadd.f32 %v8063_v49, %v1247_v32  ;;  %v1453_v13 = vadd.f32 %v5768_v15, %v1246_v28  ;;  %v1762_v35 = vld [vmem:[%s7709_s3 + $0x348] sm:$0xff] }
  0xe5   :  { %3773 = vrsqrt.f32 %v812_v12  ;;  %2223 = vmatmul.mubr.f32.vlgmr.msra.gmra.mrb[0].mxu1 %v1538_v52  ;;  %v1555_v42 = vmax.f32 %v1436_v0, 0.0  ;;  %v1471_v58 = vadd.f32 %v8063_v49, %v1264_v46  ;;  %v3230_v5 = vpack.c.bf16 %v1744_v50, %v1727_v10  ;;  %v3784_v52 = vld [vmem:[%s7710_s0 + $0x198] sm:$0xff] }
  0xe6   :  { %3223 = vmatpush1.bf16.xpose.msra.mxu1 %v3222_v4  ;;  %2228 = vmatprep.mubr.f32.mxu1 %v1556_v57  ;;  %v1573_v12 = vmax.f32 %v1454_v24, 0.0  ;;  %v1572_v4 = vmax.f32 %v1453_v13, 0.0  ;;  %v1280_v51 = vmul.f32 %v3786_v59, %v8058_v27  ;;  %v3789_v10 = vld [vmem:[%s7710_s0 + $0x338] sm:$0x1]  ;;  %v3790_v24 = vld [vmem:[%s7710_s0 + $0x330] sm:$0x1] }
  0xe7   :  { %3225 = vmatprep.subr.bf16.mxu1 %v3224_v17  ;;  %v1263_v17 = vmul.f32 %v3784_v52, %v8058_v27  ;;  %v1590_v54 = vmax.f32 %v1471_v58, 0.0  ;;  %v1315_v50 = vmul.f32 %v3789_v10, %v8061_v53  ;;  %v1314_v13 = vmul.f32 %v3790_v24, %v8058_v27  ;;  %v8067_v58 = vld [vmem:[#allocation5_spill] sm:$0xff]  ;;  %v8069_v52 = vld [vmem:[#allocation27_spill] sm:$0xff]  ;;  %v1881_v10 = vld [vmem:[%s7709_s3 + $0x700] sm:$0xff] }
  0xe8   :  { %v3760_v55 = vpop.eup %3759  ;;  %v1487_v22 = vadd.f32 %v5768_v15, %v1280_v51  ;;  %v3792_v24 = vld [vmem:[%s7710_s0 + $0x48] sm:$0xff] }
  0xe9   :  { %v3762_v61 = vpop.eup %3761  ;;  %2229 = vmatmul.mubr.f32.gmra.mrb[2].mxu1 %v1555_v42  ;;  %v8066_v42 = vld [vmem:[#allocation4_spill] sm:$0xff] }
  0xea   :  { %v3764_v40 = vpop.eup %3763  ;;  %v900_v47 = vcombine.low %v3760_v55, %v3762_v61  ;;  %v3232_v55 = vpack.c.bf16 %v1779_v23, %v1762_v35  ;;  %2234 = vmatprep.mubr.f32.mxu1 %v1573_v12  ;;  %v1281_v61 = vmul.f32 %v3785_v62, %v8061_v53  ;;  %v1606_v46 = vmax.f32 %v1487_v22, 0.0  ;;  %v8065_v35 = vld [vmem:[#allocation11_spill] sm:$0xff]  ;;  %v8071_v62 = vld [vmem:[#allocation52_spill] sm:$0xff] }
  0xeb   :  { %v3766_v20 = vpop.eup %3765  ;;  %v5892_v23 = vrot.slane %v8060_v19, %v8065_v35 }
  0xec   :  { %v3768_v26 = vpop.eup %3767  ;;  %v901_v14 = vcombine.low %v3764_v40, %v3766_v20  ;;  %v910_v56 = vrot.slane %v900_v47, %v8062_v18  ;;  %v1470_v20 = vadd.f32 %v5768_v15, %v1263_v17 }
  0xed   :  { %v3770_v21 = vpop.eup %3769  ;;  %2235 = vmatmul.mubr.f32.gmra.mrb[4].mxu1 %v1572_v4 }
  0xee   :  { %v3772_v48 = vpop.eup %3771  ;;  %v902_v16 = vcombine.low %v3768_v26, %v3770_v21  ;;  %v917_v30 = vrot.slane %v901_v14, %v8062_v18  ;;  %3227 = vmatpush1.bf16.xpose.msra.mxu1 %v3226_v11  ;;  %v3787_v11 = vld [vmem:[%s7710_s0 + $0x2b0] sm:$0xff]  ;;  %v1488_v26 = vadd.f32 %v8063_v49, %v1281_v61  ;;  %v3788_v14 = vld [vmem:[%s7710_s0 + $0x2a8] sm:$0xff]  ;;  %v1813_v21 = vld [vmem:[%s7709_s3 + $0x4e0] sm:$0xff]  ;;  %v1589_v1 = vmax.f32 %v1470_v20, 0.0  ;;  %2240 = vmatprep.mubr.f32.mxu1 %v1590_v54 }
  0xef   :  { %v3774_v63 = vpop.eup %3773  ;;  %3229 = vmatprep.subr.bf16.mxu1 %v3228_v34  ;;  %v1298_v36 = vmul.f32 %v3787_v11, %v8061_v53  ;;  %v3236_v0 = vpack.c.bf16 %v1813_v21, %v1796_v6 }
  0xf0   :  { %v903_v43 = vcombine.low %v3772_v48, %v3774_v63  ;;  %v924_v7 = vrot.slane %v902_v16, %v8062_v18  ;;  %v932_v3 = vcombine.low %v910_v56, %v917_v30  ;;  %v1297_v56 = vmul.f32 %v3788_v14, %v8058_v27 }
  0xf1   :  { %v1505_v32 = vadd.f32 %v8063_v49, %v1298_v36  ;;  %v1607_v28 = vmax.f32 %v1488_v26, 0.0  ;;  %v3234_v30 = vpack.c.bf16 %v1778_v44, %v1761_v2  ;;  %2241 = vmatmul.mubr.f32.gmra.mrb[6].mxu1 %v1589_v1  ;;  %v1522_v26 = vadd.f32 %v8063_v49, %v1315_v50 }
  0xf2   :  { %v931_v38 = vrot.slane %v903_v43, %v8062_v18  ;;  %v940_v47 = vrot.slane %v932_v3, %v8062_v18  ;;  %v1504_v48 = vadd.f32 %v5768_v15, %v1297_v56  ;;  %v3791_v43 = vld [vmem:[%s7710_s0 + $0x18] sm:$0xff] }
  0xf3   :  { %v1624_v63 = vmax.f32 %v1505_v32, 0.0  ;;  %2246 = vmatprep.mubr.f32.mxu1 %v1607_v28  ;;  %v1641_v28 = vmax.f32 %v1522_v26, 0.0  ;;  %v1863_v26 = vld [vmem:[%s7709_s3 + $0x670] sm:$0xff] }
  0xf4   :  { %v933_v40 = vcombine.low %v924_v7, %v931_v38  ;;  %v1623_v57 = vmax.f32 %v1504_v48, 0.0  ;;  %v8064_v7 = vld [vmem:[#allocation17_spill] sm:$0xff] }
  0xf5   :  { %v1215_v3 = vmul.f32 %v3791_v43, %v8064_v7  ;;  %2247 = vmatmul.mubr.f32.gmra.mrb[8].mxu1 %v1606_v46  ;;  %v3793_v43 = vld [vmem:[%s7710_s0 + $0x40] sm:$0xff] }
  0xf6   :  { %v947_v34 = vrot.slane %v933_v40, %v8062_v18  ;;  %3231 = vmatpush1.bf16.xpose.msra.mxu1 %v3230_v5  ;;  %v8068_v5 = vld [vmem:[#allocation12_spill] sm:$0xff]  ;;  %2252 = vmatprep.mubr.f32.mxu1 %v1624_v63  ;;  %v1864_v63 = vld [vmem:[%s7709_s3 + $0x678] sm:$0xff] }
  0xf7   :  { %3233 = vmatprep.subr.bf16.mxu1 %v3232_v55  ;;  %v8070_v55 = vld [vmem:[#allocation44_spill] sm:$0xff]  ;;  %v1422_v44 = vadd.f32 %v5892_v23, %v1215_v3 }
  0xf8   :  { %v948_v16 = vcombine.low %v940_v47, %v947_v34  ;;  %v1521_v34 = vadd.f32 %v5768_v15, %v1314_v13  ;;  %v1829_v15 = vld [vmem:[%s7709_s3 + $0x560] sm:$0xff] }
  0xf9   :  { %2253 = vmatmul.mubr.f32.gmra.mrb[10].mxu1 %v1623_v57 }
  0xfa   :  { %v967_v31 = vmul.f32 %v948_v16, %v832_v41  ;;  %v1640_v48 = vmax.f32 %v1521_v34, 0.0  ;;  %v1541_v16 = vmax.f32 %v1422_v44, 0.0  ;;  %2258 = vmatprep.mubr.f32.mxu1 %v1641_v28  ;;  %v3797_v34 = vld [vmem:[%s7710_s0 + $0x150] sm:$0xff] }
  0xfc   :  { %v5895_v53 = vrot.slane %v967_v31, %v8059_v39  ;;  %v5898_v12 = vrot.slane %v967_v31, %v8066_v42  ;;  %v5901_v38 = vrot.slane %v967_v31, %v8067_v58  ;;  %v5904_v27 = vrot.slane %v967_v31, %v8065_v35 }
  0xfd   :  { %v5907_v4 = vrot.slane %v967_v31, %v8068_v5  ;;  %v5910_v17 = vrot.slane %v967_v31, %v8069_v52  ;;  %v5913_v54 = vrot.slane %v967_v31, %v8070_v55  ;;  %v5916_v61 = vrot.slane %v967_v31, %v8071_v62  ;;  %v970_v31 = vld [vmem:[%s7712_s2 + $0x8] sm:$0xff]  ;;  %2259 = vmatmul.mubr.f32.gmra.mrb[12].mxu1 %v1640_v48 }
  0xfe   :  { %v1068_v59 = vmul.f32 %v5895_v53, %v5717_v29  ;;  %v1069_v51 = vmul.f32 %v5898_v12, %v5720_v37  ;;  %v1070_v40 = vmul.f32 %v5901_v38, %v5723_v25  ;;  %v1071_v47 = vmul.f32 %v5904_v27, %v5726_v60  ;;  %3235 = vmatpush1.bf16.xpose.msra.mxu1 %v3234_v30  ;;  %v1795_v25 = vld [vmem:[%s7709_s3 + $0x450] sm:$0xff]  ;;  %v1812_v60 = vld [vmem:[%s7709_s3 + $0x4d8] sm:$0xff] }
  0xff   :  { %v1072_v20 = vmul.f32 %v5907_v4, %v5729_v9  ;;  %v1073_v11 = vmul.f32 %v5910_v17, %v5732_v45  ;;  %v1074_v36 = vmul.f32 %v5913_v54, %v5737_v33  ;;  %v1075_v29 = vmul.f32 %v5916_v61, %v5740_v8  ;;  %3237 = vmatprep.subr.bf16.mxu1 %v3236_v0  ;;  %v1830_v33 = vld [vmem:[%s7709_s3 + $0x568] sm:$0xff]  ;;  %v1847_v8 = vld [vmem:[%s7709_s3 + $0x5f0] sm:$0xff] }
 0x100   :  { %v1143_v37 = vcombine.low %v1068_v59, %v1069_v51  ;;  %v1144_v2 = vcombine.low %v1070_v40, %v1071_v47  ;;  %v3238_v1 = vpack.c.bf16 %v1812_v60, %v1795_v25  ;;  %v3240_v32 = vpack.c.bf16 %v1847_v8, %v1830_v33  ;;  %v1846_v0 = vld [vmem:[%s7709_s3 + $0x5e8] sm:$0xff]  ;;  %2329 = vmatprep.mubr.f32.mxu1 %v1541_v16  ;;  %v3794_v59 = vld [vmem:[%s7710_s0 + $0xd0] sm:$0xff] }
 0x101   :  { %v1145_v9 = vcombine.low %v1072_v20, %v1073_v11  ;;  %v1146_v45 = vcombine.low %v1074_v36, %v1075_v29  ;;  %v3242_v50 = vpack.c.bf16 %v1846_v0, %v1829_v15  ;;  %v1221_v13 = vmul.f32 %v3792_v24, %v5898_v12  ;;  %v3795_v47 = vld [vmem:[%s7710_s0 + $0xc8] sm:$0xff]  ;;  %v1667_v29 = vld [vmem:[%s7709_s3 + $0x50] sm:$0xff] }
 0x102   :  { %v1153_v14 = vrot.slane %v1143_v37, %v8062_v18  ;;  %v1160_v56 = vrot.slane %v1144_v2, %v8062_v18  ;;  %v1220_v3 = vmul.f32 %v3793_v43, %v5895_v53  ;;  %v1238_v51 = vmul.f32 %v3794_v59, %v5898_v12  ;;  %v1684_v37 = vld [vmem:[%s7709_s3 + $0xd8] sm:$0xff]  ;;  %v1718_v43 = vld [vmem:[%s7709_s3 + $0x1e8] sm:$0xff]  ;;  %v1753_v59 = vld [vmem:[%s7709_s3 + $0x300] sm:$0xff] }
 0x103   :  { %v1167_v6 = vrot.slane %v1145_v9, %v8062_v18  ;;  %v1174_v21 = vrot.slane %v1146_v45, %v8062_v18  ;;  %v3244_v40 = vpack.c.bf16 %v1881_v10, %v1864_v63  ;;  %v1237_v20 = vmul.f32 %v3795_v47, %v5895_v53  ;;  %v3796_v2 = vld [vmem:[%s7710_s0 + $0x158] sm:$0xff]  ;;  %v1702_v9 = vld [vmem:[%s7709_s3 + $0x168] sm:$0xff]  ;;  %v1719_v45 = vld [vmem:[%s7709_s3 + $0x1f0] sm:$0xff] }
 0x104   :  { %v1175_v22 = vcombine.low %v1153_v14, %v1160_v56  ;;  %v1255_v25 = vmul.f32 %v3796_v2, %v5898_v12  ;;  %v3414_v8 = vpack.c.bf16 %v1684_v37, %v1667_v29  ;;  %v1880_v14 = vld [vmem:[%s7709_s3 + $0x6f8] sm:$0xff]  ;;  %v1254_v44 = vmul.f32 %v3797_v34, %v5895_v53  ;;  %v3801_v29 = vld [vmem:[%s7710_s0 + $0x260] sm:$0xff] }
 0x105   :  { %v1176_v41 = vcombine.low %v1167_v6, %v1174_v21  ;;  %v3798_v6 = vld [vmem:[%s7710_s0 + $0x1e0] sm:$0xff]  ;;  %v3416_v48 = vpack.c.bf16 %v1719_v45, %v1702_v9  ;;  %v3246_v16 = vpack.c.bf16 %v1880_v14, %v1863_v26  ;;  %v1288_v37 = vmul.f32 %v3801_v29, %v5895_v53  ;;  %v3802_v45 = vld [vmem:[%s7710_s0 + $0x2f0] sm:$0xff] }
 0x106   :  { %v1183_v49 = vrot.slane %v1175_v22, %v8062_v18  ;;  %3239 = vmatpush1.bf16.xpose.msra.mxu1 %v3238_v1  ;;  %v1272_v21 = vmul.f32 %v3798_v6, %v5898_v12  ;;  %v1769_v29 = vld [vmem:[%s7709_s3 + $0x380] sm:$0xff] }
 0x107   :  { %v1190_v30 = vrot.slane %v1176_v41, %v8062_v18  ;;  %3241 = vmatprep.subr.bf16.mxu1 %v3240_v32  ;;  %v1898_v32 = vld [vmem:[%s7709_s3 + $0x788] sm:$0xff]  ;;  %v1915_v41 = vld [vmem:[%s7709_s3 + $0x810] sm:$0xff] }
 0x109   :  { %v1191_v46 = vcombine.low %v1183_v49, %v1190_v30  ;;  %v3248_v30 = vpack.c.bf16 %v1915_v41, %v1898_v32  ;;  %v3804_v41 = vld [vmem:[%s7710_s0 + $0x378] sm:$0x1] }
 0x10b   :  { %v5970_v57 = vsub.f32 %v970_v31, %v1191_v46  ;;  %v3799_v31 = vld [vmem:[%s7710_s0 + $0x1d8] sm:$0xff] }
 0x10c   :  { %v1271_v46 = vmul.f32 %v3799_v31, %v5895_v53  ;;  %v3805_v31 = vld [vmem:[%s7710_s0 + $0x370] sm:$0x1] }
 0x10d   :  { %v5990_v11 = vrot.slane %v5970_v57, %v8066_v42  ;;  %v5994_v36 = vrot.slane %v5970_v57, %v8059_v39 }
 0x10e   :  { %3243 = vmatpush1.bf16.xpose.msra.mxu1 %v3242_v50  ;;  %v3800_v50 = vld [vmem:[%s7710_s0 + $0x268] sm:$0xff] }
 0x10f   :  { %v1428_v42 = vadd.f32 %v5990_v11, %v1221_v13  ;;  %v1427_v60 = vadd.f32 %v5994_v36, %v1220_v3  ;;  %v1445_v33 = vadd.f32 %v5990_v11, %v1238_v51  ;;  %3245 = vmatprep.subr.bf16.mxu1 %v3244_v40  ;;  %v1444_v56 = vadd.f32 %v5994_v36, %v1237_v20  ;;  %v1701_v13 = vld [vmem:[%s7709_s3 + $0x160] sm:$0xff]  ;;  %v1736_v3 = vld [vmem:[%s7709_s3 + $0x278] sm:$0xff]  ;;  %v1914_v40 = vld [vmem:[%s7709_s3 + $0x808] sm:$0xff] }
 0x110   :  { %v1462_v49 = vadd.f32 %v5990_v11, %v1255_v25  ;;  %v1461_v0 = vadd.f32 %v5994_v36, %v1254_v44  ;;  %v1479_v10 = vadd.f32 %v5990_v11, %v1272_v21  ;;  %v1289_v24 = vmul.f32 %v3800_v50, %v5898_v12  ;;  %v1897_v51 = vld [vmem:[%s7709_s3 + $0x780] sm:$0xff]  ;;  %v1932_v25 = vld [vmem:[%s7709_s3 + $0x898] sm:$0xff]  ;;  %v3803_v44 = vld [vmem:[%s7710_s0 + $0x2e8] sm:$0xff] }
 0x111   :  { %v1547_v1 = vmax.f32 %v1428_v42, 0.0  ;;  %v1546_v22 = vmax.f32 %v1427_v60, 0.0  ;;  %v1564_v28 = vmax.f32 %v1445_v33, 0.0  ;;  %v1563_v15 = vmax.f32 %v1444_v56, 0.0  ;;  %v1949_v42 = vld [vmem:[%s7709_s3 + $0x920] sm:$0xff]  ;;  %v1735_v21 = vld [vmem:[%s7709_s3 + $0x270] sm:$0xff] }
 0x112   :  { %v1581_v63 = vmax.f32 %v1462_v49, 0.0  ;;  %v1580_v47 = vmax.f32 %v1461_v0, 0.0  ;;  %v1478_v20 = vadd.f32 %v5994_v36, %v1271_v46  ;;  %v3418_v2 = vpack.c.bf16 %v1718_v43, %v1701_v13  ;;  %v1770_v49 = vld [vmem:[%s7709_s3 + $0x388] sm:$0xff]  ;;  %v3806_v13 = vld [vmem:[%s7710_s0 + $0x58] sm:$0xff] }
 0x113   :  { %2650 = vmatprep.mubr.f32.mxu0 %v1547_v1  ;;  %v1598_v60 = vmax.f32 %v1479_v10, 0.0  ;;  %v1496_v9 = vadd.f32 %v5990_v11, %v1289_v24  ;;  %v1306_v33 = vmul.f32 %v3802_v45, %v5898_v12  ;;  %v3250_v26 = vpack.c.bf16 %v1914_v40, %v1897_v51  ;;  %v1752_v1 = vld [vmem:[%s7709_s3 + $0x2f8] sm:$0xff]  ;;  %v1983_v10 = vld [vmem:[%s7709_s3 + $0xa30] sm:$0xff]  ;;  %v2017_v45 = vld [vmem:[%s7709_s3 + $0xb40] sm:$0xff] }
 0x114   :  { %2651 = vmatmul.mubr.f32.vlgmr.msra.gmra.mrb[0].mxu0 %v1546_v22  ;;  %v3252_v14 = vpack.c.bf16 %v1949_v42, %v1932_v25  ;;  %v1597_v56 = vmax.f32 %v1478_v20, 0.0  ;;  %v1495_v34 = vadd.f32 %v5994_v36, %v1288_v37  ;;  %v1305_v6 = vmul.f32 %v3803_v44, %v5895_v53  ;;  %v1804_v37 = vld [vmem:[%s7709_s3 + $0x498] sm:$0xff]  ;;  %v1982_v25 = vld [vmem:[%s7709_s3 + $0xa28] sm:$0xff] }
 0x115   :  { %3415 = vmatpush1.bf16.xpose.msra.mxu0 %v3414_v8  ;;  %2656 = vmatprep.mubr.f32.mxu0 %v1564_v28  ;;  %v3420_v8 = vpack.c.bf16 %v1753_v59, %v1736_v3  ;;  %v1615_v22 = vmax.f32 %v1496_v9, 0.0  ;;  %v1513_v32 = vadd.f32 %v5990_v11, %v1306_v33  ;;  %v1323_v28 = vmul.f32 %v3804_v41, %v5898_v12  ;;  %v1948_v12 = vld [vmem:[%s7709_s3 + $0x918] sm:$0xff]  ;;  %v1838_v44 = vld [vmem:[%s7709_s3 + $0x5a8] sm:$0xff]  ;;  %v2051_v41 = vld [vmem:[%s7709_s3 + $0xc50] sm:$0xff] }
 0x116   :  { %3417 = vmatprep.subr.bf16.mxu0 %v3416_v48  ;;  %3247 = vmatpush1.bf16.xpose.msra.mxu1 %v3246_v16  ;;  %v1787_v48 = vld [vmem:[%s7709_s3 + $0x410] sm:$0xff]  ;;  %v3422_v16 = vpack.c.bf16 %v1752_v1, %v1735_v21  ;;  %v1512_v0 = vadd.f32 %v5994_v36, %v1305_v6  ;;  %v1322_v46 = vmul.f32 %v3805_v31, %v5895_v53  ;;  %v2000_v9 = vld [vmem:[%s7709_s3 + $0xab8] sm:$0xff]  ;;  %v2050_v31 = vld [vmem:[%s7709_s3 + $0xc48] sm:$0xff] }
 0x117   :  { %3249 = vmatprep.subr.bf16.mxu1 %v3248_v30  ;;  %v1931_v30 = vld [vmem:[%s7709_s3 + $0x890] sm:$0xff]  ;;  %v1632_v50 = vmax.f32 %v1513_v32, 0.0  ;;  %v1530_v24 = vadd.f32 %v5990_v11, %v1323_v28  ;;  %v1223_v43 = vmul.f32 %v3806_v13, %v5904_v27  ;;  %v6127_v53 = vrot.slane %v5970_v57, %v8065_v35  ;;  %v1786_v35 = vld [vmem:[%s7709_s3 + $0x408] sm:$0xff]  ;;  %v2016_v1 = vld [vmem:[%s7709_s3 + $0xb38] sm:$0xff] }
 0x118   :  { %2657 = vmatmul.mubr.f32.gmra.mrb[2].mxu0 %v1563_v15  ;;  %v1614_v15 = vmax.f32 %v1495_v34, 0.0  ;;  %v3424_v3 = vpack.c.bf16 %v1787_v48, %v1770_v49  ;;  %v3254_v59 = vpack.c.bf16 %v1948_v12, %v1931_v30  ;;  %v1631_v40 = vmax.f32 %v1512_v0, 0.0  ;;  %v1820_v34 = vld [vmem:[%s7709_s3 + $0x518] sm:$0xff]  ;;  %v1855_v6 = vld [vmem:[%s7709_s3 + $0x630] sm:$0xff]  ;;  %v2034_v32 = vld [vmem:[%s7709_s3 + $0xbc8] sm:$0xff] }
 0x119   :  { %2662 = vmatprep.mubr.f32.mxu0 %v1581_v63  ;;  %v1966_v63 = vld [vmem:[%s7709_s3 + $0x9a8] sm:$0xff]  ;;  %v1649_v11 = vmax.f32 %v1530_v24, 0.0  ;;  %v1430_v20 = vadd.f32 %v6127_v53, %v1223_v43  ;;  %v1999_v21 = vld [vmem:[%s7709_s3 + $0xab0] sm:$0xff]  ;;  %v3432_v28 = vpack.c.bf16 %v1855_v6, %v1838_v44  ;;  %v3264_v48 = vpack.c.bf16 %v2051_v41, %v2034_v32  ;;  %v1872_v12 = vld [vmem:[%s7709_s3 + $0x6b8] sm:$0xff] }
 0x11a   :  { %v3256_v51 = vpack.c.bf16 %v1983_v10, %v1966_v63  ;;  %v3262_v49 = vpack.c.bf16 %v2016_v1, %v1999_v21  ;;  %v1854_v30 = vld [vmem:[%s7709_s3 + $0x628] sm:$0xff]  ;;  %v2033_v0 = vld [vmem:[%s7709_s3 + $0xbc0] sm:$0xff]  ;;  %v1679_v10 = vld [vmem:[%s7709_s3 + $0xb0] sm:$0xff] }
 0x11b   :  { %v1549_v33 = vmax.f32 %v1430_v20, 0.0  ;;  %v1662_v63 = vld [vmem:[%s7709_s3 + $0x28] sm:$0xff]  ;;  %v3807_v24 = vld [vmem:[%s7710_s0 + $0x10] sm:$0xff]  ;;  %v8072_v13 = vld [vmem:[#allocation18_spill] sm:$0xff] }
 0x11c   :  { %2663 = vmatmul.mubr.f32.gmra.mrb[4].mxu0 %v1580_v47  ;;  %v1529_v47 = vadd.f32 %v5994_v36, %v1322_v46  ;;  %v1821_v36 = vld [vmem:[%s7709_s3 + $0x520] sm:$0xff]  ;;  %v1214_v43 = vmul.f32 %v3807_v24, %v8072_v13  ;;  %v1888_v20 = vld [vmem:[%s7709_s3 + $0x738] sm:$0xff]  ;;  %v3812_v32 = vld [vmem:[%s7710_s0 + $0x1b0] sm:$0xff] }
 0x11d   :  { %3419 = vmatpush1.bf16.xpose.msra.mxu0 %v3418_v2  ;;  %2668 = vmatprep.mubr.f32.mxu0 %v1598_v60  ;;  %v1965_v2 = vld [vmem:[%s7709_s3 + $0x9a0] sm:$0xff]  ;;  %v3426_v60 = vpack.c.bf16 %v1786_v35, %v1769_v29  ;;  %v3809_v35 = vld [vmem:[%s7710_s0 + $0x98] sm:$0xff]  ;;  %v1266_v41 = vmul.f32 %v3812_v32, %v8064_v7  ;;  %v1695_v24 = vld [vmem:[%s7709_s3 + $0x130] sm:$0xff] }
 0x11e   :  { %3421 = vmatprep.subr.bf16.mxu0 %v3420_v8  ;;  %3251 = vmatpush1.bf16.xpose.msra.mxu1 %v3250_v26  ;;  %v1648_v42 = vmax.f32 %v1529_v47, 0.0  ;;  %v3428_v8 = vpack.c.bf16 %v1821_v36, %v1804_v37  ;;  %v3258_v26 = vpack.c.bf16 %v1982_v25, %v1965_v2  ;;  %v3268_v47 = vpack.c.bf16 %v1679_v10, %v1662_v63  ;;  %v1906_v36 = vld [vmem:[%s7709_s3 + $0x7c8] sm:$0xff]  ;;  %v1923_v2 = vld [vmem:[%s7709_s3 + $0x850] sm:$0xff]  ;;  %v3811_v44 = vld [vmem:[%s7710_s0 + $0x120] sm:$0xff] }
 0x11f   :  { %3253 = vmatprep.subr.bf16.mxu1 %v3252_v14  ;;  %v3260_v14 = vpack.c.bf16 %v2017_v45, %v2000_v9  ;;  %v1231_v37 = vmul.f32 %v3809_v35, %v8072_v13  ;;  %v1661_v9 = vld [vmem:[%s7709_s3 + $0x20] sm:$0xff]  ;;  %v1678_v45 = vld [vmem:[%s7709_s3 + $0xa8] sm:$0xff]  ;;  %v1248_v6 = vmul.f32 %v3811_v44, %v8072_v13  ;;  %v1473_v63 = vadd.f32 %v5892_v23, %v1266_v41  ;;  %v3814_v10 = vld [vmem:[%s7710_s0 + $0x238] sm:$0xff] }
 0x120   :  { %2669 = vmatmul.mubr.f32.gmra.mrb[6].mxu0 %v1597_v56  ;;  %v1803_v56 = vld [vmem:[%s7709_s3 + $0x490] sm:$0xff]  ;;  %v3270_v21 = vpack.c.bf16 %v1678_v45, %v1661_v9  ;;  %v1956_v45 = vld [vmem:[%s7709_s3 + $0x958] sm:$0xff]  ;;  %v1729_v44 = vld [vmem:[%s7709_s3 + $0x240] sm:$0xff] }
 0x121   :  { %2674 = vmatprep.mubr.f32.mxu0 %v1615_v22  ;;  %v3430_v22 = vpack.c.bf16 %v1820_v34, %v1803_v56  ;;  %v1939_v9 = vld [vmem:[%s7709_s3 + $0x8d0] sm:$0xff] }
 0x122   :  { %v3446_v41 = vpack.c.bf16 %v1956_v45, %v1939_v9  ;;  %v2007_v9 = vld [vmem:[%s7709_s3 + $0xaf0] sm:$0xff]  ;;  %v2024_v45 = vld [vmem:[%s7709_s3 + $0xb78] sm:$0xff] }
 0x124   :  { %2675 = vmatmul.mubr.f32.gmra.mrb[8].mxu0 %v1614_v15  ;;  %v1889_v15 = vld [vmem:[%s7709_s3 + $0x740] sm:$0xff] }
 0x125   :  { %3423 = vmatpush1.bf16.xpose.msra.mxu0 %v3422_v16  ;;  %2680 = vmatprep.mubr.f32.mxu0 %v1632_v50  ;;  %v1837_v16 = vld [vmem:[%s7709_s3 + $0x5a0] sm:$0xff]  ;;  %v3436_v50 = vpack.c.bf16 %v1889_v15, %v1872_v12  ;;  %v3813_v12 = vld [vmem:[%s7710_s0 + $0x1a8] sm:$0xff] }
 0x126   :  { %3425 = vmatprep.subr.bf16.mxu0 %v3424_v3  ;;  %3255 = vmatpush1.bf16.xpose.msra.mxu1 %v3254_v59  ;;  %v3434_v46 = vpack.c.bf16 %v1854_v30, %v1837_v16  ;;  %v6209_v3 = vrot.slane %v8060_v19, %v8067_v58  ;;  %v3266_v59 = vpack.c.bf16 %v2050_v31, %v2033_v0  ;;  %v1940_v0 = vld [vmem:[%s7709_s3 + $0x8d8] sm:$0xff]  ;;  %v1957_v31 = vld [vmem:[%s7709_s3 + $0x960] sm:$0xff] }
 0x127   :  { %3257 = vmatprep.subr.bf16.mxu1 %v3256_v51  ;;  %v3808_v51 = vld [vmem:[%s7710_s0 + $0xa0] sm:$0xff]  ;;  %v1265_v15 = vmul.f32 %v3813_v12, %v8072_v13 }
 0x128   :  { %2681 = vmatmul.mubr.f32.gmra.mrb[10].mxu0 %v1631_v40  ;;  %v1232_v40 = vmul.f32 %v3808_v51, %v8064_v7  ;;  %v1421_v29 = vadd.f32 %v6209_v3, %v1214_v43  ;;  %v1438_v34 = vadd.f32 %v6209_v3, %v1231_v37  ;;  %v1455_v30 = vadd.f32 %v6209_v3, %v1248_v6  ;;  %v1712_v43 = vld [vmem:[%s7709_s3 + $0x1b8] sm:$0xff]  ;;  %v1730_v51 = vld [vmem:[%s7709_s3 + $0x248] sm:$0xff] }
 0x129   :  { %2686 = vmatprep.mubr.f32.mxu0 %v1649_v11  ;;  %v1871_v11 = vld [vmem:[%s7709_s3 + $0x6b0] sm:$0xff]  ;;  %v3274_v37 = vpack.c.bf16 %v1712_v43, %v1695_v24  ;;  %v1746_v6 = vld [vmem:[%s7709_s3 + $0x2c8] sm:$0xff] }
 0x12a   :  { %v1439_v25 = vadd.f32 %v5892_v23, %v1232_v40  ;;  %v1540_v56 = vmax.f32 %v1421_v29, 0.0  ;;  %v1557_v16 = vmax.f32 %v1438_v34, 0.0  ;;  %v1747_v40 = vld [vmem:[%s7709_s3 + $0x2d0] sm:$0xff] }
 0x12b   :  { %v3815_v29 = vld [vmem:[%s7710_s0 + $0x230] sm:$0xff] }
 0x12c   :  { %2687 = vmatmul.mubr.f32.gmra.mrb[12].mxu0 %v1648_v42  ;;  %v3810_v42 = vld [vmem:[%s7710_s0 + $0x128] sm:$0xff]  ;;  %v1558_v1 = vmax.f32 %v1439_v25, 0.0  ;;  %v1282_v35 = vmul.f32 %v3815_v29, %v8072_v13  ;;  %v3816_v25 = vld [vmem:[%s7710_s0 + $0x2c0] sm:$0xff] }
 0x12d   :  { %3427 = vmatpush1.bf16.xpose.msra.mxu0 %v3426_v60  ;;  %2757 = vmatprep.mubr.f32.mxu0 %v1549_v33  ;;  %v1249_v60 = vmul.f32 %v3810_v42, %v8064_v7  ;;  %v3438_v33 = vpack.c.bf16 %v1888_v20, %v1871_v11  ;;  %v1574_v11 = vmax.f32 %v1455_v30, 0.0  ;;  %v1472_v20 = vadd.f32 %v6209_v3, %v1265_v15 }
 0x12e   :  { %3429 = vmatprep.subr.bf16.mxu0 %v3428_v8  ;;  %3259 = vmatpush1.bf16.xpose.msra.mxu1 %v3258_v26  ;;  %v1696_v8 = vld [vmem:[%s7709_s3 + $0x138] sm:$0xff]  ;;  %v1713_v26 = vld [vmem:[%s7709_s3 + $0x1c0] sm:$0xff]  ;;  %v1300_v42 = vmul.f32 %v3816_v25, %v8064_v7 }
 0x12f   :  { %3261 = vmatprep.subr.bf16.mxu1 %v3260_v14  ;;  %v3440_v14 = vpack.c.bf16 %v1923_v2, %v1906_v36  ;;  %v1592_v36 = vmax.f32 %v1473_v63, 0.0  ;;  %v8073_v63 = vld [vmem:[#allocation61_spill] sm:$0xff] }
 0x135   :  { %3431 = vmatpush1.bf16.xpose.msra.mxu0 %v3430_v22  ;;  %v1456_v22 = vadd.f32 %v5892_v23, %v1249_v60  ;;  %v3276_v60 = vpack.c.bf16 %v1747_v40, %v1730_v51  ;;  %v2008_v51 = vld [vmem:[%s7709_s3 + $0xaf8] sm:$0xff]  ;;  %v2025_v40 = vld [vmem:[%s7709_s3 + $0xb80] sm:$0xff] }
 0x136   :  { %3433 = vmatprep.subr.bf16.mxu0 %v3432_v28  ;;  %3263 = vmatpush1.bf16.xpose.msra.mxu1 %v3262_v49  ;;  %v3272_v28 = vpack.c.bf16 %v1713_v26, %v1696_v8  ;;  %v1905_v49 = vld [vmem:[%s7709_s3 + $0x7c0] sm:$0xff]  ;;  %v1991_v8 = vld [vmem:[%s7709_s3 + $0xa70] sm:$0xff]  ;;  %v1591_v26 = vmax.f32 %v1472_v20, 0.0 }
 0x137   :  { %3265 = vmatprep.subr.bf16.mxu1 %v3264_v48  ;;  %v1922_v48 = vld [vmem:[%s7709_s3 + $0x848] sm:$0xff]  ;;  %v1763_v20 = vld [vmem:[%s7709_s3 + $0x350] sm:$0xff] }
 0x13d   :  { %3435 = vmatpush1.bf16.xpose.msra.mxu0 %v3434_v46  ;;  %v1575_v46 = vmax.f32 %v1456_v22, 0.0  ;;  %v3818_v22 = vld [vmem:[%s7710_s0 + $0x348] sm:$0x1] }
 0x13e   :  { %3437 = vmatprep.subr.bf16.mxu0 %v3436_v50  ;;  %3267 = vmatpush1.bf16.xpose.msra.mxu1 %v3266_v59  ;;  %v1283_v50 = vmul.f32 %v3814_v10, %v8064_v7  ;;  %v3442_v59 = vpack.c.bf16 %v1922_v48, %v1905_v49  ;;  %v1317_v32 = vmul.f32 %v3818_v22, %v8064_v7  ;;  %v1764_v49 = vld [vmem:[%s7709_s3 + $0x358] sm:$0xff]  ;;  %v1781_v48 = vld [vmem:[%s7709_s3 + $0x3e0] sm:$0xff] }
 0x13f   :  { %3269 = vmatprep.subr.bf16.mxu1 %v3268_v47  ;;  %v3444_v47 = vpack.c.bf16 %v1957_v31, %v1940_v0  ;;  %v3819_v7 = vld [vmem:[%s7710_s0 + $0x340] sm:$0x1]  ;;  %v3280_v24 = vpack.c.bf16 %v1781_v48, %v1764_v49  ;;  %v3821_v49 = vld [vmem:[%s7710_s0 + $0x50] sm:$0xff] }
 0x140   :  { %v1490_v2 = vadd.f32 %v5892_v23, %v1283_v50  ;;  %v1316_v15 = vmul.f32 %v3819_v7, %v8072_v13  ;;  %v1524_v31 = vadd.f32 %v5892_v23, %v1317_v32  ;;  %v6349_v50 = vrot.slane %v8060_v19, %v8069_v52  ;;  %v2041_v22 = vld [vmem:[%s7709_s3 + $0xc00] sm:$0xff]  ;;  %v2058_v32 = vld [vmem:[%s7709_s3 + $0xc88] sm:$0xff] }
 0x141   :  { %v1222_v48 = vmul.f32 %v3821_v49, %v5901_v38  ;;  %v3458_v7 = vpack.c.bf16 %v2058_v32, %v2041_v22  ;;  %v1703_v49 = vld [vmem:[%s7709_s3 + $0x170] sm:$0xff] }
 0x145   :  { %3439 = vmatpush1.bf16.xpose.msra.mxu0 %v3438_v33  ;;  %2330 = vmatmul.mubr.f32.vlgmr.msra.gmra.mrb[0].mxu1 %v1540_v56  ;;  %v1974_v33 = vld [vmem:[%s7709_s3 + $0x9e8] sm:$0xff]  ;;  %v3817_v56 = vld [vmem:[%s7710_s0 + $0x2b8] sm:$0xff] }
 0x146   :  { %3441 = vmatprep.subr.bf16.mxu0 %v3440_v14  ;;  %3271 = vmatpush1.bf16.xpose.msra.mxu1 %v3270_v21  ;;  %v1489_v14 = vadd.f32 %v6209_v3, %v1282_v35  ;;  %v1299_v34 = vmul.f32 %v3817_v56, %v8072_v13  ;;  %v1609_v21 = vmax.f32 %v1490_v2, 0.0  ;;  %v1973_v13 = vld [vmem:[%s7709_s3 + $0x9e0] sm:$0xff]  ;;  %v1798_v35 = vld [vmem:[%s7709_s3 + $0x468] sm:$0xff]  ;;  %v3454_v56 = vpack.c.bf16 %v2024_v45, %v2007_v9 }
 0x147   :  { %2335 = vmatprep.mubr.f32.mxu1 %v1558_v1  ;;  %3273 = vmatprep.subr.bf16.mxu1 %v3272_v28  ;;  %v1507_v1 = vadd.f32 %v5892_v23, %v1300_v42  ;;  %v3448_v28 = vpack.c.bf16 %v1991_v8, %v1974_v33  ;;  %v1990_v23 = vld [vmem:[%s7709_s3 + $0xa68] sm:$0xff]  ;;  %v2059_v8 = vld [vmem:[%s7709_s3 + $0xc90] sm:$0xff]  ;;  %v1917_v9 = vld [vmem:[%s7709_s3 + $0x820] sm:$0xff] }
 0x148   :  { %v1608_v30 = vmax.f32 %v1489_v14, 0.0  ;;  %v1506_v12 = vadd.f32 %v6209_v3, %v1299_v34  ;;  %v3450_v29 = vpack.c.bf16 %v1990_v23, %v1973_v13  ;;  %v2042_v33 = vld [vmem:[%s7709_s3 + $0xc08] sm:$0xff]  ;;  %v1832_v34 = vld [vmem:[%s7709_s3 + $0x578] sm:$0xff] }
 0x149   :  { %2336 = vmatmul.mubr.f32.gmra.mrb[2].mxu1 %v1557_v16  ;;  %v3278_v16 = vpack.c.bf16 %v1746_v6, %v1729_v44  ;;  %v1626_v0 = vmax.f32 %v1507_v1, 0.0  ;;  %v1814_v14 = vld [vmem:[%s7709_s3 + $0x4e8] sm:$0xff]  ;;  %v1849_v44 = vld [vmem:[%s7709_s3 + $0x600] sm:$0xff]  ;;  %v3456_v6 = vpack.c.bf16 %v2059_v8, %v2042_v33  ;;  %v3823_v23 = vld [vmem:[%s7710_s0 + $0xd8] sm:$0xff] }
 0x14a   :  { %2341 = vmatprep.mubr.f32.mxu1 %v1575_v46  ;;  %v3820_v46 = vld [vmem:[%s7710_s0 + $0x28] sm:$0xff]  ;;  %v1625_v43 = vmax.f32 %v1506_v12, 0.0  ;;  %v3288_v1 = vpack.c.bf16 %v1849_v44, %v1832_v34  ;;  %v1848_v12 = vld [vmem:[%s7709_s3 + $0x5f8] sm:$0xff]  ;;  %v3826_v8 = vld [vmem:[%s7710_s0 + $0x1f0] sm:$0xff] }
 0x14b   :  { %v1217_v10 = vmul.f32 %v3820_v46, %v8073_v63 }
 0x14d   :  { %3443 = vmatpush1.bf16.xpose.msra.mxu0 %v3442_v59  ;;  %2342 = vmatmul.mubr.f32.gmra.mrb[4].mxu1 %v1574_v11  ;;  %v1523_v59 = vadd.f32 %v6209_v3, %v1316_v15  ;;  %v1424_v11 = vadd.f32 %v6349_v50, %v1217_v10  ;;  %v1780_v3 = vld [vmem:[%s7709_s3 + $0x3d8] sm:$0xff]  ;;  %v1866_v15 = vld [vmem:[%s7709_s3 + $0x688] sm:$0xff] }
 0x14e   :  { %3445 = vmatprep.subr.bf16.mxu0 %v3444_v47  ;;  %3275 = vmatpush1.bf16.xpose.msra.mxu1 %v3274_v37  ;;  %v1643_v47 = vmax.f32 %v1524_v31, 0.0  ;;  %v1815_v37 = vld [vmem:[%s7709_s3 + $0x4f0] sm:$0xff]  ;;  %v3282_v25 = vpack.c.bf16 %v1780_v3, %v1763_v20  ;;  %v1704_v20 = vld [vmem:[%s7709_s3 + $0x178] sm:$0xff]  ;;  %v1721_v3 = vld [vmem:[%s7709_s3 + $0x200] sm:$0xff] }
 0x14f   :  { %2347 = vmatprep.mubr.f32.mxu1 %v1592_v36  ;;  %3277 = vmatprep.subr.bf16.mxu1 %v3276_v60  ;;  %v3452_v36 = vpack.c.bf16 %v2025_v40, %v2008_v51  ;;  %v1642_v2 = vmax.f32 %v1523_v59, 0.0  ;;  %v1543_v42 = vmax.f32 %v1424_v11, 0.0  ;;  %v3284_v60 = vpack.c.bf16 %v1815_v37, %v1798_v35  ;;  %v3824_v51 = vld [vmem:[%s7710_s0 + $0x168] sm:$0xff]  ;;  %v1865_v35 = vld [vmem:[%s7709_s3 + $0x680] sm:$0xff] }
 0x150   :  { %v1257_v40 = vmul.f32 %v3824_v51, %v5904_v27  ;;  %v1686_v11 = vld [vmem:[%s7709_s3 + $0xe8] sm:$0xff] }
 0x151   :  { %2348 = vmatmul.mubr.f32.gmra.mrb[6].mxu1 %v1591_v26  ;;  %v1797_v26 = vld [vmem:[%s7709_s3 + $0x460] sm:$0xff]  ;;  %v1882_v37 = vld [vmem:[%s7709_s3 + $0x708] sm:$0xff] }
 0x152   :  { %2353 = vmatprep.mubr.f32.mxu1 %v1609_v21  ;;  %v3286_v21 = vpack.c.bf16 %v1814_v14, %v1797_v26  ;;  %v1464_v33 = vadd.f32 %v6127_v53, %v1257_v40  ;;  %v1274_v26 = vmul.f32 %v3826_v8, %v5904_v27  ;;  %v3464_v14 = vpack.c.bf16 %v1721_v3, %v1704_v20  ;;  %v1933_v8 = vld [vmem:[%s7709_s3 + $0x8a0] sm:$0xff] }
 0x154   :  { %v1583_v22 = vmax.f32 %v1464_v33, 0.0  ;;  %v1481_v32 = vadd.f32 %v6127_v53, %v1274_v26 }
 0x155   :  { %3447 = vmatpush1.bf16.xpose.msra.mxu0 %v3446_v41  ;;  %2354 = vmatmul.mubr.f32.gmra.mrb[8].mxu1 %v1608_v30  ;;  %v1670_v41 = vld [vmem:[%s7709_s3 + $0x68] sm:$0xff]  ;;  %v1831_v30 = vld [vmem:[%s7709_s3 + $0x570] sm:$0xff] }
 0x156   :  { %3449 = vmatprep.subr.bf16.mxu0 %v3448_v28  ;;  %3279 = vmatpush1.bf16.xpose.msra.mxu1 %v3278_v16  ;;  %v1687_v28 = vld [vmem:[%s7709_s3 + $0xf0] sm:$0xff]  ;;  %v6419_v16 = vrot.slane %v5970_v57, %v8067_v58  ;;  %v3822_v58 = vld [vmem:[%s7710_s0 + $0xe0] sm:$0xff]  ;;  %v3290_v10 = vpack.c.bf16 %v1848_v12, %v1831_v30  ;;  %v1738_v30 = vld [vmem:[%s7709_s3 + $0x288] sm:$0xff] }
 0x157   :  { %2359 = vmatprep.mubr.f32.mxu1 %v1626_v0  ;;  %3281 = vmatprep.subr.bf16.mxu1 %v3280_v24  ;;  %v1883_v0 = vld [vmem:[%s7709_s3 + $0x710] sm:$0xff]  ;;  %v1240_v31 = vmul.f32 %v3822_v58, %v5904_v27  ;;  %v3460_v46 = vpack.c.bf16 %v1687_v28, %v1670_v41  ;;  %v3828_v41 = vld [vmem:[%s7710_s0 + $0x278] sm:$0xff] }
 0x158   :  { %v1429_v24 = vadd.f32 %v6419_v16, %v1222_v48  ;;  %v3292_v13 = vpack.c.bf16 %v1883_v0, %v1866_v15  ;;  %v1291_v28 = vmul.f32 %v3828_v41, %v5904_v27  ;;  %v1720_v48 = vld [vmem:[%s7709_s3 + $0x1f8] sm:$0xff]  ;;  %v1755_v12 = vld [vmem:[%s7709_s3 + $0x310] sm:$0xff] }
 0x159   :  { %2360 = vmatmul.mubr.f32.gmra.mrb[10].mxu1 %v1625_v43  ;;  %v1239_v43 = vmul.f32 %v3823_v23, %v5901_v38  ;;  %v1447_v59 = vadd.f32 %v6127_v53, %v1240_v31  ;;  %v1916_v15 = vld [vmem:[%s7709_s3 + $0x818] sm:$0xff]  ;;  %v3829_v31 = vld [vmem:[%s7710_s0 + $0x270] sm:$0xff]  ;;  %v1600_v23 = vmax.f32 %v1481_v32, 0.0  ;;  %v3468_v40 = vpack.c.bf16 %v1755_v12, %v1738_v30 }
 0x15a   :  { %2365 = vmatprep.mubr.f32.mxu1 %v1643_v47  ;;  %v1669_v47 = vld [vmem:[%s7709_s3 + $0x60] sm:$0xff] }
 0x15b   :  { %v1566_v45 = vmax.f32 %v1447_v59, 0.0  ;;  %v3830_v59 = vld [vmem:[%s7710_s0 + $0x300] sm:$0xff] }
 0x15c   :  { %v1308_v51 = vmul.f32 %v3830_v59, %v5904_v27 }
 0x15d   :  { %3451 = vmatpush1.bf16.xpose.msra.mxu0 %v3450_v29  ;;  %2366 = vmatmul.mubr.f32.gmra.mrb[12].mxu1 %v1642_v2  ;;  %v1548_v29 = vmax.f32 %v1429_v24, 0.0  ;;  %v3825_v2 = vld [vmem:[%s7710_s0 + $0x160] sm:$0xff]  ;;  %v1934_v24 = vld [vmem:[%s7709_s3 + $0x8a8] sm:$0xff] }
 0x15e   :  { %3453 = vmatprep.subr.bf16.mxu0 %v3452_v36  ;;  %3283 = vmatpush1.bf16.xpose.msra.mxu1 %v3282_v25  ;;  %v1446_v36 = vadd.f32 %v6419_v16, %v1239_v43  ;;  %v1256_v25 = vmul.f32 %v3825_v2, %v5901_v38  ;;  %v1498_v43 = vadd.f32 %v6127_v53, %v1291_v28 }
 0x15f   :  { %2436 = vmatprep.mubr.f32.mxu1 %v1543_v42  ;;  %3285 = vmatprep.subr.bf16.mxu1 %v3284_v60  ;;  %v3462_v42 = vpack.c.bf16 %v1686_v11, %v1669_v47  ;;  %v1900_v60 = vld [vmem:[%s7709_s3 + $0x798] sm:$0xff] }
 0x160   :  { %v3296_v34 = vpack.c.bf16 %v1917_v9, %v1900_v60  ;;  %v1565_v44 = vmax.f32 %v1446_v36, 0.0  ;;  %v1754_v36 = vld [vmem:[%s7709_s3 + $0x308] sm:$0xff]  ;;  %v1617_v2 = vmax.f32 %v1498_v43, 0.0  ;;  %v1772_v9 = vld [vmem:[%s7709_s3 + $0x398] sm:$0xff] }
 0x165   :  { %3455 = vmatpush1.bf16.xpose.msra.mxu0 %v3454_v56  ;;  %v3294_v56 = vpack.c.bf16 %v1882_v37, %v1865_v35  ;;  %v1737_v37 = vld [vmem:[%s7709_s3 + $0x280] sm:$0xff] }
 0x166   :  { %3457 = vmatprep.subr.bf16.mxu0 %v3456_v6  ;;  %3287 = vmatpush1.bf16.xpose.msra.mxu1 %v3286_v21  ;;  %v1463_v6 = vadd.f32 %v6419_v16, %v1256_v25  ;;  %v3827_v21 = vld [vmem:[%s7710_s0 + $0x1e8] sm:$0xff]  ;;  %v1515_v25 = vadd.f32 %v6127_v53, %v1308_v51  ;;  %v3470_v33 = vpack.c.bf16 %v1754_v36, %v1737_v37  ;;  %v1805_v51 = vld [vmem:[%s7709_s3 + $0x4a0] sm:$0xff] }
 0x167   :  { %3289 = vmatprep.subr.bf16.mxu1 %v3288_v1  ;;  %v1273_v1 = vmul.f32 %v3827_v21, %v5901_v38  ;;  %v2053_v37 = vld [vmem:[%s7709_s3 + $0xc60] sm:$0xff] }
 0x168   :  { %v1582_v0 = vmax.f32 %v1463_v6, 0.0  ;;  %v1985_v6 = vld [vmem:[%s7709_s3 + $0xa40] sm:$0xff]  ;;  %v1634_v21 = vmax.f32 %v1515_v25, 0.0 }
 0x169   :  { %v1480_v58 = vadd.f32 %v6419_v16, %v1273_v1 }
 0x16b   :  { %v1599_v20 = vmax.f32 %v1480_v58, 0.0  ;;  %v1984_v58 = vld [vmem:[%s7709_s3 + $0xa38] sm:$0xff] }
 0x16d   :  { %3459 = vmatpush1.bf16.xpose.msra.mxu0 %v3458_v7  ;;  %v1899_v7 = vld [vmem:[%s7709_s3 + $0x790] sm:$0xff] }
 0x16e   :  { %3461 = vmatprep.subr.bf16.mxu0 %v3460_v46  ;;  %3291 = vmatpush1.bf16.xpose.msra.mxu1 %v3290_v10  ;;  %v1290_v46 = vmul.f32 %v3829_v31, %v5901_v38  ;;  %v3466_v10 = vpack.c.bf16 %v1720_v48, %v1703_v49  ;;  %v3298_v47 = vpack.c.bf16 %v1916_v15, %v1899_v7  ;;  %v1771_v7 = vld [vmem:[%s7709_s3 + $0x390] sm:$0xff]  ;;  %v1806_v15 = vld [vmem:[%s7709_s3 + $0x4a8] sm:$0xff] }
 0x16f   :  { %3293 = vmatprep.subr.bf16.mxu1 %v3292_v13  ;;  %v1951_v13 = vld [vmem:[%s7709_s3 + $0x930] sm:$0xff] }
 0x170   :  { %v3300_v11 = vpack.c.bf16 %v1951_v13, %v1934_v24  ;;  %v1497_v3 = vadd.f32 %v6419_v16, %v1290_v46  ;;  %v2019_v24 = vld [vmem:[%s7709_s3 + $0xb50] sm:$0xff] }
 0x172   :  { %v1616_v26 = vmax.f32 %v1497_v3, 0.0  ;;  %v2018_v3 = vld [vmem:[%s7709_s3 + $0xb48] sm:$0xff] }
 0x174   :  { %2758 = vmatmul.mubr.f32.vlgmr.msra.gmra.mrb[0].mxu0 %v1548_v29  ;;  %v3831_v29 = vld [vmem:[%s7710_s0 + $0x2f8] sm:$0xff] }
 0x175   :  { %3463 = vmatpush1.bf16.xpose.msra.mxu0 %v3462_v42  ;;  %2763 = vmatprep.mubr.f32.mxu0 %v1566_v45  ;;  %v1307_v35 = vmul.f32 %v3831_v29, %v5901_v38  ;;  %v3832_v42 = vld [vmem:[%s7710_s0 + $0x388] sm:$0x1]  ;;  %v1789_v45 = vld [vmem:[%s7709_s3 + $0x420] sm:$0xff] }
 0x176   :  { %3465 = vmatprep.subr.bf16.mxu0 %v3464_v14  ;;  %3295 = vmatpush1.bf16.xpose.msra.mxu1 %v3294_v56  ;;  %v1325_v60 = vmul.f32 %v3832_v42, %v5904_v27  ;;  %v1950_v27 = vld [vmem:[%s7709_s3 + $0x928] sm:$0xff]  ;;  %v3833_v56 = vld [vmem:[%s7710_s0 + $0x380] sm:$0x1]  ;;  %v3472_v41 = vpack.c.bf16 %v1789_v45, %v1772_v9  ;;  %v1839_v42 = vld [vmem:[%s7709_s3 + $0x5b0] sm:$0xff] }
 0x177   :  { %3297 = vmatprep.subr.bf16.mxu1 %v3296_v34  ;;  %v1514_v14 = vadd.f32 %v6419_v16, %v1307_v35  ;;  %v1324_v34 = vmul.f32 %v3833_v56, %v5901_v38  ;;  %v6571_v38 = vrot.slane %v5970_v57, %v8069_v52  ;;  %v3302_v28 = vpack.c.bf16 %v1950_v27, %v1933_v8  ;;  %v1788_v52 = vld [vmem:[%s7709_s3 + $0x418] sm:$0xff]  ;;  %v1874_v9 = vld [vmem:[%s7709_s3 + $0x6c8] sm:$0xff]  ;;  %v1891_v45 = vld [vmem:[%s7709_s3 + $0x750] sm:$0xff] }
 0x178   :  { %2764 = vmatmul.mubr.f32.gmra.mrb[2].mxu0 %v1565_v44  ;;  %v1968_v44 = vld [vmem:[%s7709_s3 + $0x9b8] sm:$0xff]  ;;  %v1532_v1 = vadd.f32 %v6127_v53, %v1325_v60  ;;  %v3474_v46 = vpack.c.bf16 %v1788_v52, %v1771_v7  ;;  %v3484_v56 = vpack.c.bf16 %v1891_v45, %v1874_v9  ;;  %v1925_v7 = vld [vmem:[%s7709_s3 + $0x860] sm:$0xff] }
 0x179   :  { %2769 = vmatprep.mubr.f32.mxu0 %v1583_v22  ;;  %v3834_v22 = vld [vmem:[%s7710_s0 + $0x68] sm:$0xff]  ;;  %v3304_v49 = vpack.c.bf16 %v1985_v6, %v1968_v44  ;;  %v1633_v48 = vmax.f32 %v1514_v14, 0.0  ;;  %v1531_v30 = vadd.f32 %v6419_v16, %v1324_v34  ;;  %v1823_v16 = vld [vmem:[%s7709_s3 + $0x530] sm:$0xff]  ;;  %v2036_v35 = vld [vmem:[%s7709_s3 + $0xbd8] sm:$0xff] }
 0x17a   :  { %v1225_v32 = vmul.f32 %v3834_v22, %v5910_v17  ;;  %v1651_v53 = vmax.f32 %v1532_v1, 0.0  ;;  %v3312_v25 = vpack.c.bf16 %v2053_v37, %v2036_v35  ;;  %v1856_v60 = vld [vmem:[%s7709_s3 + $0x638] sm:$0xff]  ;;  %v1681_v14 = vld [vmem:[%s7709_s3 + $0xc0] sm:$0xff]  ;;  %v3836_v22 = vld [vmem:[%s7710_s0 + $0xb0] sm:$0xff] }
 0x17b   :  { %v1650_v31 = vmax.f32 %v1531_v30, 0.0  ;;  %v2052_v8 = vld [vmem:[%s7709_s3 + $0xc58] sm:$0xff]  ;;  %v3482_v27 = vpack.c.bf16 %v1856_v60, %v1839_v42  ;;  %v3835_v34 = vld [vmem:[%s7710_s0 + $0x20] sm:$0xff]  ;;  %v3837_v30 = vld [vmem:[%s7710_s0 + $0xa8] sm:$0xff] }
 0x17c   :  { %2770 = vmatmul.mubr.f32.gmra.mrb[4].mxu0 %v1582_v0  ;;  %v1432_v12 = vadd.f32 %v6571_v38, %v1225_v32  ;;  %v1967_v0 = vld [vmem:[%s7709_s3 + $0x9b0] sm:$0xff]  ;;  %v8074_v44 = vld [vmem:[#allocation57_spill] sm:$0xff]  ;;  %v1234_v32 = vmul.f32 %v3836_v22, %v8073_v63  ;;  %v1942_v42 = vld [vmem:[%s7709_s3 + $0x8e8] sm:$0xff] }
 0x17d   :  { %3467 = vmatpush1.bf16.xpose.msra.mxu0 %v3466_v10  ;;  %2775 = vmatprep.mubr.f32.mxu0 %v1600_v23  ;;  %v2002_v10 = vld [vmem:[%s7709_s3 + $0xac8] sm:$0xff]  ;;  %v3476_v23 = vpack.c.bf16 %v1823_v16, %v1806_v15  ;;  %v3306_v43 = vpack.c.bf16 %v1984_v58, %v1967_v0  ;;  %v1216_v6 = vmul.f32 %v3835_v34, %v8074_v44  ;;  %v3838_v15 = vld [vmem:[%s7710_s0 + $0x138] sm:$0xff]  ;;  %v1663_v0 = vld [vmem:[%s7709_s3 + $0x30] sm:$0xff] }
 0x17e   :  { %3469 = vmatprep.subr.bf16.mxu0 %v3468_v40  ;;  %3299 = vmatpush1.bf16.xpose.msra.mxu1 %v3298_v47  ;;  %v1551_v13 = vmax.f32 %v1432_v12, 0.0  ;;  %v3308_v59 = vpack.c.bf16 %v2019_v24, %v2002_v10  ;;  %v1822_v40 = vld [vmem:[%s7709_s3 + $0x528] sm:$0xff]  ;;  %v1840_v47 = vld [vmem:[%s7709_s3 + $0x5b8] sm:$0xff]  ;;  %v1441_v52 = vadd.f32 %v6349_v50, %v1234_v32  ;;  %v1251_v16 = vmul.f32 %v3838_v15, %v8073_v63  ;;  %v1715_v10 = vld [vmem:[%s7709_s3 + $0x1d0] sm:$0xff] }
 0x17f   :  { %3301 = vmatprep.subr.bf16.mxu1 %v3300_v11  ;;  %v1857_v11 = vld [vmem:[%s7709_s3 + $0x640] sm:$0xff]  ;;  %v3478_v29 = vpack.c.bf16 %v1822_v40, %v1805_v51  ;;  %v1908_v12 = vld [vmem:[%s7709_s3 + $0x7d8] sm:$0xff]  ;;  %v1959_v60 = vld [vmem:[%s7709_s3 + $0x970] sm:$0xff] }
 0x180   :  { %2776 = vmatmul.mubr.f32.gmra.mrb[6].mxu0 %v1599_v20  ;;  %v2001_v20 = vld [vmem:[%s7709_s3 + $0xac0] sm:$0xff]  ;;  %v3480_v36 = vpack.c.bf16 %v1857_v11, %v1840_v47  ;;  %v1680_v58 = vld [vmem:[%s7709_s3 + $0xb8] sm:$0xff]  ;;  %v3488_v24 = vpack.c.bf16 %v1925_v7, %v1908_v12  ;;  %v1560_v40 = vmax.f32 %v1441_v52, 0.0  ;;  %v1458_v47 = vadd.f32 %v6349_v50, %v1251_v16  ;;  %v1958_v52 = vld [vmem:[%s7709_s3 + $0x968] sm:$0xff] }
 0x181   :  { %2781 = vmatprep.mubr.f32.mxu0 %v1617_v2  ;;  %v3310_v2 = vpack.c.bf16 %v2018_v3, %v2001_v20  ;;  %v3318_v51 = vpack.c.bf16 %v1680_v58, %v1663_v0  ;;  %v3840_v11 = vld [vmem:[%s7710_s0 + $0x1c0] sm:$0xff]  ;;  %v1924_v35 = vld [vmem:[%s7709_s3 + $0x858] sm:$0xff] }
 0x182   :  { %v1268_v20 = vmul.f32 %v3840_v11, %v8073_v63  ;;  %v1577_v9 = vmax.f32 %v1458_v47, 0.0  ;;  %v1749_v34 = vld [vmem:[%s7709_s3 + $0x2e0] sm:$0xff]  ;;  %v1976_v15 = vld [vmem:[%s7709_s3 + $0x9f8] sm:$0xff]  ;;  %v1766_v47 = vld [vmem:[%s7709_s3 + $0x368] sm:$0xff] }
 0x183   :  { %v3843_v32 = vld [vmem:[%s7710_s0 + $0x240] sm:$0xff]  ;;  %v1783_v11 = vld [vmem:[%s7709_s3 + $0x3f0] sm:$0xff] }
 0x184   :  { %2782 = vmatmul.mubr.f32.gmra.mrb[8].mxu0 %v1616_v26  ;;  %v1664_v26 = vld [vmem:[%s7709_s3 + $0x38] sm:$0xff]  ;;  %v1475_v45 = vadd.f32 %v6349_v50, %v1268_v20  ;;  %v1941_v7 = vld [vmem:[%s7709_s3 + $0x8e0] sm:$0xff] }
 0x185   :  { %3471 = vmatpush1.bf16.xpose.msra.mxu0 %v3470_v33  ;;  %2787 = vmatprep.mubr.f32.mxu0 %v1634_v21  ;;  %v2035_v33 = vld [vmem:[%s7709_s3 + $0xbd0] sm:$0xff]  ;;  %v6653_v21 = vrot.slane %v8060_v19, %v8068_v5  ;;  %v1993_v16 = vld [vmem:[%s7709_s3 + $0xa80] sm:$0xff] }
 0x186   :  { %3473 = vmatprep.subr.bf16.mxu0 %v3472_v41  ;;  %3303 = vmatpush1.bf16.xpose.msra.mxu1 %v3302_v28  ;;  %v3314_v1 = vpack.c.bf16 %v2052_v8, %v2035_v33  ;;  %v3316_v41 = vpack.c.bf16 %v1681_v14, %v1664_v26  ;;  %v1873_v28 = vld [vmem:[%s7709_s3 + $0x6c0] sm:$0xff]  ;;  %v3842_v33 = vld [vmem:[%s7710_s0 + $0x248] sm:$0xff] }
 0x187   :  { %3305 = vmatprep.subr.bf16.mxu1 %v3304_v49  ;;  %v1890_v49 = vld [vmem:[%s7709_s3 + $0x748] sm:$0xff]  ;;  %v1285_v8 = vmul.f32 %v3842_v33, %v8073_v63 }
 0x188   :  { %2788 = vmatmul.mubr.f32.gmra.mrb[10].mxu0 %v1633_v48  ;;  %v1423_v48 = vadd.f32 %v6653_v21, %v1216_v6  ;;  %v1714_v26 = vld [vmem:[%s7709_s3 + $0x1c8] sm:$0xff]  ;;  %v3492_v6 = vpack.c.bf16 %v1959_v60, %v1942_v42  ;;  %v6793_v60 = vrot.slane %v8060_v19, %v8071_v62 }
 0x189   :  { %2793 = vmatprep.mubr.f32.mxu0 %v1651_v53  ;;  %v1233_v53 = vmul.f32 %v3837_v30, %v8074_v44  ;;  %v3844_v30 = vld [vmem:[%s7710_s0 + $0x2d0] sm:$0xff] }
 0x18c   :  { %2794 = vmatmul.mubr.f32.gmra.mrb[12].mxu0 %v1650_v31  ;;  %v3486_v31 = vpack.c.bf16 %v1890_v49, %v1873_v28  ;;  %v1594_v49 = vmax.f32 %v1475_v45, 0.0 }
 0x18d   :  { %3475 = vmatpush1.bf16.xpose.msra.mxu0 %v3474_v46  ;;  %2864 = vmatprep.mubr.f32.mxu0 %v1551_v13  ;;  %v1698_v46 = vld [vmem:[%s7709_s3 + $0x148] sm:$0xff]  ;;  %v1542_v13 = vmax.f32 %v1423_v48, 0.0  ;;  %v1492_v48 = vadd.f32 %v6349_v50, %v1285_v8 }
 0x18e   :  { %3477 = vmatprep.subr.bf16.mxu0 %v3476_v23  ;;  %3307 = vmatpush1.bf16.xpose.msra.mxu1 %v3306_v43  ;;  %v1440_v23 = vadd.f32 %v6653_v21, %v1233_v53  ;;  %v3839_v43 = vld [vmem:[%s7710_s0 + $0x130] sm:$0xff]  ;;  %v3320_v3 = vpack.c.bf16 %v1715_v10, %v1698_v46  ;;  %v1302_v53 = vmul.f32 %v3844_v30, %v8073_v63  ;;  %v2010_v8 = vld [vmem:[%s7709_s3 + $0xb08] sm:$0xff] }
 0x18f   :  { %3309 = vmatprep.subr.bf16.mxu1 %v3308_v59  ;;  %v1250_v59 = vmul.f32 %v3839_v43, %v8074_v44  ;;  %v1731_v10 = vld [vmem:[%s7709_s3 + $0x250] sm:$0xff]  ;;  %v3846_v43 = vld [vmem:[%s7710_s0 + $0x358] sm:$0x1]  ;;  %v2026_v30 = vld [vmem:[%s7709_s3 + $0xb88] sm:$0xff] }
 0x190   :  { %v1559_v37 = vmax.f32 %v1440_v23, 0.0  ;;  %v1509_v23 = vadd.f32 %v6349_v50, %v1302_v53  ;;  %v2044_v53 = vld [vmem:[%s7709_s3 + $0xc18] sm:$0xff] }
 0x195   :  { %3479 = vmatpush1.bf16.xpose.msra.mxu0 %v3478_v29  ;;  %v1907_v29 = vld [vmem:[%s7709_s3 + $0x7d0] sm:$0xff] }
 0x196   :  { %3481 = vmatprep.subr.bf16.mxu0 %v3480_v36  ;;  %3311 = vmatpush1.bf16.xpose.msra.mxu1 %v3310_v2  ;;  %v1457_v36 = vadd.f32 %v6653_v21, %v1250_v59  ;;  %v3841_v2 = vld [vmem:[%s7710_s0 + $0x1b8] sm:$0xff]  ;;  %v3490_v14 = vpack.c.bf16 %v1924_v35, %v1907_v29  ;;  %v1319_v59 = vmul.f32 %v3846_v43, %v8073_v63  ;;  %v3847_v63 = vld [vmem:[%s7710_s0 + $0x350] sm:$0x1] }
 0x197   :  { %3313 = vmatprep.subr.bf16.mxu1 %v3312_v25  ;;  %v1267_v25 = vmul.f32 %v3841_v2, %v8074_v44  ;;  %v1318_v35 = vmul.f32 %v3847_v63, %v8074_v44  ;;  %v3848_v2 = vld [vmem:[%s7710_s0 + $0x38] sm:$0xff]  ;;  %v1833_v63 = vld [vmem:[%s7709_s3 + $0x580] sm:$0xff] }
 0x198   :  { %v2060_v43 = vld [vmem:[%s7709_s3 + $0xc98] sm:$0xff] }
 0x199   :  { %v1474_v22 = vadd.f32 %v6653_v21, %v1267_v25  ;;  %v8075_v25 = vld [vmem:[#allocation48_spill] sm:$0xff]  ;;  %v1525_v33 = vadd.f32 %v6653_v21, %v1318_v35  ;;  %v1850_v35 = vld [vmem:[%s7709_s3 + $0x608] sm:$0xff] }
 0x19a   :  { %v1219_v42 = vmul.f32 %v3848_v2, %v8075_v25  ;;  %v6912_v2 = vld [vmem:[%s7709_s3 + $0x320] sm:$0xff] }
 0x19b   :  { %v1593_v0 = vmax.f32 %v1474_v22, 0.0 }
 0x19d   :  { %3483 = vmatpush1.bf16.xpose.msra.mxu0 %v3482_v27  ;;  %v1697_v27 = vld [vmem:[%s7709_s3 + $0x140] sm:$0xff] }
 0x19e   :  { %3485 = vmatprep.subr.bf16.mxu0 %v3484_v56  ;;  %3315 = vmatpush1.bf16.xpose.msra.mxu1 %v3314_v1  ;;  %v1732_v56 = vld [vmem:[%s7709_s3 + $0x258] sm:$0xff]  ;;  %v1576_v1 = vmax.f32 %v1457_v36, 0.0  ;;  %v3322_v28 = vpack.c.bf16 %v1714_v26, %v1697_v27  ;;  %v1526_v36 = vadd.f32 %v6349_v50, %v1319_v59  ;;  %v2027_v27 = vld [vmem:[%s7709_s3 + $0xb90] sm:$0xff] }
 0x19f   :  { %3317 = vmatprep.subr.bf16.mxu1 %v3316_v41  ;;  %v1284_v41 = vmul.f32 %v3843_v32, %v8074_v44  ;;  %v3324_v12 = vpack.c.bf16 %v1749_v34, %v1732_v56  ;;  %v1992_v50 = vld [vmem:[%s7709_s3 + $0xa78] sm:$0xff]  ;;  %v1765_v56 = vld [vmem:[%s7709_s3 + $0x360] sm:$0xff]  ;;  %v3500_v22 = vpack.c.bf16 %v2027_v27, %v2010_v8  ;;  %v1644_v32 = vmax.f32 %v1525_v33, 0.0  ;;  %v6927_v33 = vld [vmem:[%s7709_s3 + $0x690] sm:$0xff] }
 0x1a0   :  { %v1645_v26 = vmax.f32 %v1526_v36, 0.0  ;;  %v1672_v59 = vld [vmem:[%s7709_s3 + $0x78] sm:$0xff]  ;;  %v6937_v27 = vld [vmem:[%s7709_s3 + $0x7a8] sm:$0xff] }
 0x1a1   :  { %v1491_v58 = vadd.f32 %v6653_v21, %v1284_v41  ;;  %v6907_v36 = vld [vmem:[%s7709_s3 + $0x298] sm:$0xff] }
 0x1a2   :  { %v6932_v8 = vld [vmem:[%s7709_s3 + $0x718] sm:$0xff] }
 0x1a5   :  { %3487 = vmatpush1.bf16.xpose.msra.mxu0 %v3486_v31  ;;  %2437 = vmatmul.mubr.f32.vlgmr.msra.gmra.mrb[0].mxu1 %v1542_v13  ;;  %v3845_v31 = vld [vmem:[%s7710_s0 + $0x2c8] sm:$0xff]  ;;  %v1611_v13 = vmax.f32 %v1492_v48, 0.0  ;;  %v2009_v48 = vld [vmem:[%s7709_s3 + $0xb00] sm:$0xff] }
 0x1a6   :  { %3489 = vmatprep.subr.bf16.mxu0 %v3488_v24  ;;  %3319 = vmatpush1.bf16.xpose.msra.mxu1 %v3318_v51  ;;  %v1301_v46 = vmul.f32 %v3845_v31, %v8074_v44  ;;  %v1748_v24 = vld [vmem:[%s7709_s3 + $0x2d8] sm:$0xff]  ;;  %v3494_v51 = vpack.c.bf16 %v1958_v52, %v1941_v7  ;;  %v1975_v44 = vld [vmem:[%s7709_s3 + $0x9f0] sm:$0xff] }
 0x1a7   :  { %2442 = vmatprep.mubr.f32.mxu1 %v1560_v40  ;;  %3321 = vmatprep.subr.bf16.mxu1 %v3320_v3  ;;  %v3496_v40 = vpack.c.bf16 %v1993_v16, %v1976_v15  ;;  %v3326_v20 = vpack.c.bf16 %v1748_v24, %v1731_v10  ;;  %v1610_v3 = vmax.f32 %v1491_v58, 0.0  ;;  %v3498_v34 = vpack.c.bf16 %v1992_v50, %v1975_v44  ;;  %v1799_v7 = vld [vmem:[%s7709_s3 + $0x470] sm:$0xff]  ;;  %v1816_v52 = vld [vmem:[%s7709_s3 + $0x4f8] sm:$0xff]  ;;  %v1834_v16 = vld [vmem:[%s7709_s3 + $0x588] sm:$0xff] }
 0x1a8   :  { %v1508_v29 = vadd.f32 %v6653_v21, %v1301_v46  ;;  %v1782_v21 = vld [vmem:[%s7709_s3 + $0x3e8] sm:$0xff]  ;;  %v3502_v15 = vpack.c.bf16 %v2026_v30, %v2009_v48  ;;  %v3334_v31 = vpack.c.bf16 %v1816_v52, %v1799_v7  ;;  %v3849_v46 = vld [vmem:[%s7710_s0 + $0x60] sm:$0xff]  ;;  %v6851_v24 = vrot.slane %v5970_v57, %v8068_v5  ;;  %v3850_v44 = vld [vmem:[%s7710_s0 + $0xf0] sm:$0xff] }
 0x1a9   :  { %2443 = vmatmul.mubr.f32.gmra.mrb[2].mxu1 %v1559_v37  ;;  %v1628_v37 = vmax.f32 %v1509_v23, 0.0  ;;  %v3330_v41 = vpack.c.bf16 %v1782_v21, %v1765_v56  ;;  %v1224_v10 = vmul.f32 %v3849_v46, %v5907_v4  ;;  %v2043_v23 = vld [vmem:[%s7709_s3 + $0xc10] sm:$0xff]  ;;  %v1689_v5 = vld [vmem:[%s7709_s3 + $0x100] sm:$0xff]  ;;  %v1242_v50 = vmul.f32 %v3850_v44, %v5910_v17  ;;  %v6952_v21 = vld [vmem:[%s7709_s3 + $0x828] sm:$0xff] }
 0x1aa   :  { %2448 = vmatprep.mubr.f32.mxu1 %v1577_v9  ;;  %v3328_v9 = vpack.c.bf16 %v1783_v11, %v1766_v47  ;;  %v1627_v45 = vmax.f32 %v1508_v29, 0.0  ;;  %v6881_v11 = vld [vmem:[%s7709_s3 + $0x188] sm:$0xff]  ;;  %v6947_v56 = vld [vmem:[%s7709_s3 + $0x7a0] sm:$0xff]  ;;  %v3516_v7 = vpack.c.bf16 %v6912_v2, %v6907_v36  ;;  %v3342_v52 = vpack.c.bf16 %v6932_v8, %v6927_v33  ;;  %v1935_v36 = vld [vmem:[%s7709_s3 + $0x8b0] sm:$0xff] }
 0x1ab   :  { %v6876_v47 = vadd.f32 %v6851_v24, %v1224_v10  ;;  %v6896_v29 = vld [vmem:[%s7709_s3 + $0x208] sm:$0xff]  ;;  %v1449_v30 = vadd.f32 %v6571_v38, %v1242_v50  ;;  %v6991_v10 = vld [vmem:[%s7710_s0 + $0x80] sm:$0xff]  ;;  %v1952_v2 = vld [vmem:[%s7709_s3 + $0x938] sm:$0xff] }
 0x1ad   :  { %3491 = vmatpush1.bf16.xpose.msra.mxu0 %v3490_v14  ;;  %2449 = vmatmul.mubr.f32.gmra.mrb[4].mxu1 %v1576_v1  ;;  %v1426_v14 = vadd.f32 %v6793_v60, %v1219_v42  ;;  %v1817_v1 = vld [vmem:[%s7709_s3 + $0x500] sm:$0xff]  ;;  %v1868_v42 = vld [vmem:[%s7709_s3 + $0x698] sm:$0xff] }
 0x1ae   :  { %3493 = vmatprep.subr.bf16.mxu0 %v3492_v6  ;;  %3323 = vmatpush1.bf16.xpose.msra.mxu1 %v3322_v28  ;;  %v1800_v6 = vld [vmem:[%s7709_s3 + $0x478] sm:$0xff] }
 0x1af   :  { %2454 = vmatprep.mubr.f32.mxu1 %v1594_v49  ;;  %3325 = vmatprep.subr.bf16.mxu1 %v3324_v12  ;;  %v1545_v28 = vmax.f32 %v1426_v14, 0.0  ;;  %v3332_v49 = vpack.c.bf16 %v1817_v1, %v1800_v6  ;;  %v2061_v12 = vld [vmem:[%s7709_s3 + $0xca0] sm:$0xff]  ;;  %v6942_v14 = vld [vmem:[%s7709_s3 + $0x830] sm:$0xff]  ;;  %v3852_v1 = vld [vmem:[%s7710_s0 + $0x178] sm:$0xff] }
 0x1b0   :  { %v3504_v58 = vpack.c.bf16 %v2061_v12, %v2044_v53  ;;  %v3853_v53 = vld [vmem:[%s7710_s0 + $0x170] sm:$0xff] }
 0x1b1   :  { %2455 = vmatmul.mubr.f32.gmra.mrb[6].mxu1 %v1593_v0  ;;  %v1851_v0 = vld [vmem:[%s7709_s3 + $0x610] sm:$0xff]  ;;  %v1258_v12 = vmul.f32 %v3853_v53, %v5907_v4 }
 0x1b2   :  { %2460 = vmatprep.mubr.f32.mxu1 %v1611_v13  ;;  %v3336_v13 = vpack.c.bf16 %v1851_v0, %v1834_v16  ;;  %v3346_v16 = vpack.c.bf16 %v6952_v21, %v6947_v56  ;;  %v3861_v56 = vld [vmem:[%s7710_s0 + $0x390] sm:$0x1] }
 0x1b3   :  { %v1326_v21 = vmul.f32 %v3861_v56, %v5907_v4 }
 0x1b5   :  { %3495 = vmatpush1.bf16.xpose.msra.mxu0 %v3494_v51  ;;  %2461 = vmatmul.mubr.f32.gmra.mrb[8].mxu1 %v1610_v3  ;;  %v6868_v51 = vld [vmem:[%s7709_s3 + $0x70] sm:$0xff]  ;;  %v6891_v3 = vld [vmem:[%s7709_s3 + $0x180] sm:$0xff] }
 0x1b6   :  { %3497 = vmatprep.subr.bf16.mxu0 %v3496_v40  ;;  %3327 = vmatpush1.bf16.xpose.msra.mxu1 %v3326_v20  ;;  %v6873_v40 = vld [vmem:[%s7709_s3 + $0xf8] sm:$0xff]  ;;  %v6886_v20 = vld [vmem:[%s7709_s3 + $0x210] sm:$0xff]  ;;  %v3514_v48 = vpack.c.bf16 %v6896_v29, %v6891_v3 }
 0x1b7   :  { %2466 = vmatprep.mubr.f32.mxu1 %v1628_v37  ;;  %3329 = vmatprep.subr.bf16.mxu1 %v3328_v9  ;;  %v3506_v37 = vpack.c.bf16 %v2060_v43, %v2043_v23  ;;  %v1885_v9 = vld [vmem:[%s7709_s3 + $0x720] sm:$0xff]  ;;  %v346_v23 = vsel %vm345_vm1, %v6991_v10, 0.0 }
 0x1b9   :  { %2467 = vmatmul.mubr.f32.gmra.mrb[10].mxu1 %v1627_v45  ;;  %v3508_v45 = vpack.c.bf16 %v1689_v5, %v1672_v59  ;;  %v382_v59 = vmul.f32 %v6991_v10, %v6991_v10 }
 0x1ba   :  { %2472 = vmatprep.mubr.f32.mxu1 %v1645_v26  ;;  %v3338_v26 = vpack.c.bf16 %v1850_v35, %v1833_v63 }
 0x1bd   :  { %3499 = vmatpush1.bf16.xpose.msra.mxu0 %v3498_v34  ;;  %2473 = vmatmul.mubr.f32.gmra.mrb[12].mxu1 %v1644_v32  ;;  %v3851_v34 = vld [vmem:[%s7710_s0 + $0xe8] sm:$0xff]  ;;  %v1550_v32 = vmax.f32 %v6876_v47, 0.0  ;;  %v3855_v47 = vld [vmem:[%s7710_s0 + $0x1f8] sm:$0xff] }
 0x1be   :  { %3501 = vmatprep.subr.bf16.mxu0 %v3500_v22  ;;  %3331 = vmatpush1.bf16.xpose.msra.mxu1 %v3330_v41  ;;  %v1241_v6 = vmul.f32 %v3851_v34, %v5907_v4  ;;  %v1259_v22 = vmul.f32 %v3852_v1, %v5910_v17  ;;  %v3510_v41 = vpack.c.bf16 %v6873_v40, %v6868_v51  ;;  %v1568_v51 = vmax.f32 %v1449_v30, 0.0  ;;  %v3856_v1 = vld [vmem:[%s7710_s0 + $0x288] sm:$0xff] }
 0x1bf   :  { %2543 = vmatprep.mubr.f32.mxu1 %v1545_v28  ;;  %3333 = vmatprep.subr.bf16.mxu1 %v3332_v49  ;;  %v3340_v28 = vpack.c.bf16 %v1885_v9, %v1868_v42  ;;  %v3512_v49 = vpack.c.bf16 %v6886_v20, %v6881_v11  ;;  %v7007_v40 = vadd.f32 %v6851_v24, %v1258_v12  ;;  %v7016_v20 = vld [vmem:[%s7710_s0 + $0x190] sm:$0xff]  ;;  %v693_v42 = vsel %vm345_vm1, %v382_v59, 0.0 }
 0x1c0   :  { %v1448_v0 = vadd.f32 %v6851_v24, %v1241_v6  ;;  %v1275_v11 = vmul.f32 %v3855_v47, %v5907_v4  ;;  %v349_v35 = vsel %vm345_vm1, %v7016_v20, 0.0 }
 0x1c1   :  { %v1584_v6 = vmax.f32 %v7007_v40, 0.0 }
 0x1c2   :  { %v1567_v44 = vmax.f32 %v1448_v0, 0.0  ;;  %v1482_v53 = vadd.f32 %v6851_v24, %v1275_v11 }
 0x1c5   :  { %3503 = vmatpush1.bf16.xpose.msra.mxu0 %v3502_v15  ;;  %v3344_v15 = vpack.c.bf16 %v6942_v14, %v6937_v27 }
 0x1c6   :  { %3505 = vmatprep.subr.bf16.mxu0 %v3504_v58  ;;  %3335 = vmatpush1.bf16.xpose.msra.mxu1 %v3334_v31  ;;  %v1466_v58 = vadd.f32 %v6571_v38, %v1259_v22  ;;  %v3854_v31 = vld [vmem:[%s7710_s0 + $0x200] sm:$0xff]  ;;  %v1293_v22 = vmul.f32 %v3856_v1, %v5910_v17 }
 0x1c7   :  { %3337 = vmatprep.subr.bf16.mxu1 %v3336_v13  ;;  %v1276_v46 = vmul.f32 %v3854_v31, %v5910_v17  ;;  %v6996_v13 = vld [vmem:[%s7710_s0 + $0x108] sm:$0xff]  ;;  %v1953_v31 = vld [vmem:[%s7709_s3 + $0x940] sm:$0xff] }
 0x1c8   :  { %v347_v43 = vsel %vm345_vm1, %v6996_v13, 0.0  ;;  %v399_v5 = vmul.f32 %v6996_v13, %v6996_v13  ;;  %v1585_v27 = vmax.f32 %v1466_v58, 0.0  ;;  %v1936_v58 = vld [vmem:[%s7709_s3 + $0x8b8] sm:$0xff] }
 0x1c9   :  { %v348_v63 = vadd.f32 %v347_v43, %v346_v23  ;;  %v1483_v50 = vadd.f32 %v6571_v38, %v1276_v46  ;;  %v3857_v46 = vld [vmem:[%s7710_s0 + $0x280] sm:$0xff]  ;;  %v7064_v43 = vld [vmem:[%s7710_s0 + $0x328] sm:$0xff] }
 0x1ca   :  { %v694_v9 = vsel %vm345_vm1, %v399_v5, 0.0  ;;  %v1292_v23 = vmul.f32 %v3857_v46, %v5907_v4  ;;  %v3858_v5 = vld [vmem:[%s7710_s0 + $0x310] sm:$0xff]  ;;  %v355_v40 = vsel %vm345_vm1, %v7064_v43, 0.0  ;;  %v467_v47 = vmul.f32 %v7064_v43, %v7064_v43 }
 0x1cb   :  { %v350_v33 = vadd.f32 %v349_v35, %v348_v63  ;;  %v695_v8 = vadd.f32 %v694_v9, %v693_v42  ;;  %v1500_v63 = vadd.f32 %v6571_v38, %v1293_v22  ;;  %v3348_v42 = vpack.c.bf16 %v1953_v31, %v1936_v58  ;;  %v3859_v22 = vld [vmem:[%s7710_s0 + $0x308] sm:$0xff] }
 0x1cc   :  { %v1774_v31 = vld [vmem:[%s7709_s3 + $0x3a8] sm:$0xff] }
 0x1cd   :  { %3507 = vmatpush1.bf16.xpose.msra.mxu0 %v3506_v37  ;;  %v416_v37 = vmul.f32 %v7016_v20, %v7016_v20 }
 0x1ce   :  { %3509 = vmatprep.subr.bf16.mxu0 %v3508_v45  ;;  %3339 = vmatpush1.bf16.xpose.msra.mxu1 %v3338_v26  ;;  %v7028_v45 = vld [vmem:[%s7710_s0 + $0x218] sm:$0xff] }
 0x1cf   :  { %3341 = vmatprep.subr.bf16.mxu1 %v3340_v28  ;;  %v351_v26 = vsel %vm345_vm1, %v7028_v45, 0.0  ;;  %v433_v14 = vmul.f32 %v7028_v45, %v7028_v45  ;;  %v696_v34 = vsel %vm345_vm1, %v416_v37, 0.0 }
 0x1d0   :  { %v352_v28 = vadd.f32 %v351_v26, %v350_v33  ;;  %v697_v30 = vadd.f32 %v696_v34, %v695_v8  ;;  %v1601_v33 = vmax.f32 %v1482_v53, 0.0  ;;  %v1499_v8 = vadd.f32 %v6851_v24, %v1292_v23  ;;  %v1756_v34 = vld [vmem:[%s7709_s3 + $0x318] sm:$0xff]  ;;  %v1987_v23 = vld [vmem:[%s7709_s3 + $0xa50] sm:$0xff] }
 0x1d1   :  { %v698_v0 = vsel %vm345_vm1, %v433_v14, 0.0  ;;  %v1739_v14 = vld [vmem:[%s7709_s3 + $0x290] sm:$0xff] }
 0x1d2   :  { %v699_v59 = vadd.f32 %v698_v0, %v697_v30  ;;  %v3860_v30 = vld [vmem:[%s7710_s0 + $0x398] sm:$0x1]  ;;  %v3518_v58 = vpack.c.bf16 %v1756_v34, %v1739_v14  ;;  %v1618_v3 = vmax.f32 %v1499_v8, 0.0  ;;  %v1825_v8 = vld [vmem:[%s7709_s3 + $0x540] sm:$0xff]  ;;  %v1986_v34 = vld [vmem:[%s7709_s3 + $0xa48] sm:$0xff] }
 0x1d3   :  { %v1327_v53 = vmul.f32 %v3860_v30, %v5910_v17  ;;  %v1969_v14 = vld [vmem:[%s7709_s3 + $0x9c0] sm:$0xff] }
 0x1d4   :  { %2865 = vmatmul.mubr.f32.vlgmr.msra.gmra.mrb[0].mxu0 %v1550_v32  ;;  %v7043_v32 = vld [vmem:[%s7710_s0 + $0x2a0] sm:$0xff] }
 0x1d5   :  { %3511 = vmatpush1.bf16.xpose.msra.mxu0 %v3510_v41  ;;  %2870 = vmatprep.mubr.f32.mxu0 %v1568_v51  ;;  %v353_v41 = vsel %vm345_vm1, %v7043_v32, 0.0  ;;  %v450_v12 = vmul.f32 %v7043_v32, %v7043_v32  ;;  %v1310_v51 = vmul.f32 %v3858_v5, %v5910_v17  ;;  %v1791_v17 = vld [vmem:[%s7709_s3 + $0x430] sm:$0xff]  ;;  %v1534_v46 = vadd.f32 %v6571_v38, %v1327_v53  ;;  %v2021_v30 = vld [vmem:[%s7709_s3 + $0xb60] sm:$0xff] }
 0x1d6   :  { %3513 = vmatprep.subr.bf16.mxu0 %v3512_v49  ;;  %3343 = vmatpush1.bf16.xpose.msra.mxu1 %v3342_v52  ;;  %v1602_v49 = vmax.f32 %v1483_v50, 0.0  ;;  %v354_v52 = vadd.f32 %v353_v41, %v352_v28  ;;  %v702_v50 = vsel %vm345_vm1, %v467_v47, 0.0  ;;  %v1309_v28 = vmul.f32 %v3859_v22, %v5907_v4 }
 0x1d7   :  { %3345 = vmatprep.subr.bf16.mxu1 %v3344_v15  ;;  %v700_v11 = vsel %vm345_vm1, %v450_v12, 0.0  ;;  %v7079_v15 = vld [vmem:[%s7710_s0 + $0x3b0] sm:$0x1]  ;;  %v1517_v1 = vadd.f32 %v6571_v38, %v1310_v51  ;;  %v3520_v51 = vpack.c.bf16 %v1791_v17, %v1774_v31 }
 0x1d8   :  { %2871 = vmatmul.mubr.f32.gmra.mrb[2].mxu0 %v1567_v44  ;;  %v356_v35 = vadd.f32 %v355_v40, %v354_v52  ;;  %v701_v37 = vadd.f32 %v700_v11, %v699_v59  ;;  %v358_v9 = vsel %vm357_vm2, %v7079_v15, 0.0  ;;  %v484_v44 = vmul.f32 %v7079_v15, %v7079_v15  ;;  %v3862_v52 = vld [vmem:[%s7710_s0 + $0x78] sm:$0xff] }
 0x1d9   :  { %2876 = vmatprep.mubr.f32.mxu0 %v1585_v27  ;;  %v1227_v38 = vmul.f32 %v3862_v52, %v5916_v61  ;;  %v7142_v59 = vrot.slane %v5970_v57, %v8071_v62  ;;  %v3350_v40 = vpack.c.bf16 %v1952_v2, %v1935_v36  ;;  %v1773_v62 = vld [vmem:[%s7709_s3 + $0x3a0] sm:$0xff]  ;;  %v1842_v36 = vld [vmem:[%s7709_s3 + $0x5c8] sm:$0xff]  ;;  %v1859_v2 = vld [vmem:[%s7709_s3 + $0x650] sm:$0xff] }
 0x1da   :  { %v359_v27 = vadd.f32 %v358_v9, %v356_v35  ;;  %v703_v26 = vadd.f32 %v702_v50, %v701_v37  ;;  %v704_v41 = vsel %vm357_vm2, %v484_v44, 0.0  ;;  %v1533_v37 = vadd.f32 %v6851_v24, %v1326_v21  ;;  %v2038_v21 = vld [vmem:[%s7709_s3 + $0xbe8] sm:$0xff] }
 0x1db   :  { %v1434_v9 = vadd.f32 %v7142_v59, %v1227_v38  ;;  %v3528_v52 = vpack.c.bf16 %v1859_v2, %v1842_v36  ;;  %v3867_v2 = vld [vmem:[%s7710_s0 + $0x140] sm:$0xff] }
 0x1dc   :  { %2877 = vmatmul.mubr.f32.gmra.mrb[4].mxu0 %v1584_v6  ;;  %v1619_v6 = vmax.f32 %v1500_v63, 0.0  ;;  %v360_v12 = vrot.slane %v359_v27, 4  ;;  %v705_v0 = vadd.f32 %v704_v41, %v703_v26 }
 0x1dd   :  { %3515 = vmatpush1.bf16.xpose.msra.mxu0 %v3514_v48  ;;  %2882 = vmatprep.mubr.f32.mxu0 %v1602_v49  ;;  %v1516_v49 = vadd.f32 %v6851_v24, %v1309_v28  ;;  %v1808_v24 = vld [vmem:[%s7709_s3 + $0x4b8] sm:$0xff]  ;;  %v1553_v53 = vmax.f32 %v1434_v9, 0.0  ;;  %v8076_v9 = vld [vmem:[#allocation39_spill] sm:$0xff] }
 0x1de   :  { %3517 = vmatprep.subr.bf16.mxu0 %v3516_v7  ;;  %3347 = vmatpush1.bf16.xpose.msra.mxu1 %v3346_v16  ;;  %v361_v29 = vadd.f32 %v360_v12, %v359_v27  ;;  %v706_v48 = vrot.slane %v705_v0, 4  ;;  %v1636_v7 = vmax.f32 %v1517_v1, 0.0  ;;  %v1970_v16 = vld [vmem:[%s7709_s3 + $0x9c8] sm:$0xff]  ;;  %v1652_v1 = vmax.f32 %v1533_v37, 0.0  ;;  %v2004_v28 = vld [vmem:[%s7709_s3 + $0xad8] sm:$0xff] }
 0x1df   :  { %3349 = vmatprep.subr.bf16.mxu1 %v3348_v42  ;;  %v3352_v63 = vpack.c.bf16 %v1987_v23, %v1970_v16  ;;  %v1635_v35 = vmax.f32 %v1516_v49, 0.0  ;;  %v1653_v42 = vmax.f32 %v1534_v46, 0.0  ;;  %v3524_v12 = vpack.c.bf16 %v1825_v8, %v1808_v24  ;;  %v2003_v49 = vld [vmem:[%s7709_s3 + $0xad0] sm:$0xff]  ;;  %v2020_v46 = vld [vmem:[%s7709_s3 + $0xb58] sm:$0xff] }
 0x1e0   :  { %2883 = vmatmul.mubr.f32.gmra.mrb[6].mxu0 %v1601_v33  ;;  %v362_v4 = vrot.slane %v361_v29, 2  ;;  %v707_v5 = vadd.f32 %v706_v48, %v705_v0  ;;  %v1790_v33 = vld [vmem:[%s7709_s3 + $0x428] sm:$0xff]  ;;  %v3354_v0 = vpack.c.bf16 %v1986_v34, %v1969_v14  ;;  %v3356_v17 = vpack.c.bf16 %v2021_v30, %v2004_v28  ;;  %v1824_v48 = vld [vmem:[%s7709_s3 + $0x538] sm:$0xff]  ;;  %v2055_v16 = vld [vmem:[%s7709_s3 + $0xc70] sm:$0xff] }
 0x1e1   :  { %2888 = vmatprep.mubr.f32.mxu0 %v1619_v6  ;;  %v3522_v22 = vpack.c.bf16 %v1790_v33, %v1773_v62  ;;  %v3358_v38 = vpack.c.bf16 %v2020_v46, %v2003_v49  ;;  %v3864_v33 = vld [vmem:[%s7710_s0 + $0xc0] sm:$0xff]  ;;  %v1927_v14 = vld [vmem:[%s7709_s3 + $0x870] sm:$0xff] }
 0x1e2   :  { %v363_v47 = vadd.f32 %v362_v4, %v361_v29  ;;  %v708_v11 = vrot.slane %v707_v5, 2  ;;  %v1807_v29 = vld [vmem:[%s7709_s3 + $0x4b0] sm:$0xff]  ;;  %v3360_v4 = vpack.c.bf16 %v2055_v16, %v2038_v21  ;;  %v1236_v24 = vmul.f32 %v3864_v33, %v8075_v25 }
 0x1e3   :  { %v3526_v56 = vpack.c.bf16 %v1824_v48, %v1807_v29  ;;  %v833_v29 = vld [vmem:[%s7711_s1 + $0x10] sm:$0x1] }
 0x1e4   :  { %2889 = vmatmul.mubr.f32.gmra.mrb[8].mxu0 %v1618_v3  ;;  %v364_v44 = vrot.slane %v363_v47, 1  ;;  %v709_v50 = vadd.f32 %v708_v11, %v707_v5  ;;  %v1841_v5 = vld [vmem:[%s7709_s3 + $0x5c0] sm:$0xff]  ;;  %v1443_v30 = vadd.f32 %v6793_v60, %v1236_v24  ;;  %v3868_v16 = vld [vmem:[%s7710_s0 + $0x1d0] sm:$0xff]  ;;  %v1724_v24 = vld [vmem:[%s7709_s3 + $0x218] sm:$0xff] }
 0x1e5   :  { %3519 = vmatpush1.bf16.xpose.msra.mxu0 %v3518_v58  ;;  %2894 = vmatprep.mubr.f32.mxu0 %v1636_v7  ;;  %v2037_v11 = vld [vmem:[%s7709_s3 + $0xbe0] sm:$0xff] }
 0x1e6   :  { %3521 = vmatprep.subr.bf16.mxu0 %v3520_v51  ;;  %3351 = vmatpush1.bf16.xpose.msra.mxu1 %v3350_v40  ;;  %v365_v27 = vadd.f32 %v364_v44, %v363_v47  ;;  %v710_v26 = vrot.slane %v709_v50, 1  ;;  %v1858_v51 = vld [vmem:[%s7709_s3 + $0x648] sm:$0xff]  ;;  %v1876_v40 = vld [vmem:[%s7709_s3 + $0x6d8] sm:$0xff]  ;;  %v1893_v47 = vld [vmem:[%s7709_s3 + $0x760] sm:$0xff] }
 0x1e7   :  { %3353 = vmatprep.subr.bf16.mxu1 %v3352_v63  ;;  %v2054_v63 = vld [vmem:[%s7709_s3 + $0xc68] sm:$0xff]  ;;  %v3532_v37 = vpack.c.bf16 %v1893_v47, %v1876_v40  ;;  %v1961_v40 = vld [vmem:[%s7709_s3 + $0x980] sm:$0xff] }
 0x1e8   :  { %2895 = vmatmul.mubr.f32.gmra.mrb[10].mxu0 %v1635_v35  ;;  %v711_v41 = vadd.f32 %v710_v26, %v709_v50  ;;  %v7170_v6 = vmul.f32 0.020408163, %v365_v27  ;;  %v3530_v35 = vpack.c.bf16 %v1858_v51, %v1841_v5  ;;  %v7222_v50 = vrot.slane %v8060_v19, %v8070_v55  ;;  %v1875_v27 = vld [vmem:[%s7709_s3 + $0x6d0] sm:$0xff]  ;;  %v1892_v26 = vld [vmem:[%s7709_s3 + $0x758] sm:$0xff]  ;;  %v1910_v19 = vld [vmem:[%s7709_s3 + $0x7e8] sm:$0xff] }
 0x1e9   :  { %2900 = vmatprep.mubr.f32.mxu0 %v1653_v42  ;;  %v3863_v42 = vld [vmem:[%s7710_s0 + $0x30] sm:$0xff]  ;;  %v3362_v62 = vpack.c.bf16 %v2054_v63, %v2037_v11  ;;  %v1926_v5 = vld [vmem:[%s7709_s3 + $0x868] sm:$0xff]  ;;  %v1944_v51 = vld [vmem:[%s7709_s3 + $0x8f8] sm:$0xff] }
 0x1ea   :  { %v745_v58 = vmul.f32 0.020408163, %v711_v41  ;;  %v762_v31 = vmul.f32 %v7170_v6, %v7170_v6  ;;  %v1218_v44 = vmul.f32 %v3863_v42, %v8076_v9  ;;  %v3869_v63 = vld [vmem:[%s7710_s0 + $0x1c8] sm:$0xff] }
 0x1ec   :  { %2901 = vmatmul.mubr.f32.gmra.mrb[12].mxu0 %v1652_v1  ;;  %v779_v3 = vsub.f32 %v745_v58, %v762_v31  ;;  %v1425_v34 = vadd.f32 %v7222_v50, %v1218_v44  ;;  %v3865_v1 = vld [vmem:[%s7710_s0 + $0xb8] sm:$0xff]  ;;  %v1690_v58 = vld [vmem:[%s7709_s3 + $0x108] sm:$0xff] }
 0x1ed   :  { %3523 = vmatpush1.bf16.xpose.msra.mxu0 %v3522_v22  ;;  %2971 = vmatprep.mubr.f32.mxu0 %v1553_v53  ;;  %v1235_v22 = vmul.f32 %v3865_v1, %v8076_v9  ;;  %v3866_v53 = vld [vmem:[%s7710_s0 + $0x148] sm:$0xff]  ;;  %v3871_v1 = vld [vmem:[%s7710_s0 + $0x250] sm:$0xff] }
 0x1ee   :  { %3525 = vmatprep.subr.bf16.mxu0 %v3524_v12  ;;  %3355 = vmatpush1.bf16.xpose.msra.mxu1 %v3354_v0  ;;  %v796_v7 = vmax.f32 %v779_v3, 0.0  ;;  %v1253_v41 = vmul.f32 %v3866_v53, %v8075_v25  ;;  %v3890_v12 = vmov 0.0|0.0   ;;  %v1673_v0 = vld [vmem:[%s7709_s3 + $0x80] sm:$0xff]  ;;  %v3536_v3 = vpack.c.bf16 %v1927_v14, %v1910_v19 }
 0x1ef   :  { %3357 = vmatprep.subr.bf16.mxu1 %v3356_v17  ;;  %v3534_v17 = vpack.c.bf16 %v1892_v26, %v1875_v27  ;;  %v1544_v48 = vmax.f32 %v1425_v34, 0.0  ;;  %v1442_v36 = vadd.f32 %v7222_v50, %v1235_v22  ;;  %v7267_v46 = vpack.c.bf16 %v1690_v58, %v1673_v0  ;;  %v971_v27 = vld [vmem:[%s7712_s2 + $0x10] sm:$0x1]  ;;  %v3872_v0 = vld [vmem:[%s7710_s0 + $0x2e0] sm:$0xff] }
 0x1f0   :  { %v813_v23 = vadd.f32 1e-05, %v796_v7  ;;  %v1252_v7 = vmul.f32 %v3867_v2, %v8076_v9  ;;  %v1460_v21 = vadd.f32 %v6793_v60, %v1253_v41  ;;  %v3540_v19 = vpack.c.bf16 %v1961_v40, %v1944_v51 }
 0x1f1   :  { %v1561_v47 = vmax.f32 %v1442_v36, 0.0  ;;  %v1286_v22 = vmul.f32 %v3871_v1, %v8076_v9  ;;  %v1304_v58 = vmul.f32 %v3872_v0, %v8075_v25  ;;  %v3873_v36 = vld [vmem:[%s7710_s0 + $0x2d8] sm:$0xff]  ;;  %v1809_v0 = vld [vmem:[%s7709_s3 + $0x4c0] sm:$0xff] }
 0x1f2   :  { %3775 = vrsqrt.f32 %v813_v23  ;;  %v1270_v23 = vmul.f32 %v3868_v16, %v8075_v25  ;;  %v1459_v11 = vadd.f32 %v7222_v50, %v1252_v7  ;;  %v1579_v42 = vmax.f32 %v1460_v21, 0.0  ;;  %v1978_v7 = vld [vmem:[%s7709_s3 + $0xa08] sm:$0xff] }
 0x1f3   :  { %v1303_v2 = vmul.f32 %v3873_v36, %v8076_v9  ;;  %v1511_v21 = vadd.f32 %v6793_v60, %v1304_v58  ;;  %v1826_v58 = vld [vmem:[%s7709_s3 + $0x548] sm:$0xff] }
 0x1f4   :  { %v1477_v44 = vadd.f32 %v6793_v60, %v1270_v23  ;;  %v1578_v14 = vmax.f32 %v1459_v11, 0.0  ;;  %v1741_v23 = vld [vmem:[%s7709_s3 + $0x2a0] sm:$0xff] }
 0x1f5   :  { %3527 = vmatpush1.bf16.xpose.msra.mxu0 %v3526_v56  ;;  %v1562_v56 = vmax.f32 %v1443_v30, 0.0  ;;  %v1510_v11 = vadd.f32 %v7222_v50, %v1303_v2  ;;  %v7452_v2 = vrot.slane %v5970_v57, %v8070_v55  ;;  %v3878_v57 = vld [vmem:[%s7710_s0 + $0xf8] sm:$0xff] }
 0x1f6   :  { %3529 = vmatprep.subr.bf16.mxu0 %v3528_v52  ;;  %3359 = vmatpush1.bf16.xpose.msra.mxu1 %v3358_v38  ;;  %v1596_v53 = vmax.f32 %v1477_v44, 0.0  ;;  %v1977_v44 = vld [vmem:[%s7709_s3 + $0xa00] sm:$0xff] }
 0x1f7   :  { %3361 = vmatprep.subr.bf16.mxu1 %v3360_v4  ;;  %v1909_v4 = vld [vmem:[%s7709_s3 + $0x7e0] sm:$0xff] }
 0x1f8   :  { %v3538_v26 = vpack.c.bf16 %v1926_v5, %v1909_v4  ;;  %v1758_v4 = vld [vmem:[%s7709_s3 + $0x328] sm:$0xff] }
 0x1fc   :  { %v3776_v8 = vpop.eup %3775 }
 0x1fd   :  { %3531 = vmatpush1.bf16.xpose.msra.mxu0 %v3530_v35  ;;  %v955_v28 = vrot.slane %v3776_v8, %v8062_v18  ;;  %v1269_v35 = vmul.f32 %v3869_v63, %v8076_v9 }
 0x1fe   :  { %3533 = vmatprep.subr.bf16.mxu0 %v3532_v37  ;;  %3363 = vmatpush1.bf16.xpose.msra.mxu1 %v3362_v62  ;;  %v3870_v62 = vld [vmem:[%s7710_s0 + $0x258] sm:$0xff] }
 0x1ff   :  { %3604 = vmatprep.subr.bf16.mxu1 %v3890_v12  ;;  %v962_v31 = vrot.slane %v955_v28, %v8062_v18  ;;  %v1287_v33 = vmul.f32 %v3870_v62, %v8075_v25  ;;  %v1476_v34 = vadd.f32 %v7222_v50, %v1269_v35  ;;  %v7379_v35 = vpack.c.bf16 %v1758_v4, %v1741_v23  ;;  %v1994_v62 = vld [vmem:[%s7709_s3 + $0xa88] sm:$0xff] }
 0x200   :  { %v1243_v23 = vmul.f32 %v3878_v57, %v5913_v54 }
 0x201   :  { %v968_v49 = vmul.f32 %v962_v31, %v833_v29  ;;  %v1494_v41 = vadd.f32 %v6793_v60, %v1287_v33  ;;  %v1595_v29 = vmax.f32 %v1476_v34, 0.0  ;;  %v1629_v33 = vmax.f32 %v1510_v11, 0.0 }
 0x202   :  { %v1450_v11 = vadd.f32 %v7452_v2, %v1243_v23  ;;  %v3888_v23 = vld [vmem:[%s7710_s0 + $0x3a0] sm:$0x1] }
 0x203   :  { %v7281_v38 = vrot.slane %v968_v49, %v8059_v39  ;;  %v1995_v49 = vld [vmem:[%s7709_s3 + $0xa90] sm:$0xff] }
 0x204   :  { %v3544_v40 = vpack.c.bf16 %v1995_v49, %v1978_v7  ;;  %v1843_v7 = vld [vmem:[%s7709_s3 + $0x5d0] sm:$0xff]  ;;  %v1860_v49 = vld [vmem:[%s7709_s3 + $0x658] sm:$0xff] }
 0x205   :  { %3535 = vmatpush1.bf16.xpose.msra.mxu0 %v3534_v17  ;;  %2544 = vmatmul.mubr.f32.vlgmr.msra.gmra.mrb[0].mxu1 %v1544_v48  ;;  %v1076_v37 = vmul.f32 %v7281_v38, %v7170_v6  ;;  %v1707_v6 = vld [vmem:[%s7709_s3 + $0x190] sm:$0xff]  ;;  %v1228_v17 = vmul.f32 %v7281_v38, %v6991_v10  ;;  %v1493_v48 = vadd.f32 %v7222_v50, %v1286_v22 }
 0x206   :  { %3537 = vmatprep.subr.bf16.mxu0 %v3536_v3  ;;  %3616 = vmatpush1.bf16.xpose.msk.msra.mxu1 %vm7276_vm3, %v7267_v46  ;;  %v7327_v30 = vpack.c.bf16 %v1724_v24, %v1707_v6  ;;  %v1960_v3 = vld [vmem:[%s7709_s3 + $0x978] sm:$0xff]  ;;  %v2011_v22 = vld [vmem:[%s7709_s3 + $0xb10] sm:$0xff] }
 0x207   :  { %2549 = vmatprep.mubr.f32.mxu1 %v1562_v56  ;;  %3605 = vmatprep.subr.bf16.mxu1 %v3890_v12  ;;  %v1198_v8 = vrot.slane %v1076_v37, %v8062_v18  ;;  %v1613_v56 = vmax.f32 %v1494_v41, 0.0  ;;  %v1630_v37 = vmax.f32 %v1511_v21, 0.0  ;;  %v2012_v6 = vld [vmem:[%s7709_s3 + $0xb18] sm:$0xff]  ;;  %v3891_v41 = vmov 0.0   ;;  %v3877_v21 = vld [vmem:[%s7710_s0 + $0x100] sm:$0xff] }
 0x209   :  { %2550 = vmatmul.mubr.f32.gmra.mrb[2].mxu1 %v1561_v47  ;;  %v1205_v28 = vrot.slane %v1198_v8, %v8062_v18  ;;  %v1943_v18 = vld [vmem:[%s7709_s3 + $0x8f0] sm:$0xff]  ;;  %v1612_v47 = vmax.f32 %v1493_v48, 0.0  ;;  %v1792_v8 = vld [vmem:[%s7709_s3 + $0x438] sm:$0xff] }
 0x20a   :  { %2555 = vmatprep.mubr.f32.mxu1 %v1579_v42  ;;  %v3542_v51 = vpack.c.bf16 %v1960_v3, %v1943_v18  ;;  %v7435_v18 = vpack.c.bf16 %v1826_v58, %v1809_v0  ;;  %v2045_v3 = vld [vmem:[%s7709_s3 + $0xc20] sm:$0xff]  ;;  %v3876_v48 = vld [vmem:[%s7710_s0 + $0x70] sm:$0xff]  ;;  %v1928_v0 = vld [vmem:[%s7709_s3 + $0x878] sm:$0xff] }
 0x20b   :  { %v1211_v31 = vsub.f32 %v971_v27, %v1205_v28  ;;  %v3546_v27 = vpack.c.bf16 %v1994_v62, %v1977_v44  ;;  %v2028_v28 = vld [vmem:[%s7709_s3 + $0xb98] sm:$0xff]  ;;  %v1226_v36 = vmul.f32 %v3876_v48, %v5913_v54 }
 0x20d   :  { %3539 = vmatpush1.bf16.xpose.msra.mxu0 %v3538_v26  ;;  %2556 = vmatmul.mubr.f32.gmra.mrb[4].mxu1 %v1578_v14  ;;  %v7348_v10 = vrot.slane %v1211_v31, %v8059_v39  ;;  %v3874_v39 = vld [vmem:[%s7710_s0 + $0x368] sm:$0x1]  ;;  %v1279_v14 = vmul.f32 %v7281_v38, %v7028_v45  ;;  %v3550_v31 = vpack.c.bf16 %v2028_v28, %v2011_v22  ;;  %v3884_v28 = vld [vmem:[%s7710_s0 + $0x290] sm:$0xff] }
 0x20e   :  { %3541 = vmatprep.subr.bf16.mxu0 %v3540_v19  ;;  %3617 = vmatpush1.bf16.xpose.msk.msra.mxu1 %vm7276_vm3, %v7327_v30  ;;  %v1321_v16 = vmul.f32 %v3874_v39, %v8075_v25  ;;  %v3875_v25 = vld [vmem:[%s7710_s0 + $0x360] sm:$0x1]  ;;  %v2046_v45 = vld [vmem:[%s7709_s3 + $0xc28] sm:$0xff]  ;;  %v1244_v39 = vmul.f32 %v3877_v21, %v5916_v61  ;;  %v1433_v55 = vadd.f32 %v7452_v2, %v1226_v36 }
 0x20f   :  { %2561 = vmatprep.mubr.f32.mxu1 %v1596_v53  ;;  %3606 = vmatprep.subr.bf16.mxu1 %v3890_v12  ;;  %v7372_v5 = vadd.f32 %v7348_v10, %v1228_v17  ;;  %v1320_v63 = vmul.f32 %v3875_v25, %v8076_v9  ;;  %v7410_v1 = vadd.f32 %v7348_v10, %v1279_v14  ;;  %v2063_v53 = vld [vmem:[%s7709_s3 + $0xcb0] sm:$0xff]  ;;  %v3880_v25 = vld [vmem:[%s7710_s0 + $0x180] sm:$0xff] }
 0x210   :  { %v1528_v42 = vadd.f32 %v6793_v60, %v1321_v16  ;;  %v2029_v60 = vld [vmem:[%s7709_s3 + $0xba0] sm:$0xff]  ;;  %v3552_v17 = vpack.c.bf16 %v2063_v53, %v2046_v45  ;;  %v7465_v16 = vpack.c.bf16 %v1860_v49, %v1843_v7  ;;  %v1451_v4 = vadd.f32 %v7142_v59, %v1244_v39  ;;  %v1911_v53 = vld [vmem:[%s7709_s3 + $0x7f0] sm:$0xff]  ;;  %v3886_v7 = vld [vmem:[%s7710_s0 + $0x318] sm:$0xff] }
 0x211   :  { %2562 = vmatmul.mubr.f32.gmra.mrb[6].mxu1 %v1595_v29  ;;  %v1527_v9 = vadd.f32 %v7222_v50, %v1320_v63  ;;  %v1775_v50 = vld [vmem:[%s7709_s3 + $0x3b0] sm:$0xff]  ;;  %v3548_v26 = vpack.c.bf16 %v2029_v60, %v2012_v6  ;;  %v2062_v29 = vld [vmem:[%s7709_s3 + $0xca8] sm:$0xff]  ;;  %v1260_v63 = vmul.f32 %v3880_v25, %v5913_v54  ;;  %v1569_v60 = vmax.f32 %v1450_v11, 0.0 }
 0x212   :  { %2567 = vmatprep.mubr.f32.mxu1 %v1613_v56  ;;  %v1647_v24 = vmax.f32 %v1528_v42, 0.0  ;;  %v7407_v34 = vpack.c.bf16 %v1792_v8, %v1775_v50  ;;  %v3554_v56 = vpack.c.bf16 %v2062_v29, %v2045_v3  ;;  %v1894_v42 = vld [vmem:[%s7709_s3 + $0x768] sm:$0xff]  ;;  %v1570_v44 = vmax.f32 %v1451_v4, 0.0 }
 0x213   :  { %v1646_v19 = vmax.f32 %v1527_v9, 0.0  ;;  %v3882_v50 = vld [vmem:[%s7710_s0 + $0x208] sm:$0xff]  ;;  %v1294_v45 = vmul.f32 %v3884_v28, %v5913_v54  ;;  %v7534_v29 = vpack.c.bf16 %v1928_v0, %v1911_v53  ;;  %v1311_v49 = vmul.f32 %v3886_v7, %v5913_v54 }
 0x214   :  { %v1277_v8 = vmul.f32 %v3882_v50, %v5913_v54  ;;  %v3887_v39 = vld [vmem:[%s7710_s0 + $0x3a8] sm:$0x1]  ;;  %v1328_v4 = vmul.f32 %v3888_v23, %v5913_v54 }
 0x215   :  { %3543 = vmatpush1.bf16.xpose.msra.mxu0 %v3542_v51  ;;  %2568 = vmatmul.mubr.f32.gmra.mrb[8].mxu1 %v1612_v47  ;;  %v3879_v51 = vld [vmem:[%s7710_s0 + $0x188] sm:$0xff]  ;;  %v1552_v47 = vmax.f32 %v1433_v55, 0.0  ;;  %v1501_v36 = vadd.f32 %v7452_v2, %v1294_v45  ;;  %v1329_v55 = vmul.f32 %v3887_v39, %v5916_v61 }
 0x216   :  { %3545 = vmatprep.subr.bf16.mxu0 %v3544_v40  ;;  %3618 = vmatpush1.bf16.xpose.msk.msra.mxu1 %vm7276_vm3, %v7379_v35  ;;  %v1261_v40 = vmul.f32 %v3879_v51, %v5916_v61  ;;  %v1962_v51 = vld [vmem:[%s7709_s3 + $0x988] sm:$0xff] }
 0x217   :  { %2573 = vmatprep.mubr.f32.mxu1 %v1630_v37  ;;  %3607 = vmatprep.subr.bf16.mxu1 %v3890_v12  ;;  %v1877_v37 = vld [vmem:[%s7709_s3 + $0x6e0] sm:$0xff]  ;;  %v1620_v57 = vmax.f32 %v1501_v36, 0.0 }
 0x218   :  { %v1468_v62 = vadd.f32 %v7142_v59, %v1261_v40  ;;  %v7498_v6 = vpack.c.bf16 %v1894_v42, %v1877_v37  ;;  %v2013_v42 = vld [vmem:[%s7709_s3 + $0xb20] sm:$0xff] }
 0x219   :  { %2574 = vmatmul.mubr.f32.gmra.mrb[10].mxu1 %v1629_v33  ;;  %v3881_v33 = vld [vmem:[%s7710_s0 + $0x210] sm:$0xff] }
 0x21a   :  { %2579 = vmatprep.mubr.f32.mxu1 %v1647_v24  ;;  %v1278_v9 = vmul.f32 %v3881_v33, %v5916_v61  ;;  %v1467_v24 = vadd.f32 %v7452_v2, %v1260_v63  ;;  %v1535_v63 = vadd.f32 %v7452_v2, %v1328_v4  ;;  %v2064_v33 = vld [vmem:[%s7709_s3 + $0xcb8] sm:$0xff] }
 0x21c   :  { %v1586_v22 = vmax.f32 %v1467_v24, 0.0  ;;  %v1654_v37 = vmax.f32 %v1535_v63, 0.0  ;;  %v1313_v24 = vmul.f32 %v7281_v38, %v7064_v43 }
 0x21d   :  { %3547 = vmatpush1.bf16.xpose.msra.mxu0 %v3546_v27  ;;  %2580 = vmatmul.mubr.f32.gmra.mrb[12].mxu1 %v1646_v19  ;;  %v1587_v27 = vmax.f32 %v1468_v62, 0.0  ;;  %v3883_v19 = vld [vmem:[%s7710_s0 + $0x298] sm:$0xff] }
 0x21e   :  { %3549 = vmatprep.subr.bf16.mxu0 %v3548_v26  ;;  %3619 = vmatpush1.bf16.xpose.msk.msra.mxu1 %vm7276_vm3, %v7407_v34  ;;  %v1485_v26 = vadd.f32 %v7142_v59, %v1278_v9  ;;  %v1295_v14 = vmul.f32 %v3883_v19, %v5916_v61  ;;  %v1296_v9 = vmul.f32 %v7281_v38, %v7043_v32 }
 0x21f   :  { %3102 = vmatprep.mubr.f32.mxu1 %v3891_v41  ;;  %3608 = vmatprep.subr.bf16.mxu1 %v3890_v12  ;;  %v1330_v32 = vmul.f32 %v7281_v38, %v7079_v15  ;;  %v1245_v15 = vmul.f32 %v7281_v38, %v6996_v13  ;;  %v1262_v19 = vmul.f32 %v7281_v38, %v7016_v20 }
 0x220   :  { %v1604_v58 = vmax.f32 %v1485_v26, 0.0 }
 0x221   :  { %v1537_v43 = vadd.f32 %v7348_v10, %v1330_v32  ;;  %v1452_v26 = vadd.f32 %v7348_v10, %v1245_v15 }
 0x225   :  { %3551 = vmatpush1.bf16.xpose.msra.mxu0 %v3550_v31  ;;  %v1502_v31 = vadd.f32 %v7142_v59, %v1295_v14  ;;  %v1571_v14 = vmax.f32 %v1452_v26, 0.0 }
 0x226   :  { %3553 = vmatprep.subr.bf16.mxu0 %v3552_v17  ;;  %3620 = vmatpush1.bf16.xpose.msk.msra.mxu1 %vm7276_vm3, %v7435_v18  ;;  %v3885_v17 = vld [vmem:[%s7710_s0 + $0x320] sm:$0xff] }
 0x227   :  { %3609 = vmatprep.subr.bf16.mxu1 %v3890_v12  ;;  %v1312_v3 = vmul.f32 %v3885_v17, %v5916_v61  ;;  %v1945_v61 = vld [vmem:[%s7709_s3 + $0x900] sm:$0xff] }
 0x228   :  { %v3589_v11 = vpack.c.bf16 %v1962_v51, %v1945_v61 }
 0x229   :  { %v1519_v21 = vadd.f32 %v7142_v59, %v1312_v3 }
 0x22b   :  { %v1638_v40 = vmax.f32 %v1519_v21, 0.0 }
 0x22d   :  { %3555 = vmatpush1.bf16.xpose.msra.mxu0 %v3554_v56  ;;  %v1621_v56 = vmax.f32 %v1502_v31, 0.0 }
 0x22e   :  { %3556 = vmatprep.subr.bf16.mxu0 %v3890_v12  ;;  %3621 = vmatpush1.bf16.xpose.msk.msra.mxu1 %vm7276_vm3, %v7465_v16 }
 0x22f   :  { %3610 = vmatprep.subr.bf16.mxu1 %v3890_v12 }
 0x234   :  { %2972 = vmatmul.mubr.f32.vlgmr.msra.gmra.mrb[0].mxu0 %v1552_v47  ;;  %v1536_v47 = vadd.f32 %v7142_v59, %v1329_v55  ;;  %v1979_v59 = vld [vmem:[%s7709_s3 + $0xa10] sm:$0xff] }
 0x235   :  { %3559 = vmatpush1.bf16.xpose.msk.msra.mxu0 %vm7276_vm3, %v7267_v46  ;;  %2977 = vmatprep.mubr.f32.mxu0 %v1570_v44  ;;  %v1484_v46 = vadd.f32 %v7452_v2, %v1277_v8  ;;  %v2030_v44 = vld [vmem:[%s7709_s3 + $0xba8] sm:$0xff]  ;;  %v1520_v8 = vadd.f32 %v7348_v10, %v1313_v24 }
 0x236   :  { %3560 = vmatprep.subr.bf16.mxu0 %v3890_v12  ;;  %3622 = vmatpush1.bf16.xpose.msk.msra.mxu1 %vm7276_vm3, %v7498_v6  ;;  %v1655_v54 = vmax.f32 %v1536_v47, 0.0  ;;  %v3597_v62 = vpack.c.bf16 %v2030_v44, %v2013_v42 }
 0x237   :  { %3611 = vmatprep.subr.bf16.mxu1 %v3890_v12  ;;  %v1603_v48 = vmax.f32 %v1484_v46, 0.0 }
 0x238   :  { %2978 = vmatmul.mubr.f32.gmra.mrb[2].mxu0 %v1569_v60 }
 0x239   :  { %2983 = vmatprep.mubr.f32.mxu0 %v1587_v27  ;;  %v1656_v27 = vmax.f32 %v1537_v43, 0.0 }
 0x23c   :  { %2984 = vmatmul.mubr.f32.gmra.mrb[4].mxu0 %v1586_v22  ;;  %v1469_v22 = vadd.f32 %v7348_v10, %v1262_v19 }
 0x23d   :  { %3563 = vmatpush1.bf16.xpose.msk.msra.mxu0 %vm7276_vm3, %v7327_v30  ;;  %2989 = vmatprep.mubr.f32.mxu0 %v1604_v58  ;;  %v1518_v30 = vadd.f32 %v7452_v2, %v1311_v49  ;;  %v1996_v2 = vld [vmem:[%s7709_s3 + $0xa98] sm:$0xff] }
 0x23e   :  { %3564 = vmatprep.subr.bf16.mxu0 %v3890_v12  ;;  %3623 = vmatpush1.bf16.xpose.msk.msra.mxu1 %vm7276_vm3, %v7534_v29  ;;  %v1588_v13 = vmax.f32 %v1469_v22, 0.0 }
 0x23f   :  { %3612 = vmatprep.subr.bf16.mxu1 %v3890_v12  ;;  %v1637_v25 = vmax.f32 %v1518_v30, 0.0 }
 0x240   :  { %2990 = vmatmul.mubr.f32.gmra.mrb[6].mxu0 %v1603_v48 }
 0x241   :  { %2995 = vmatprep.mubr.f32.mxu0 %v1621_v56 }
 0x244   :  { %2996 = vmatmul.mubr.f32.gmra.mrb[8].mxu0 %v1620_v57 }
 0x245   :  { %3567 = vmatpush1.bf16.xpose.msk.msra.mxu0 %vm7276_vm3, %v7379_v35  ;;  %3001 = vmatprep.mubr.f32.mxu0 %v1638_v40  ;;  %v3593_v35 = vpack.c.bf16 %v1996_v2, %v1979_v59 }
 0x246   :  { %3568 = vmatprep.subr.bf16.mxu0 %v3890_v12  ;;  %3624 = vmatpush1.bf16.xpose.msk.msra.mxu1 %vm7276_vm3, %v3589_v11 }
 0x247   :  { %3613 = vmatprep.subr.bf16.mxu1 %v3890_v12 }
 0x248   :  { %3002 = vmatmul.mubr.f32.gmra.mrb[10].mxu0 %v1637_v25 }
 0x249   :  { %3007 = vmatprep.mubr.f32.mxu0 %v1655_v54 }
 0x24c   :  { %3008 = vmatmul.mubr.f32.gmra.mrb[12].mxu0 %v1654_v37 }
 0x24d   :  { %3571 = vmatpush1.bf16.xpose.msk.msra.mxu0 %vm7276_vm3, %v7407_v34  ;;  %3078 = vmatprep.mubr.f32.mxu0 %v3891_v41  ;;  %v2047_v34 = vld [vmem:[%s7709_s3 + $0xc30] sm:$0xff] }
 0x24e   :  { %3572 = vmatprep.subr.bf16.mxu0 %v3890_v12  ;;  %3625 = vmatpush1.bf16.xpose.msk.msra.mxu1 %vm7276_vm3, %v3593_v35  ;;  %v3601_v60 = vpack.c.bf16 %v2064_v33, %v2047_v34 }
 0x24f   :  { %3614 = vmatprep.subr.bf16.mxu1 %v3890_v12 }
 0x255   :  { %3575 = vmatpush1.bf16.xpose.msk.msra.mxu0 %vm7276_vm3, %v7435_v18  ;;  %v1503_v18 = vadd.f32 %v7348_v10, %v1296_v9 }
 0x256   :  { %3576 = vmatprep.subr.bf16.mxu0 %v3890_v12  ;;  %3626 = vmatpush1.bf16.xpose.msk.msra.mxu1 %vm7276_vm3, %v3597_v62 }
 0x257   :  { %3615 = vmatprep.subr.bf16.mxu1 %v3890_v12  ;;  %v1622_v50 = vmax.f32 %v1503_v18, 0.0 }
 0x25d   :  { %3579 = vmatpush1.bf16.xpose.msk.msra.mxu0 %vm7276_vm3, %v7465_v16  ;;  %v1639_v16 = vmax.f32 %v1520_v8, 0.0 }
 0x25e   :  { %3580 = vmatprep.subr.bf16.mxu0 %v3890_v12  ;;  %3627 = vmatpush1.bf16.xpose.msk.msra.mxu1 %vm7276_vm3, %v3601_v60 }
 0x265   :  { %3583 = vmatpush1.bf16.xpose.msk.msra.mxu0 %vm7276_vm3, %v7498_v6  ;;  %3169 = vmatmul.mubr.msk.f32.vlgmr.msra.gmra.mrb[14].mxu1 %vm345_vm1, %v1622_v50  ;;  %v1554_v6 = vmax.f32 %v7372_v5, 0.0 }
 0x266   :  { %3584 = vmatprep.subr.bf16.mxu0 %v3890_v12  ;;  %3108 = vmatprep.mubr.f32.mxu1 %v3891_v41 }
 0x269   :  { %3170 = vmatmul.mubr.msk.f32.gmra.mrb[16].mxu1 %vm345_vm1, %v1639_v16 }
 0x26a   :  { %3114 = vmatprep.mubr.f32.mxu1 %v3891_v41 }
 0x26d   :  { %3587 = vmatpush1.bf16.xpose.msk.msra.mxu0 %vm7276_vm3, %v7534_v29  ;;  %3171 = vmatmul.mubr.msk.f32.gmra.mrb[18].mxu1 %vm345_vm1, %v1656_v27 }
 0x26e   :  { %3588 = vmatprep.subr.bf16.mxu0 %v3890_v12 }
 0x275   :  { %3591 = vmatpush1.bf16.xpose.msk.msra.mxu0 %vm7276_vm3, %v3589_v11 }
 0x276   :  { %3592 = vmatprep.subr.bf16.mxu0 %v3890_v12 }
 0x27d   :  { %3595 = vmatpush1.bf16.xpose.msk.msra.mxu0 %vm7276_vm3, %v3593_v35 }
 0x27e   :  { %3596 = vmatprep.subr.bf16.mxu0 %v3890_v12 }
 0x285   :  { %3599 = vmatpush1.bf16.xpose.msk.msra.mxu0 %vm7276_vm3, %v3597_v62 }
 0x286   :  { %3600 = vmatprep.subr.bf16.mxu0 %v3890_v12  ;;  %v1605_v12 = vmax.f32 %v7410_v1, 0.0 }
 0x28d   :  { %3603 = vmatpush1.bf16.xpose.msk.msra.mxu0 %vm7276_vm3, %v3601_v60 }
 0x294   :  { %3165 = vmatmul.mubr.msk.f32.vlgmr.msra.gmra.mrb[0].mxu0 %vm345_vm1, %v1554_v6 }
 0x295   :  { %3084 = vmatprep.mubr.f32.mxu0 %v3891_v41 }
 0x298   :  { %3166 = vmatmul.mubr.msk.f32.gmra.mrb[2].mxu0 %vm345_vm1, %v1571_v14 }
 0x299   :  { %3090 = vmatprep.mubr.f32.mxu0 %v3891_v41 }
 0x29c   :  { %3167 = vmatmul.mubr.msk.f32.gmra.mrb[4].mxu0 %vm345_vm1, %v1588_v13 }
 0x29d   :  { %3096 = vmatprep.mubr.f32.mxu0 %v3891_v41 }
 0x2a0   :  { %3168 = vmatmul.mubr.msk.f32.gmra.mrb[6].mxu0 %vm345_vm1, %v1605_v12 }
 0x2d8   :  { %v2545_v20 = vpop.f32.mrb[0].mxu1 }
 0x2d9   :  { %v2547_v52 = vpop.f32.mrb[1].mxu1 }
 0x2dc   :  { %v2551_v38 = vpop.f32.mrb[2].mxu1 }
 0x2dd   :  { %v2553_v5 = vpop.f32.mrb[3].mxu1 }
 0x2e0   :  { %v2557_v10 = vpop.f32.mrb[4].mxu1 }
 0x2e1   :  { %v2559_v46 = vpop.f32.mrb[5].mxu1 }
 0x2e4   :  { %v2563_v28 = vpop.f32.mrb[6].mxu1 }
 0x2e5   :  { %v2565_v45 = vpop.f32.mrb[7].mxu1 }
 0x2e8   :  { %v2569_v53 = vpop.f32.mrb[8].mxu1 }
 0x2e9   :  { %v2571_v0 = vpop.f32.mrb[9].mxu1 }
 0x2ec   :  { %v2575_v58 = vpop.f32.mrb[10].mxu1 }
 0x2ed   :  { %v2577_v31 = vpop.f32.mrb[11].mxu1 }
 0x2f0   :  { %v2581_v17 = vpop.f32.mrb[12].mxu1 }
 0x2f1   :  { %v2583_v3 = vpop.f32.mrb[13].mxu1 }
 0x317   :  { %v2997_v29 = vpop.f32.mrb[8].mxu0 }
 0x318   :  { %v3636_v1 = vadd.f32 %v2997_v29, %v2569_v53  ;;  %v2999_v48 = vpop.f32.mrb[9].mxu0 }
 0x319   :  { %v3638_v41 = vadd.f32 %v2999_v48, %v2571_v0 }
 0x31b   :  { %v3003_v36 = vpop.f32.mrb[10].mxu0 }
 0x31c   :  { %v3640_v7 = vadd.f32 %v3003_v36, %v2575_v58  ;;  %v3005_v49 = vpop.f32.mrb[11].mxu0 }
 0x31d   :  { %v3642_v56 = vadd.f32 %v3005_v49, %v2577_v31 }
 0x31f   :  { %v3009_v21 = vpop.f32.mrb[12].mxu0 }
 0x320   :  { %v3644_v39 = vadd.f32 %v3009_v21, %v2581_v17  ;;  %v3011_v55 = vpop.f32.mrb[13].mxu0 }
 0x321   :  { %v3646_v57 = vadd.f32 %v3011_v55, %v2583_v3 }
 0x338   :  { %v3104_v30 = vpop.f32.mrb[14].mxu1 }
 0x339   :  { %v3637_v23 = vadd.f32 %v3636_v1, %v3104_v30  ;;  %v3106_v4 = vpop.f32.mrb[15].mxu1 }
 0x33a   :  { %v3639_v61 = vadd.f32 %v3638_v41, %v3106_v4 }
 0x33b   :  { %3130 = vst [vmem:[%s7713_s4 + $0x40] sm:$0xff] %v3637_v23 }
 0x33c   :  { %3131 = vst.msk [vmem:[%s7713_s4 + $0x48] sm:$0xff] %vm3122_vm4, %v3639_v61  ;;  %v3110_v51 = vpop.f32.mrb[16].mxu1 }
 0x33d   :  { %v3641_v40 = vadd.f32 %v3640_v7, %v3110_v51  ;;  %v3112_v47 = vpop.f32.mrb[17].mxu1 }
 0x33e   :  { %v3643_v11 = vadd.f32 %v3642_v56, %v3112_v47 }
 0x33f   :  { %3132 = vst [vmem:[%s7713_s4 + $0x50] sm:$0xff] %v3641_v40 }
 0x340   :  { %3133 = vst.msk [vmem:[%s7713_s4 + $0x58] sm:$0xff] %vm3122_vm4, %v3643_v11  ;;  %v3116_v25 = vpop.f32.mrb[18].mxu1 }
 0x341   :  { %v3645_v63 = vadd.f32 %v3644_v39, %v3116_v25  ;;  %v3118_v54 = vpop.f32.mrb[19].mxu1 }
 0x342   :  { %v3647_v37 = vadd.f32 %v3646_v57, %v3118_v54 }
 0x343   :  { %3134 = vst [vmem:[%s7713_s4 + $0x60] sm:$0x1] %v3645_v63 }
 0x344   :  { %3136 = vst.msk [vmem:[%s7713_s4 + $0x68] sm:$0x1] %vm3135_vm5, %v3647_v37 }
 0x367   :  { %v3080_v59 = vpop.f32.mrb[0].mxu0 }
 0x368   :  { %v3628_v2 = vadd.f32 %v3080_v59, %v2545_v20  ;;  %v3082_v35 = vpop.f32.mrb[1].mxu0 }
 0x369   :  { %v3629_v42 = vadd.f32 %v3082_v35, %v2547_v52 }
 0x36a   :  { %3121 = vst [vmem:[%s7713_s4] sm:$0xff] %v3628_v2 }
 0x36b   :  { %3123 = vst.msk [vmem:[%s7713_s4 + $0x8] sm:$0xff] %vm3122_vm4, %v3629_v42  ;;  %v3086_v44 = vpop.f32.mrb[2].mxu0 }
 0x36c   :  { %v3630_v62 = vadd.f32 %v3086_v44, %v2551_v38  ;;  %v3088_v34 = vpop.f32.mrb[3].mxu0 }
 0x36d   :  { %v3631_v33 = vadd.f32 %v3088_v34, %v2553_v5 }
 0x36e   :  { %3124 = vst [vmem:[%s7713_s4 + $0x10] sm:$0xff] %v3630_v62 }
 0x36f   :  { %3125 = vst.msk [vmem:[%s7713_s4 + $0x18] sm:$0xff] %vm3122_vm4, %v3631_v33  ;;  %v3092_v9 = vpop.f32.mrb[4].mxu0 }
 0x370   :  { %v3632_v60 = vadd.f32 %v3092_v9, %v2557_v10  ;;  %v3094_v18 = vpop.f32.mrb[5].mxu0 }
 0x371   :  { %v3633_v24 = vadd.f32 %v3094_v18, %v2559_v46 }
 0x372   :  { %3126 = vst [vmem:[%s7713_s4 + $0x20] sm:$0xff] %v3632_v60 }
 0x373   :  { %3127 = vst.msk [vmem:[%s7713_s4 + $0x28] sm:$0xff] %vm3122_vm4, %v3633_v24  ;;  %v3098_v50 = vpop.f32.mrb[6].mxu0 }
 0x374   :  { %v3634_v8 = vadd.f32 %v3098_v50, %v2563_v28  ;;  %v3100_v32 = vpop.f32.mrb[7].mxu0 }
 0x375   :  { %v3635_v16 = vadd.f32 %v3100_v32, %v2565_v45 }
 0x376   :  { %3128 = vst [vmem:[%s7713_s4 + $0x30] sm:$0xff] %v3634_v8 }
 0x377   :  { %3129 = vst.msk [vmem:[%s7713_s4 + $0x38] sm:$0xff] %vm3122_vm4, %v3635_v16 }

</bundles_post_ra>
